<compile_context>
chip_gen: v7x
topology: tpu7x:2x2x1
jax: 0.10.0
libtpu: 0.0.40
codegen_flags: <defaults>
</compile_context>

<pallas_src>
import jax
import jax.numpy as jnp
from jax.experimental import pallas as pl
from jax.experimental.pallas import tpu as pltpu


def _generator_kernel(x_ref, w1_ref, b1_ref, w2_ref, b2_ref, o_ref):
    # In-kernel f32 -> bf16 casts (VPU work, hidden under the MXU); f32 accumulate.
    x = x_ref[...].astype(jnp.bfloat16)
    w1 = w1_ref[...].astype(jnp.bfloat16)
    h = jnp.dot(x, w1, preferred_element_type=jnp.float32)
    h = h + b1_ref[...]                        # b1 is (1, H) -> broadcast over rows
    # LeakyReLU(negative_slope=0.2) in f32 (v5e VPU has no bf16).
    h = jnp.where(h > 0, h, 0.2 * h)
    # Dropout(0.1): eval-mode identity (see TODO at top of file).
    w2 = w2_ref[...].astype(jnp.bfloat16)
    out = jnp.dot(h.astype(jnp.bfloat16), w2, preferred_element_type=jnp.float32)
    out = out + b2_ref[...]                    # b2 is (1, O), f32
    o_ref[...] = out.astype(o_ref.dtype)


def _round_up(x, m):
    return (x + m - 1) // m * m


def _choose_tile_b(B, max_tile=1024):
    """Batch tile: >=2 balanced blocks when possible (v7x has 2 TensorCores),
    rounded up to the 8-row sublane, capped at max_tile rows per step."""
    if B <= 16:
        return B                       # single full-extent block
    half = _round_up(pl.cdiv(B, 2), 8)
    return max(8, min(max_tile, half))


def generator_forward(noise, w1, b1, w2, b2, *, max_tile_b=1024, out_dtype=jnp.float32):
    """Fused Generator forward pass as a single Pallas TPU kernel.

    noise: [B, K]  float32 (cast to bf16 inside the kernel)
    w1:    [K, H]  float32 (cast to bf16 inside the kernel)
    b1:    [1, H]  float32
    w2:    [H, O]  float32 (cast to bf16 inside the kernel)
    b2:    [1, O]  float32
    returns [B, O] out_dtype (default float32; pass bf16 to halve output HBM traffic)
    """
    B, K = noise.shape
    H = w1.shape[1]
    O = w2.shape[1]
    out_bytes = jnp.dtype(out_dtype).itemsize

    tile_b = _choose_tile_b(B, max_tile_b)
    n_tiles = pl.cdiv(B, tile_b)       # ragged last block is masked by Pallas

    # --- VMEM budget (double-buffered tiles + resident f32 params, x2 buffers) ---
    act_tile_bytes = 2 * tile_b * K * 4
    out_tile_bytes = 2 * tile_b * O * out_bytes
    weight_resident = 2 * 4 * (K * H + H + H * O + O)
    vmem_needed = act_tile_bytes + out_tile_bytes + weight_resident
    if vmem_needed > (56 << 20):       # leave headroom below v7x's 64 MiB per-TC VMEM
        # TODO(synk): fall back to a K/H reduction grid axis ("arbitrary") + accumulator
        # scratch for hidden sizes whose resident weights exceed the v7x budget.
        raise ValueError(
            f"Generator kernel VMEM estimate {vmem_needed >> 20} MiB exceeds the "
            "v7x per-TensorCore budget; tile the contraction dimension instead.")
    vmem_limit = min(max(2 * vmem_needed, 32 << 20), 64 << 20)

    flops = 2 * B * (K * H + H * O)
    bytes_accessed = (B * K * 4) + 4 * (K * H + H + H * O + O) + (B * O * out_bytes)

    return pl.pallas_call(
        _generator_kernel,
        out_shape=jax.ShapeDtypeStruct((B, O), out_dtype),
        grid_spec=pltpu.PrefetchScalarGridSpec(
            num_scalar_prefetch=0,
            grid=(n_tiles,),
            in_specs=[
                # Activations: tiled over batch.
                pl.BlockSpec((tile_b, K), lambda i: (i, 0)),
                # Weights / biases: same block every step -> VMEM-resident.
                pl.BlockSpec((K, H), lambda i: (0, 0)),
                pl.BlockSpec((1, H), lambda i: (0, 0)),
                pl.BlockSpec((H, O), lambda i: (0, 0)),
                pl.BlockSpec((1, O), lambda i: (0, 0)),
            ],
            out_specs=pl.BlockSpec((tile_b, O), lambda i: (i, 0)),
        ),
        compiler_params=pltpu.CompilerParams(
            dimension_semantics=("parallel",),
            vmem_limit_bytes=vmem_limit,
        ),
        cost_estimate=pl.CostEstimate(
            flops=flops, transcendentals=0, bytes_accessed=bytes_accessed
        ),
    )(noise, w1, b1, w2, b2)


def init_generator_params(key, noise_size, hidden_size, output_size):
    """Deterministic init mimicking nn.Linear's uniform(-1/sqrt(fan_in), 1/sqrt(fan_in))."""
    k1, k2, k3, k4 = jax.random.split(key, 4)
    bound1 = 1.0 / jnp.sqrt(noise_size)
    bound2 = 1.0 / jnp.sqrt(hidden_size)
    w1 = jax.random.uniform(k1, (noise_size, hidden_size), jnp.float32, -bound1, bound1)
    b1 = jax.random.uniform(k2, (1, hidden_size), jnp.float32, -bound1, bound1)
    w2 = jax.random.uniform(k3, (hidden_size, output_size), jnp.float32, -bound2, bound2)
    b2 = jax.random.uniform(k4, (1, output_size), jnp.float32, -bound2, bound2)
    return w1, b1, w2, b2


def _reference_forward(noise, w1, b1, w2, b2):
    """Plain-JAX reference with the same bf16-matmul / f32-accumulate semantics."""
    h = jnp.dot(noise.astype(jnp.bfloat16), w1.astype(jnp.bfloat16),
                preferred_element_type=jnp.float32) + b1
    h = jnp.where(h > 0, h, 0.2 * h)
    out = jnp.dot(h.astype(jnp.bfloat16), w2.astype(jnp.bfloat16),
                  preferred_element_type=jnp.float32) + b2
    return out


if __name__ == "__main__":
    # Lane-dense feature dims (multiples of 128) matching the module defaults
    # (hidden_sizes=[512], output_size=512; noise 100 -> 128 for lane density).
    batch = 512
    noise_size = 128
    hidden_size = 512
    output_size = 512

    key = jax.random.PRNGKey(0)
    k_noise, k_params = jax.random.split(key)

    noise = jax.random.normal(k_noise, (batch, noise_size), dtype=jnp.float32)
    w1, b1, w2, b2 = init_generator_params(k_params, noise_size, hidden_size, output_size)

    out = generator_forward(noise, w1, b1, w2, b2)
    out = jax.block_until_ready(out)

    ref = _reference_forward(noise, w1, b1, w2, b2)
    assert out.shape == (batch, output_size)
    assert out.dtype == jnp.float32
    assert jnp.allclose(out, ref, atol=1e-2, rtol=1e-2), float(jnp.max(jnp.abs(out - ref)))

    # Ragged batch (not a multiple of the tile): no wrapper pad / slice, the last
    # grid block's store is masked by Pallas.
    noise_r = noise[:200]
    out_r = jax.block_until_ready(generator_forward(noise_r, w1, b1, w2, b2))
    ref_r = _reference_forward(noise_r, w1, b1, w2, b2)
    assert out_r.shape == (200, output_size)
    assert jnp.allclose(out_r, ref_r, atol=1e-2, rtol=1e-2), float(jnp.max(jnp.abs(out_r - ref_r)))

    print("KERNEL_OK")
</pallas_src>

<mosaic_0001>
module attributes {stable_mosaic.version = 11 : i64} {
  func.func @_generator_kernel(%arg0: i32, %arg1: memref<256x128xf32, #tpu.memory_space<vmem>>, %arg2: memref<128x512xf32, #tpu.memory_space<vmem>>, %arg3: memref<1x512xf32, #tpu.memory_space<vmem>>, %arg4: memref<512x512xf32, #tpu.memory_space<vmem>>, %arg5: memref<1x512xf32, #tpu.memory_space<vmem>>, %arg6: memref<256x512xf32, #tpu.memory_space<vmem>>) attributes {dimension_semantics = [#tpu.dimension_semantics<parallel>], iteration_bounds = array<i64: 2>, scalar_prefetch = 0 : i64, scratch_operands = 0 : i64, tpu.core_type = #tpu.core_type<tc>, window_params = [{transform_indices = @transform_0, window_bounds = array<i64: 256, 128>}, {pipeline_mode = #tpu.pipeline_mode<synchronous>, transform_indices = @transform_1, window_bounds = array<i64: 128, 512>}, {pipeline_mode = #tpu.pipeline_mode<synchronous>, transform_indices = @transform_2, window_bounds = array<i64: 1, 512>}, {pipeline_mode = #tpu.pipeline_mode<synchronous>, transform_indices = @transform_3, window_bounds = array<i64: 512, 512>}, {pipeline_mode = #tpu.pipeline_mode<synchronous>, transform_indices = @transform_4, window_bounds = array<i64: 1, 512>}, {transform_indices = @transform_5, window_bounds = array<i64: 256, 512>}]} {
    %c0 = arith.constant 0 : index
    %c0_0 = arith.constant 0 : index
    %0 = vector.load %arg1[%c0, %c0_0] : memref<256x128xf32, #tpu.memory_space<vmem>>, vector<256x128xf32>
    %1 = arith.truncf %0 : vector<256x128xf32> to vector<256x128xbf16>
    %c0_1 = arith.constant 0 : index
    %c0_2 = arith.constant 0 : index
    %2 = vector.load %arg2[%c0_1, %c0_2] : memref<128x512xf32, #tpu.memory_space<vmem>>, vector<128x512xf32>
    %3 = arith.truncf %2 : vector<128x512xf32> to vector<128x512xbf16>
    %cst = arith.constant dense<0.000000e+00> : vector<256x512xf32>
    %4 = tpu.matmul %1, %3, %cst {dimension_numbers = #tpu.dot_dimension_numbers<[1], [0], [0], [1], [0, 0, 1, 1], [], []>} : vector<256x128xbf16>, vector<128x512xbf16>, vector<256x512xf32> -> vector<256x512xf32>
    %c0_3 = arith.constant 0 : index
    %c0_4 = arith.constant 0 : index
    %5 = vector.load %arg3[%c0_3, %c0_4] : memref<1x512xf32, #tpu.memory_space<vmem>>, vector<1x512xf32>
    %6 = vector.broadcast %5 : vector<1x512xf32> to vector<256x512xf32>
    %7 = arith.addf %4, %6 : vector<256x512xf32>
    %cst_5 = arith.constant 0.000000e+00 : f32
    %8 = vector.broadcast %cst_5 : f32 to vector<256x512xf32>
    %9 = arith.cmpf ogt, %7, %8 : vector<256x512xf32>
    %cst_6 = arith.constant 2.000000e-01 : f32
    %10 = vector.broadcast %cst_6 : f32 to vector<256x512xf32>
    %11 = arith.mulf %10, %7 : vector<256x512xf32>
    %12 = arith.select %9, %7, %11 : vector<256x512xi1>, vector<256x512xf32>
    %c0_7 = arith.constant 0 : index
    %c0_8 = arith.constant 0 : index
    %13 = vector.load %arg4[%c0_7, %c0_8] : memref<512x512xf32, #tpu.memory_space<vmem>>, vector<512x512xf32>
    %14 = arith.truncf %13 : vector<512x512xf32> to vector<512x512xbf16>
    %15 = arith.truncf %12 : vector<256x512xf32> to vector<256x512xbf16>
    %cst_9 = arith.constant dense<0.000000e+00> : vector<256x512xf32>
    %16 = tpu.matmul %15, %14, %cst_9 {dimension_numbers = #tpu.dot_dimension_numbers<[1], [0], [0], [1], [0, 0, 1, 1], [], []>} : vector<256x512xbf16>, vector<512x512xbf16>, vector<256x512xf32> -> vector<256x512xf32>
    %c0_10 = arith.constant 0 : index
    %c0_11 = arith.constant 0 : index
    %17 = vector.load %arg5[%c0_10, %c0_11] : memref<1x512xf32, #tpu.memory_space<vmem>>, vector<1x512xf32>
    %18 = vector.broadcast %17 : vector<1x512xf32> to vector<256x512xf32>
    %19 = arith.addf %16, %18 : vector<256x512xf32>
    %c0_12 = arith.constant 0 : index
    %c0_13 = arith.constant 0 : index
    %20 = vector.load %arg6[%c0_12, %c0_13] : memref<256x512xf32, #tpu.memory_space<vmem>>, vector<256x512xf32>
    tpu.vector_store %arg6[%c0_12, %c0_13], %19 {strides = array<i32>} : memref<256x512xf32, #tpu.memory_space<vmem>>, vector<256x512xf32>,
    return
  }
  func.func @transform_0(%arg0: i32) -> (i32, i32) {
    %c0_i32 = arith.constant 0 : i32
    %c0_i32_0 = arith.constant 0 : i32
    return %arg0, %c0_i32 : i32, i32
  }
  func.func @transform_1(%arg0: i32) -> (i32, i32) {
    %c0_i32 = arith.constant 0 : i32
    %c0_i32_0 = arith.constant 0 : i32
    %c0_i32_1 = arith.constant 0 : i32
    return %c0_i32, %c0_i32_0 : i32, i32
  }
  func.func @transform_2(%arg0: i32) -> (i32, i32) {
    %c0_i32 = arith.constant 0 : i32
    %c0_i32_0 = arith.constant 0 : i32
    %c0_i32_1 = arith.constant 0 : i32
    return %c0_i32, %c0_i32_0 : i32, i32
  }
  func.func @transform_3(%arg0: i32) -> (i32, i32) {
    %c0_i32 = arith.constant 0 : i32
    %c0_i32_0 = arith.constant 0 : i32
    %c0_i32_1 = arith.constant 0 : i32
    return %c0_i32, %c0_i32_0 : i32, i32
  }
  func.func @transform_4(%arg0: i32) -> (i32, i32) {
    %c0_i32 = arith.constant 0 : i32
    %c0_i32_0 = arith.constant 0 : i32
    %c0_i32_1 = arith.constant 0 : i32
    return %c0_i32, %c0_i32_0 : i32, i32
  }
  func.func @transform_5(%arg0: i32) -> (i32, i32) {
    %c0_i32 = arith.constant 0 : i32
    %c0_i32_0 = arith.constant 0 : i32
    return %arg0, %c0_i32 : i32, i32
  }
}

</mosaic_0001>

<bundles_post_ra>
// kernel: tpu_custom_call.1
= control target key start
LH: loop header
LB: loop body
LE: loop exit
PB: predicated region body
PF: predicated region fallthrough
CT: control target
= control target key end

     0   :  { %10 = vsyncpa [#allocation3], 0  ;;  %s5395_s0 = inlined_call_operand.hbm [shape: f32[512,128], index: 0, kind: input, shape index: {}]   ;;  %s5396_s1 = inlined_call_operand.hbm [shape: f32[128,512], index: 1, kind: input, shape index: {}]   ;;  %s5397_s2 = inlined_call_operand.vmem [shape: f32[1,512], index: 2, kind: input, shape index: {}]   ;;  %s5398_s3 = inlined_call_operand.hbm [shape: f32[512,512], index: 3, kind: input, shape index: {}]   ;;  %s5399_s4 = inlined_call_operand.vmem [shape: f32[1,512], index: 4, kind: input, shape index: {}]   ;;  %s5400_s5 = inlined_call_operand.hbm [shape: f32[512,512], index: 5, kind: output, shape index: {}]  }
   0x1   :  { %12 = vsyncpa [#allocation3 + $0x1], 0 }
   0x2   :  { %13 = vsyncpa [#allocation6], 0 }
   0x3   :  { %14 = vsyncpa [#allocation4], 0 }
   0x4   :  { %16 = vsyncpa [#allocation4 + $0x1], 0  ;;  %s3239_s18 = smov 0   ;;  %s3241_s19 = smov 0  }
   0x5   :  { %s3243_s20 = smov 0   ;;  %s3245_s21 = smov 0  }
   0x6 LB: > { %s3260_s22 = sadd.s32 4294967295, %s3196_s21   ;;  %s2688_s23 = sadd.s32 4294967294, %s3196_s21   ;;  %s3196_s21 = sphi %s3245_s21, %s5549_s21   ;;  %s3192_s20 = sphi %s3243_s20, %s5548_s20   ;;  %s3188_s19 = sphi %s3241_s19, %s5547_s19   ;;  %s3184_s18 = sphi %s3239_s18, %s5546_s18  }
   0x7   : > { %p42_p0 = scmp.ne.s32.totalorder %s3188_s19, %s3184_s18  ;;  %p5401_p1 = scmp.eq.s32.totalorder %s3260_s22, 0 }
   0x8   : > { %p156_p3 = scmp.eq.s32.totalorder %s2688_s23, 1  ;;  %p2689_p5 = scmp.ge.s32.totalorder %s3196_s21, 1 }
   0x9   : > { %p3269_p4 = por %p5401_p1, %p42_p0  ;;  %p163_p7 = scmp.lt.s32.totalorder %s3196_s21, 3 }
   0xa   : > { %p3274_p6 = por %p156_p3, %p42_p0  ;;  %s3198_s27 = smov [#allocation5]  }
   0xb   : > { %s5422_s24 = scalar_select %p3269_p4, 1, 0 }
   0xc   : > { %s5423_s25 = scalar_select %p3274_p6, 1, 0 }
   0xd   : > { %p3279_p8 = pnand %p2689_p5, %p163_p7  ;;  %s175_s28 = sshll.u32 %s3198_s27, 4  ;;  %s3283_s28 = int_to_ptr.vmem [resolvable:$true] %s175_s28 }
   0xe   : > { %s3199_s30 = smov [#allocation7]   ;;  %s3040_s9 = scalar_lea.hbm %s5396_s1, 8192 }
   0xf   : > { %p2978_p9 = pneg %p3279_p8  ;;  %s191_s6 = sshll.u32 %s3199_s30, 4  ;;  %s3294_s6 = int_to_ptr.vmem [resolvable:$true] %s191_s6 }
  0x10   : > { %p3041_p12 = scmp.ne.s32.totalorder %s5396_s1, %s3040_s9  ;;  %p3047_p5 = scmp.lt.u32.totalorder %s3040_s9, %s5396_s1 }
  0x11   : > { %p3290_p11 = pnand %p2978_p9, %p5401_p1 }
  0x13   : > { %p3042_p13 = pneg %p3290_p11 }
  0x15   : > { %p3043_p0 = pnand %p3042_p13, %p3041_p12 }
  0x17   : > { %p3044_p3 = pneg %p3043_p0 }
  0x19   : > { %p3049_p7 = pnand %p3047_p5, %p3044_p3 }
  0x1b   : > { %3052 = shalt.err (!%p3049_p7)
}
  0x1c   : > { %s3053_s14 = scalar_lea.vmem %s3283_s28, 8192  ;;  %p3061_p2 = scmp.lt.s32.totalorder %s3283_s28, %s3283_s28 }
  0x1d   : > { %p3054_p9 = scmp.ne.s32.totalorder %s3283_s28, %s3053_s14  ;;  %p3062_p12 = scmp.lt.s32.totalorder %s3053_s14, %s3053_s14 }
  0x1f   : > { %p3056_p10 = pnand %p3054_p9, %p3042_p13  ;;  %p3063_p0 = por %p3062_p12, %p3061_p2 }
  0x21   : > { %p3057_p1 = pneg %p3056_p10 }
  0x23   : > { %p3064_p6 = pnand %p3063_p0, %p3057_p1 }
  0x25   : > { %3067 = shalt.err (!%p3064_p6)
}
  0x26   : > { %s3200_s15 = smov 512   ;;  %s3201_s16 = smov 32  }
  0x27   : > { %2981 = dma.hbm_to_vmem [thread:$0]  (!%p3290_p11), %s5396_s1, 8192, %s3283_s28, [#allocation6], %s3200_s15, %s3200_s15, %s3201_s16  }
  0x28   : > { %s3068_s7 = scalar_lea.hbm %s5398_s3, 32768 }
  0x29   : > { %p3069_p2 = scmp.ne.s32.totalorder %s5398_s3, %s3068_s7  ;;  %p3075_p10 = scmp.lt.u32.totalorder %s3068_s7, %s5398_s3 }
  0x2b   : > { %p3071_p1 = pnand %p3069_p2, %p3042_p13 }
  0x2d   : > { %p3072_p6 = pneg %p3071_p1 }
  0x2f   : > { %p3077_p3 = pnand %p3075_p10, %p3072_p6 }
  0x31   : > { %3080 = shalt.err (!%p3077_p3)
}
  0x32   : > { %s3081_s28 = scalar_lea.vmem %s3294_s6, 32768  ;;  %p3089_p12 = scmp.lt.s32.totalorder %s3294_s6, %s3294_s6 }
  0x33   : > { %p3082_p5 = scmp.ne.s32.totalorder %s3294_s6, %s3081_s28  ;;  %p3090_p0 = scmp.lt.s32.totalorder %s3081_s28, %s3081_s28 }
  0x35   : > { %p3084_p7 = pnand %p3082_p5, %p3042_p13  ;;  %p3091_p2 = por %p3090_p0, %p3089_p12 }
  0x37   : > { %p3085_p9 = pneg %p3084_p7 }
  0x39   : > { %p3092_p1 = pnand %p3091_p2, %p3085_p9 }
  0x3b   : > { %3095 = shalt.err (!%p3092_p1)
}
  0x3c   : > { %2984 = dma.hbm_to_vmem [thread:$0]  (!%p3290_p11), %s5398_s3, 32768, %s3294_s6, [#allocation6], %s3200_s15, %s3200_s15, %s3201_s16  }
  0x3d   : > { %s3349_s14 = sadd.s32 1, %s3196_s21   ;;  %s29_s29 = sadd.s32 1, %s3192_s20 }
  0x3e   : > { %s26_s17 = ssub.s32 %s3196_s21, %s3349_s14  ;;  %p36_p13 = scmp.ne.s32.totalorder %s3192_s20, %s3188_s19 }
  0x3f   : > { %p27_p6 = scmp.eq.s32.totalorder %s26_s17, 0  ;;  %p37_p10 = scmp.eq.s32.totalorder %s3196_s21, 0 }
  0x40   : > { %p5426_p3 = scmp.eq.s32.totalorder %s3260_s22, 1  ;;  %p2995_p7 = scmp.lt.s32.totalorder %s3196_s21, 2 }
  0x41   : > { %s3365_s27 = scalar_select %p27_p6, %s3192_s20, %s29_s29  }
  0x42   : > { %p3359_p5 = por %p5426_p3, %p36_p13  ;;  %p38_p9 = por %p37_p10, %p36_p13 }
  0x43   : > { %s208_s30 = sand.u32 1, %s3192_s20   ;;  %s2707_s6 = sshll.u32 %s3196_s21, 12 }
  0x44   : > { %s5427_s23 = scalar_select %p3359_p5, 1, 0 }
  0x45   : > { %s2693_s7 = sshll.u32 %s208_s30, 8  ;;  %s3372_s8 = scalar_lea.hbm %s5395_s0, %s2707_s6 }
  0x46   : > { %s212_s9 = scalar_lea.vmem [#allocation2], %s2693_s7  ;;  %p3376_p11 = pnand %p2995_p7, %p38_p9 }
  0x47   : > { %s219_s10 = sshll.u32 %s212_s9, 4  ;;  %s3380_s28 = scalar_lea.sflag [#allocation3], %s208_s30  ;;  %s3374_s10 = int_to_ptr.vmem [resolvable:$true] %s219_s10 }
  0x48   : > { %s3096_s12 = scalar_lea.hbm %s3372_s8, 4096  ;;  %p3098_p0 = pneg %p3376_p11 }
  0x49   : > { %p3097_p12 = scmp.ne.s32.totalorder %s3372_s8, %s3096_s12  ;;  %s3101_s17 = scalar_lea.hbm %s5395_s0, 8192 }
  0x4a   : > { %p3102_p13 = scmp.lt.u32.totalorder %s3372_s8, %s5395_s0  ;;  %p3103_p6 = scmp.lt.u32.totalorder %s3101_s17, %s3096_s12 }
  0x4b   : > { %p3099_p2 = pnand %p3098_p0, %p3097_p12  ;;  %p3105_p3 = scmp.lt.u32.totalorder %s3096_s12, %s3372_s8 }
  0x4c   : > { %p3104_p10 = por %p3103_p6, %p3102_p13 }
  0x4d   : > { %p3100_p1 = pneg %p3099_p2 }
  0x4e   : > { %p3106_p7 = por %p3105_p3, %p3104_p10 }
  0x50   : > { %p3107_p9 = pnand %p3106_p7, %p3100_p1 }
  0x52   : > { %3110 = shalt.err (!%p3107_p9)
}
  0x53   : > { %s3111_s30 = scalar_lea.vmem %s3374_s10, 4096  ;;  %s3202_s15 = smov [#allocation2]  }
  0x54   : > { %p3112_p12 = scmp.ne.s32.totalorder %s3374_s10, %s3111_s30  ;;  %s3116_s16 = sshll.u32 %s3202_s15, 4  ;;  %s3117_s16 = int_to_ptr.vmem [resolvable:$false] %s3116_s16 }
  0x55   : > { %s3118_s9 = scalar_lea.vmem %s3117_s16, 8192  ;;  %p3119_p4 = scmp.lt.s32.totalorder %s3374_s10, %s3117_s16 }
  0x56   : > { %p3114_p2 = pnand %p3112_p12, %p3098_p0  ;;  %p3120_p13 = scmp.lt.s32.totalorder %s3118_s9, %s3111_s30 }
  0x58   : > { %p3115_p5 = pneg %p3114_p2  ;;  %p3121_p6 = por %p3120_p13, %p3119_p4 }
  0x5a   : > { %p3122_p10 = pnand %p3121_p6, %p3115_p5 }
  0x5c   : > { %3125 = shalt.err (!%p3122_p10)
}
  0x5d   : > { %s3203_s12 = smov 128   ;;  %s3204_s13 = smov 8  }
  0x5e   : > { %2988 = dma.hbm_to_vmem [thread:$0]  (!%p3376_p11), %s3372_s8, 4096, %s3374_s10, %s3380_s28, %s3203_s12, %s3203_s12, %s3204_s13  }
  0x5f   : > { %231 = sbr.rel (%p3279_p8) target bundleno = 860 (0x35c), region = 40 }
  0x66   : > { %s3411_s29 = sand.u32 1, %s3188_s19   ;;  %p5429_p4 = scmp.ne.s32.totalorder %s5422_s24, 0 }
  0x67   : > { %s2697_s17 = sshll.u32 %s3411_s29, 8  ;;  %s234_s7 = scalar_lea.sflag [#allocation3], %s3411_s29 }
  0x68   : > { %s3415_s6 = scalar_lea.vmem [#allocation2], %s2697_s17 }
  0x69   : > { %3171 = dma.done.wait (%p5429_p4), %s234_s7, 4096  }
  0x6a   : > { %3173 = vsyncadd (%p5429_p4), %s234_s7, 4294963200  ;;  %p5430_p5 = scmp.eq.s32.totalorder %s3260_s22, 0 }
  0x6c   : > { %3175 = dma.done.wait (%p5430_p5), [#allocation6], 40960   ;;  %p5431_p8 = pmov %p5430_p5 }
  0x6d   : > { %v3205_v0 = vmov 0   ;;  %v324_v1 = vld [vmem:[#allocation5 + $0x8] sm:$0xff]  ;;  %v323_v3 = vld [vmem:[#allocation5] sm:$0xff]  ;;  %v326_v36 = vld [vmem:[#allocation5 + $0x18] sm:$0xff]  ;;  %s2700_s11 = sshll.u32 %s3411_s29, 10  ;;  %s2709_s30 = sshll.u32 %s3260_s22, 14 }
  0x6e   : > { %3177 = vsyncadd (%p5431_p8), [#allocation6], 4294926336  ;;  %473 = vmatprep.mubr.bf16.mxu0 %v3205_v0  ;;  %666 = vmatprep.mubr.bf16.mxu1 %v3205_v0  ;;  %v328_v2 = vld [vmem:[#allocation5 + $0x28] sm:$0xff]  ;;  %v327_v5 = vld [vmem:[#allocation5 + $0x20] sm:$0xff]  ;;  %s5090_s28 = scalar_lea.vmem [#allocation8], %s2700_s11  ;;  %s5341_s9 = scalar_lea.hbm %s5400_s5, %s2709_s30 }
  0x6f   : > { %v388_v4 = vpack.c.bf16 %v328_v2, %v324_v1  ;;  %v332_v6 = vld [vmem:[#allocation5 + $0x48] sm:$0xff]  ;;  %v387_v8 = vpack.c.bf16 %v327_v5, %v323_v3  ;;  %v331_v10 = vld [vmem:[#allocation5 + $0x40] sm:$0xff]  ;;  %v330_v37 = vld [vmem:[#allocation5 + $0x38] sm:$0xff]  ;;  %s2596_s15 = sshll.u32 %s5090_s28, 4  ;;  %s2582_s12 = scalar_lea.sflag [#allocation4], %s3411_s29  ;;  %s5343_s15 = int_to_ptr.vmem [resolvable:$true] %s2596_s15 }
  0x70   : > { %v336_v7 = vld [vmem:[#allocation5 + $0x68] sm:$0xff]  ;;  %v335_v11 = vld [vmem:[#allocation5 + $0x60] sm:$0xff]  ;;  %v325_v38 = vld [vmem:[#allocation5 + $0x10] sm:$0xff]  ;;  %v390_v40 = vpack.c.bf16 %v330_v37, %v326_v36  ;;  %s3126_s13 = scalar_lea.vmem %s5343_s15, 16384  ;;  %p5543_p0 = scmp.ne.s32.totalorder %s5427_s23, 0 }
  0x71   : > { %v392_v9 = vpack.c.bf16 %v336_v7, %v332_v6  ;;  %v340_v12 = vld [vmem:[#allocation5 + $0x88] sm:$0xff]  ;;  %441 = vmatprep.subr.bf16.mxu0 %v388_v4  ;;  %v391_v14 = vpack.c.bf16 %v335_v11, %v331_v10  ;;  %v339_v16 = vld [vmem:[#allocation5 + $0x80] sm:$0xff]  ;;  %v329_v41 = vld [vmem:[#allocation5 + $0x30] sm:$0xff]  ;;  %p3127_p11 = scmp.ne.s32.totalorder %s5343_s15, %s3126_s13  ;;  %s3206_s17 = smov [#allocation8]  }
  0x72   : > { %v344_v13 = vld [vmem:[#allocation5 + $0xa8] sm:$0xff]  ;;  %442 = vmatpush1.bf16.msra.mxu0 %v387_v8  ;;  %v343_v17 = vld [vmem:[#allocation5 + $0xa0] sm:$0xff]  ;;  %v334_v42 = vld [vmem:[#allocation5 + $0x58] sm:$0xff]  ;;  %v389_v45 = vpack.c.bf16 %v329_v41, %v325_v38  ;;  %634 = vmatprep.subr.bf16.mxu1 %v390_v40  ;;  %s3130_s7 = sshll.u32 %s3206_s17, 4  ;;  %s3131_s7 = int_to_ptr.vmem [resolvable:$false] %s3130_s7 }
  0x73   : > { %443 = vmatprep.subr.bf16.mxu0 %v392_v9  ;;  %v396_v15 = vpack.c.bf16 %v344_v13, %v340_v12  ;;  %v348_v18 = vld [vmem:[#allocation5 + $0xc8] sm:$0xff]  ;;  %v395_v20 = vpack.c.bf16 %v343_v17, %v339_v16  ;;  %v347_v22 = vld [vmem:[#allocation5 + $0xc0] sm:$0xff]  ;;  %v338_v43 = vld [vmem:[#allocation5 + $0x78] sm:$0xff]  ;;  %p3128_p1 = pnand %p3127_p11, %p5543_p0  ;;  %p3133_p7 = scmp.lt.s32.totalorder %s5343_s15, %s3131_s7 }
  0x74   : > { %v352_v19 = vld [vmem:[#allocation5 + $0xe8] sm:$0xff]  ;;  %v351_v23 = vld [vmem:[#allocation5 + $0xe0] sm:$0xff]  ;;  %v394_v46 = vpack.c.bf16 %v338_v43, %v334_v42  ;;  %v333_v47 = vld [vmem:[#allocation5 + $0x50] sm:$0xff]  ;;  %635 = vmatpush1.bf16.msra.mxu1 %v389_v45 }
  0x75   : > { %v400_v21 = vpack.c.bf16 %v352_v19, %v348_v18  ;;  %v356_v24 = vld [vmem:[#allocation5 + $0x108] sm:$0xff]  ;;  %v399_v26 = vpack.c.bf16 %v351_v23, %v347_v22  ;;  %v355_v28 = vld [vmem:[#allocation5 + $0x100] sm:$0xff]  ;;  %v337_v48 = vld [vmem:[#allocation5 + $0x70] sm:$0xff]  ;;  %p3129_p3 = pneg %p3128_p1 }
  0x76   : > { %444 = vmatpush1.bf16.msra.mxu0 %v391_v14  ;;  %v360_v25 = vld [vmem:[#allocation5 + $0x128] sm:$0xff]  ;;  %v359_v29 = vld [vmem:[#allocation5 + $0x120] sm:$0xff]  ;;  %v342_v49 = vld [vmem:[#allocation5 + $0x98] sm:$0xff]  ;;  %v393_v54 = vpack.c.bf16 %v337_v48, %v333_v47  ;;  %636 = vmatprep.subr.bf16.mxu1 %v394_v46 }
  0x77   : > { %445 = vmatprep.subr.bf16.mxu0 %v396_v15  ;;  %v404_v27 = vpack.c.bf16 %v360_v25, %v356_v24  ;;  %v364_v30 = vld [vmem:[#allocation5 + $0x148] sm:$0xff]  ;;  %v363_v32 = vld [vmem:[#allocation5 + $0x140] sm:$0xff]  ;;  %v403_v34 = vpack.c.bf16 %v359_v29, %v355_v28  ;;  %v346_v50 = vld [vmem:[#allocation5 + $0xb8] sm:$0xff] }
  0x78   : > { %v368_v31 = vld [vmem:[#allocation5 + $0x168] sm:$0xff]  ;;  %v367_v33 = vld [vmem:[#allocation5 + $0x160] sm:$0xff]  ;;  %v398_v57 = vpack.c.bf16 %v346_v50, %v342_v49  ;;  %v341_v58 = vld [vmem:[#allocation5 + $0x90] sm:$0xff]  ;;  %637 = vmatpush1.bf16.msra.mxu1 %v393_v54 }
  0x79   : > { %v372_v35 = vld [vmem:[#allocation5 + $0x188] sm:$0xff]  ;;  %v408_v39 = vpack.c.bf16 %v368_v31, %v364_v30  ;;  %v407_v51 = vpack.c.bf16 %v367_v33, %v363_v32  ;;  %v371_v52 = vld [vmem:[#allocation5 + $0x180] sm:$0xff]  ;;  %v345_v59 = vld [vmem:[#allocation5 + $0xb0] sm:$0xff] }
  0x7a   : > { %446 = vmatpush1.bf16.msra.mxu0 %v395_v20  ;;  %v376_v44 = vld [vmem:[#allocation5 + $0x1a8] sm:$0xff]  ;;  %v375_v53 = vld [vmem:[#allocation5 + $0x1a0] sm:$0xff]  ;;  %v350_v61 = vld [vmem:[#allocation5 + $0xd8] sm:$0xff]  ;;  %v397_v2 = vpack.c.bf16 %v345_v59, %v341_v58  ;;  %638 = vmatprep.subr.bf16.mxu1 %v398_v57 }
  0x7b   : > { %447 = vmatprep.subr.bf16.mxu0 %v400_v21  ;;  %v412_v55 = vpack.c.bf16 %v376_v44, %v372_v35  ;;  %v380_v56 = vld [vmem:[#allocation5 + $0x1c8] sm:$0xff]  ;;  %v354_v62 = vld [vmem:[#allocation5 + $0xf8] sm:$0xff]  ;;  %v411_v63 = vpack.c.bf16 %v375_v53, %v371_v52  ;;  %v379_v1 = vld [vmem:[#allocation5 + $0x1c0] sm:$0xff] }
  0x7c   : > { %v384_v60 = vld [vmem:[#allocation5 + $0x1e8] sm:$0xff]  ;;  %v383_v4 = vld [vmem:[#allocation5 + $0x1e0] sm:$0xff]  ;;  %v402_v5 = vpack.c.bf16 %v354_v62, %v350_v61  ;;  %v349_v6 = vld [vmem:[#allocation5 + $0xd0] sm:$0xff]  ;;  %639 = vmatpush1.bf16.msra.mxu1 %v397_v2 }
  0x7d   : > { %v416_v3 = vpack.c.bf16 %v384_v60, %v380_v56  ;;  %v353_v7 = vld [vmem:[#allocation5 + $0xf0] sm:$0xff]  ;;  %v358_v8 = vld [vmem:[#allocation5 + $0x118] sm:$0xff]  ;;  %v415_v10 = vpack.c.bf16 %v383_v4, %v379_v1  ;;  %v275_v11 = vld [vmem:[%s3415_s6] sm:$0xff] }
  0x7e   : > { %448 = vmatpush1.bf16.msra.mxu0 %v399_v26  ;;  %v362_v9 = vld [vmem:[#allocation5 + $0x138] sm:$0xff]  ;;  %v276_v12 = vld [vmem:[%s3415_s6 + $0x8] sm:$0xff]  ;;  %v401_v13 = vpack.c.bf16 %v353_v7, %v349_v6  ;;  %v357_v14 = vld [vmem:[#allocation5 + $0x110] sm:$0xff]  ;;  %640 = vmatprep.subr.bf16.mxu1 %v402_v5 }
  0x7f   : > { %449 = vmatprep.subr.bf16.mxu0 %v404_v27  ;;  %v406_v15 = vpack.c.bf16 %v362_v9, %v358_v8  ;;  %v361_v16 = vld [vmem:[#allocation5 + $0x130] sm:$0xff]  ;;  %v1212_v17 = vld [vmem:[#allocation7 + $0x8] sm:$0xff]  ;;  %v366_v19 = vld [vmem:[#allocation5 + $0x158] sm:$0xff]  ;;  %v3429_v23 = vpack.c.bf16 %v276_v12, %v275_v11 }
  0x80   : > { %v1216_v18 = vld [vmem:[#allocation7 + $0x28] sm:$0xff]  ;;  %v370_v20 = vld [vmem:[#allocation5 + $0x178] sm:$0xff]  ;;  %v1211_v22 = vld [vmem:[#allocation7] sm:$0xff]  ;;  %641 = vmatpush1.bf16.msra.mxu1 %v401_v13  ;;  %v405_v25 = vpack.c.bf16 %v361_v16, %v357_v14 }
  0x81   : > { %v1468_v21 = vpack.c.bf16 %v1216_v18, %v1212_v17  ;;  %v1215_v24 = vld [vmem:[#allocation7 + $0x20] sm:$0xff]  ;;  %v365_v26 = vld [vmem:[#allocation5 + $0x150] sm:$0xff]  ;;  %v1220_v27 = vld [vmem:[#allocation7 + $0x48] sm:$0xff]  ;;  %642 = vmatprep.subr.bf16.mxu1 %v406_v15  ;;  %v410_v28 = vpack.c.bf16 %v370_v20, %v366_v19 }
  0x82   : > { %450 = vmatpush1.bf16.msra.mxu0 %v403_v34  ;;  %v369_v29 = vld [vmem:[#allocation5 + $0x170] sm:$0xff]  ;;  %v374_v30 = vld [vmem:[#allocation5 + $0x198] sm:$0xff]  ;;  %v1467_v31 = vpack.c.bf16 %v1215_v24, %v1211_v22  ;;  %v1224_v32 = vld [vmem:[#allocation7 + $0x68] sm:$0xff] }
  0x83   : > { %451 = vmatprep.subr.bf16.mxu0 %v408_v39  ;;  %v378_v33 = vld [vmem:[#allocation5 + $0x1b8] sm:$0xff]  ;;  %v1472_v34 = vpack.c.bf16 %v1224_v32, %v1220_v27  ;;  %v1219_v35 = vld [vmem:[#allocation7 + $0x40] sm:$0xff]  ;;  %v277_v37 = vld [vmem:[%s3415_s6 + $0x10] sm:$0xff]  ;;  %v409_v39 = vpack.c.bf16 %v369_v29, %v365_v26 }
  0x84   : > { %v1223_v36 = vld [vmem:[#allocation7 + $0x60] sm:$0xff]  ;;  %v278_v38 = vld [vmem:[%s3415_s6 + $0x18] sm:$0xff]  ;;  %643 = vmatpush1.bf16.msra.mxu1 %v405_v25  ;;  %v1228_v40 = vld [vmem:[#allocation7 + $0x88] sm:$0xff]  ;;  %v414_v42 = vpack.c.bf16 %v378_v33, %v374_v30 }
  0x85   : > { %v1232_v41 = vld [vmem:[#allocation7 + $0xa8] sm:$0xff]  ;;  %644 = vmatprep.subr.bf16.mxu1 %v410_v28  ;;  %v373_v43 = vld [vmem:[#allocation5 + $0x190] sm:$0xff]  ;;  %v382_v45 = vld [vmem:[#allocation5 + $0x1d8] sm:$0xff]  ;;  %v1471_v46 = vpack.c.bf16 %v1223_v36, %v1219_v35 }
  0x86   : > { %452 = vmatpush1.bf16.msra.mxu0 %v407_v51  ;;  %v377_v44 = vld [vmem:[#allocation5 + $0x1b0] sm:$0xff]  ;;  %v386_v47 = vld [vmem:[#allocation5 + $0x1f8] sm:$0xff]  ;;  %v1476_v48 = vpack.c.bf16 %v1232_v41, %v1228_v40  ;;  %v1227_v49 = vld [vmem:[#allocation7 + $0x80] sm:$0xff]  ;;  %v3435_v51 = vpack.c.bf16 %v278_v38, %v277_v37 }
  0x87   : > { %453 = vmatprep.subr.bf16.mxu0 %v412_v55  ;;  %v1231_v50 = vld [vmem:[#allocation7 + $0xa0] sm:$0xff]  ;;  %v1236_v52 = vld [vmem:[#allocation7 + $0xc8] sm:$0xff]  ;;  %v413_v54 = vpack.c.bf16 %v377_v44, %v373_v43  ;;  %v418_v55 = vpack.c.bf16 %v386_v47, %v382_v45  ;;  %v381_v56 = vld [vmem:[#allocation5 + $0x1d0] sm:$0xff] }
  0x88   : > { %v1240_v53 = vld [vmem:[#allocation7 + $0xe8] sm:$0xff]  ;;  %645 = vmatpush1.bf16.msra.mxu1 %v409_v39  ;;  %v385_v57 = vld [vmem:[#allocation5 + $0x1f0] sm:$0xff]  ;;  %v1214_v58 = vld [vmem:[#allocation7 + $0x18] sm:$0xff]  ;;  %v1475_v59 = vpack.c.bf16 %v1231_v50, %v1227_v49 }
  0x89   : > { %646 = vmatprep.subr.bf16.mxu1 %v414_v42  ;;  %v1218_v60 = vld [vmem:[#allocation7 + $0x38] sm:$0xff]  ;;  %v1480_v61 = vpack.c.bf16 %v1240_v53, %v1236_v52  ;;  %v1235_v62 = vld [vmem:[#allocation7 + $0xc0] sm:$0xff]  ;;  %v1244_v1 = vld [vmem:[#allocation7 + $0x108] sm:$0xff]  ;;  %v417_v5 = vpack.c.bf16 %v385_v57, %v381_v56 }
  0x8a   : > { %454 = vmatpush1.bf16.msra.mxu0 %v411_v63  ;;  %v1239_v63 = vld [vmem:[#allocation7 + $0xe0] sm:$0xff]  ;;  %v1248_v2 = vld [vmem:[#allocation7 + $0x128] sm:$0xff]  ;;  %v1470_v6 = vpack.c.bf16 %v1218_v60, %v1214_v58  ;;  %v1213_v7 = vld [vmem:[#allocation7 + $0x10] sm:$0xff] }
  0x8b   : > { %455 = vmatprep.subr.bf16.mxu0 %v416_v3  ;;  %v279_v3 = vld [vmem:[%s3415_s6 + $0x20] sm:$0xff]  ;;  %v280_v4 = vld [vmem:[%s3415_s6 + $0x28] sm:$0xff]  ;;  %v1217_v8 = vld [vmem:[#allocation7 + $0x30] sm:$0xff]  ;;  %v1479_v9 = vpack.c.bf16 %v1239_v63, %v1235_v62  ;;  %v1484_v12 = vpack.c.bf16 %v1248_v2, %v1244_v1 }
  0x8c   : > { %647 = vmatpush1.bf16.msra.mxu1 %v413_v54  ;;  %v1226_v11 = vld [vmem:[#allocation7 + $0x78] sm:$0xff]  ;;  %v3441_v13 = vpack.c.bf16 %v280_v4, %v279_v3  ;;  %v1243_v14 = vld [vmem:[#allocation7 + $0x100] sm:$0xff]  ;;  %v1469_v16 = vpack.c.bf16 %v1217_v8, %v1213_v7  ;;  %v1252_v17 = vld [vmem:[#allocation7 + $0x148] sm:$0xff] }
  0x8d   : > { %648 = vmatprep.subr.bf16.mxu1 %v418_v55  ;;  %v1247_v15 = vld [vmem:[#allocation7 + $0x120] sm:$0xff]  ;;  %v1256_v18 = vld [vmem:[#allocation7 + $0x168] sm:$0xff]  ;;  %v1221_v20 = vld [vmem:[#allocation7 + $0x50] sm:$0xff] }
  0x8e   : > { %456 = vmatpush1.bf16.msra.mxu0 %v415_v10  ;;  %v1222_v10 = vld [vmem:[#allocation7 + $0x58] sm:$0xff]  ;;  %v1483_v25 = vpack.c.bf16 %v1247_v15, %v1243_v14  ;;  %v1488_v26 = vpack.c.bf16 %v1256_v18, %v1252_v17  ;;  %v1251_v27 = vld [vmem:[#allocation7 + $0x140] sm:$0xff]  ;;  %v281_v29 = vld [vmem:[%s3415_s6 + $0x30] sm:$0xff] }
  0x8f   : > { %1681 = vmatprep.subr.bf16.mxu0 %v1468_v21  ;;  %v1474_v19 = vpack.c.bf16 %v1226_v11, %v1222_v10  ;;  %v1225_v21 = vld [vmem:[#allocation7 + $0x70] sm:$0xff]  ;;  %v1230_v22 = vld [vmem:[#allocation7 + $0x98] sm:$0xff]  ;;  %v1255_v28 = vld [vmem:[#allocation7 + $0x160] sm:$0xff] }
  0x90   : > { %649 = vmatpush1.bf16.msra.mxu1 %v417_v5  ;;  %v1234_v24 = vld [vmem:[#allocation7 + $0xb8] sm:$0xff]  ;;  %v1229_v33 = vld [vmem:[#allocation7 + $0x90] sm:$0xff]  ;;  %v1487_v36 = vpack.c.bf16 %v1255_v28, %v1251_v27  ;;  %v1260_v37 = vld [vmem:[#allocation7 + $0x188] sm:$0xff] }
  0x91   : > { %474 = vmatmul.mubr.bf16.vlgmr.msra.gmra.mrb[0].mxu0 %v3429_v23  ;;  %2067 = vmatprep.subr.bf16.mxu1 %v1470_v6  ;;  %v282_v30 = vld [vmem:[%s3415_s6 + $0x38] sm:$0xff]  ;;  %v1478_v32 = vpack.c.bf16 %v1234_v24, %v1230_v22  ;;  %v1259_v40 = vld [vmem:[#allocation7 + $0x180] sm:$0xff]  ;;  %v1268_v42 = vld [vmem:[#allocation7 + $0x1c8] sm:$0xff] }
  0x92   : > { %483 = vmatprep.mubr.bf16.mxu0 %v3205_v0  ;;  %1682 = vmatpush1.bf16.msra.mxu0 %v1467_v31  ;;  %v1473_v31 = vpack.c.bf16 %v1225_v21, %v1221_v20  ;;  %v1238_v35 = vld [vmem:[#allocation7 + $0xd8] sm:$0xff]  ;;  %v3449_v38 = vpack.c.bf16 %v282_v30, %v281_v29  ;;  %v1263_v41 = vld [vmem:[#allocation7 + $0x1a0] sm:$0xff]  ;;  %v1272_v43 = vld [vmem:[#allocation7 + $0x1e8] sm:$0xff] }
  0x93   : > { %1683 = vmatprep.subr.bf16.mxu0 %v1472_v34  ;;  %667 = vmatmul.mubr.bf16.vlgmr.msra.gmra.mrb[0].mxu1 %v3429_v23  ;;  %v1233_v34 = vld [vmem:[#allocation7 + $0xb0] sm:$0xff]  ;;  %v1264_v23 = vld [vmem:[#allocation7 + $0x1a8] sm:$0xff]  ;;  %v1242_v39 = vld [vmem:[#allocation7 + $0xf8] sm:$0xff]  ;;  %v1491_v50 = vpack.c.bf16 %v1263_v41, %v1259_v40  ;;  %v1496_v53 = vpack.c.bf16 %v1272_v43, %v1268_v42 }
  0x94   : > { %2068 = vmatpush1.bf16.msra.mxu1 %v1469_v16  ;;  %676 = vmatprep.mubr.bf16.mxu1 %v3205_v0  ;;  %v1477_v44 = vpack.c.bf16 %v1233_v34, %v1229_v33  ;;  %v1492_v45 = vpack.c.bf16 %v1264_v23, %v1260_v37  ;;  %v1237_v47 = vld [vmem:[#allocation7 + $0xd0] sm:$0xff]  ;;  %v1246_v49 = vld [vmem:[#allocation7 + $0x118] sm:$0xff]  ;;  %v1267_v54 = vld [vmem:[#allocation7 + $0x1c0] sm:$0xff] }
  0x95   : > { %2069 = vmatprep.subr.bf16.mxu1 %v1474_v19  ;;  %v1250_v52 = vld [vmem:[#allocation7 + $0x138] sm:$0xff]  ;;  %v1271_v55 = vld [vmem:[#allocation7 + $0x1e0] sm:$0xff]  ;;  %v284_v57 = vld [vmem:[%s3415_s6 + $0x48] sm:$0xff] }
  0x96   : > { %1684 = vmatpush1.bf16.msra.mxu0 %v1471_v46  ;;  %v1482_v46 = vpack.c.bf16 %v1242_v39, %v1238_v35  ;;  %v283_v56 = vld [vmem:[%s3415_s6 + $0x40] sm:$0xff]  ;;  %v1249_v60 = vld [vmem:[#allocation7 + $0x130] sm:$0xff]  ;;  %v1254_v62 = vld [vmem:[#allocation7 + $0x158] sm:$0xff] }
  0x97   : > { %1685 = vmatprep.subr.bf16.mxu0 %v1476_v48  ;;  %v1241_v48 = vld [vmem:[#allocation7 + $0xf0] sm:$0xff]  ;;  %v1276_v63 = vld [vmem:[#allocation7 + $0x208] sm:$0xff]  ;;  %v3457_v2 = vpack.c.bf16 %v284_v57, %v283_v56  ;;  %v1258_v3 = vld [vmem:[#allocation7 + $0x178] sm:$0xff] }
  0x98   : > { %2070 = vmatpush1.bf16.msra.mxu1 %v1473_v31  ;;  %v1481_v58 = vpack.c.bf16 %v1241_v48, %v1237_v47  ;;  %v1280_v1 = vld [vmem:[#allocation7 + $0x228] sm:$0xff]  ;;  %v1275_v4 = vld [vmem:[#allocation7 + $0x200] sm:$0xff]  ;;  %v1490_v10 = vpack.c.bf16 %v1258_v3, %v1254_v62  ;;  %v1253_v11 = vld [vmem:[#allocation7 + $0x150] sm:$0xff] }
  0x99   : > { %484 = vmatmul.mubr.bf16.gmra.mrb[4].mxu0 %v3435_v51  ;;  %2071 = vmatprep.subr.bf16.mxu1 %v1478_v32  ;;  %v1279_v5 = vld [vmem:[#allocation7 + $0x220] sm:$0xff]  ;;  %v1284_v6 = vld [vmem:[#allocation7 + $0x248] sm:$0xff]  ;;  %v1262_v14 = vld [vmem:[#allocation7 + $0x198] sm:$0xff] }
  0x9a   : > { %493 = vmatprep.mubr.bf16.mxu0 %v3205_v0  ;;  %1686 = vmatpush1.bf16.msra.mxu0 %v1475_v59  ;;  %v1245_v59 = vld [vmem:[#allocation7 + $0x110] sm:$0xff]  ;;  %v1288_v7 = vld [vmem:[#allocation7 + $0x268] sm:$0xff]  ;;  %v1499_v15 = vpack.c.bf16 %v1279_v5, %v1275_v4  ;;  %v1266_v16 = vld [vmem:[#allocation7 + $0x1b8] sm:$0xff] }
  0x9b   : > { %1687 = vmatprep.subr.bf16.mxu0 %v1480_v61  ;;  %677 = vmatmul.mubr.bf16.gmra.mrb[4].mxu1 %v3435_v51  ;;  %v1486_v61 = vpack.c.bf16 %v1250_v52, %v1246_v49  ;;  %v1495_v51 = vpack.c.bf16 %v1271_v55, %v1267_v54  ;;  %v1485_v8 = vpack.c.bf16 %v1249_v60, %v1245_v59  ;;  %v1283_v18 = vld [vmem:[#allocation7 + $0x240] sm:$0xff]  ;;  %v285_v20 = vld [vmem:[%s3415_s6 + $0x50] sm:$0xff]  ;;  %v286_v21 = vld [vmem:[%s3415_s6 + $0x58] sm:$0xff] }
  0x9c   : > { %686 = vmatprep.mubr.bf16.mxu1 %v3205_v0  ;;  %2072 = vmatpush1.bf16.msra.mxu1 %v1477_v44  ;;  %v1504_v17 = vpack.c.bf16 %v1288_v7, %v1284_v6  ;;  %v1287_v19 = vld [vmem:[#allocation7 + $0x260] sm:$0xff]  ;;  %v1261_v24 = vld [vmem:[#allocation7 + $0x190] sm:$0xff]  ;;  %v1270_v27 = vld [vmem:[#allocation7 + $0x1d8] sm:$0xff]  ;;  %v3465_v30 = vpack.c.bf16 %v286_v21, %v285_v20 }
  0x9d   : > { %2073 = vmatprep.subr.bf16.mxu1 %v1482_v46  ;;  %v1292_v28 = vld [vmem:[#allocation7 + $0x288] sm:$0xff]  ;;  %v1274_v31 = vld [vmem:[#allocation7 + $0x1f8] sm:$0xff]  ;;  %v1291_v32 = vld [vmem:[#allocation7 + $0x280] sm:$0xff] }
  0x9e   : > { %1688 = vmatpush1.bf16.msra.mxu0 %v1479_v9  ;;  %v1500_v9 = vpack.c.bf16 %v1280_v1, %v1276_v63  ;;  %v1296_v29 = vld [vmem:[#allocation7 + $0x2a8] sm:$0xff]  ;;  %v1295_v33 = vld [vmem:[#allocation7 + $0x2a0] sm:$0xff]  ;;  %v1498_v23 = vpack.c.bf16 %v1274_v31, %v1270_v27  ;;  %v1269_v39 = vld [vmem:[#allocation7 + $0x1d0] sm:$0xff] }
  0x9f   : > { %1689 = vmatprep.subr.bf16.mxu0 %v1484_v12  ;;  %v1257_v12 = vld [vmem:[#allocation7 + $0x170] sm:$0xff]  ;;  %v1300_v34 = vld [vmem:[#allocation7 + $0x2c8] sm:$0xff]  ;;  %v1508_v37 = vpack.c.bf16 %v1296_v29, %v1292_v28  ;;  %v1278_v41 = vld [vmem:[#allocation7 + $0x218] sm:$0xff]  ;;  %v1507_v42 = vpack.c.bf16 %v1295_v33, %v1291_v32 }
  0xa0   : > { %2074 = vmatpush1.bf16.msra.mxu1 %v1481_v58  ;;  %v1489_v22 = vpack.c.bf16 %v1257_v12, %v1253_v11  ;;  %v1304_v35 = vld [vmem:[#allocation7 + $0x2e8] sm:$0xff]  ;;  %v1273_v40 = vld [vmem:[#allocation7 + $0x1f0] sm:$0xff]  ;;  %v1282_v43 = vld [vmem:[#allocation7 + $0x238] sm:$0xff] }
  0xa1   : > { %494 = vmatmul.mubr.bf16.gmra.mrb[8].mxu0 %v3441_v13  ;;  %2075 = vmatprep.subr.bf16.mxu1 %v1486_v61  ;;  %v1512_v44 = vpack.c.bf16 %v1304_v35, %v1300_v34  ;;  %v1303_v46 = vld [vmem:[#allocation7 + $0x2e0] sm:$0xff]  ;;  %v288_v48 = vld [vmem:[%s3415_s6 + $0x68] sm:$0xff]  ;;  %v1497_v49 = vpack.c.bf16 %v1273_v40, %v1269_v39  ;;  %v1281_v52 = vld [vmem:[#allocation7 + $0x230] sm:$0xff] }
  0xa2   : > { %503 = vmatprep.mubr.bf16.mxu0 %v3205_v0  ;;  %1690 = vmatpush1.bf16.msra.mxu0 %v1483_v25  ;;  %v1265_v25 = vld [vmem:[#allocation7 + $0x1b0] sm:$0xff]  ;;  %v287_v47 = vld [vmem:[%s3415_s6 + $0x60] sm:$0xff]  ;;  %v1286_v54 = vld [vmem:[#allocation7 + $0x258] sm:$0xff] }
  0xa3   : > { %1691 = vmatprep.subr.bf16.mxu0 %v1488_v26  ;;  %687 = vmatmul.mubr.bf16.gmra.mrb[8].mxu1 %v3441_v13  ;;  %v1494_v26 = vpack.c.bf16 %v1266_v16, %v1262_v14  ;;  %v1503_v13 = vpack.c.bf16 %v1287_v19, %v1283_v18  ;;  %v1308_v55 = vld [vmem:[#allocation7 + $0x308] sm:$0xff]  ;;  %v3473_v57 = vpack.c.bf16 %v288_v48, %v287_v47  ;;  %v1290_v58 = vld [vmem:[#allocation7 + $0x278] sm:$0xff]  ;;  %v1307_v59 = vld [vmem:[#allocation7 + $0x300] sm:$0xff] }
  0xa4   : > { %696 = vmatprep.mubr.bf16.mxu1 %v3205_v0  ;;  %2076 = vmatpush1.bf16.msra.mxu1 %v1485_v8  ;;  %v1312_v56 = vld [vmem:[#allocation7 + $0x328] sm:$0xff]  ;;  %v1311_v60 = vld [vmem:[#allocation7 + $0x320] sm:$0xff]  ;;  %v1506_v1 = vpack.c.bf16 %v1290_v58, %v1286_v54  ;;  %v1285_v3 = vld [vmem:[#allocation7 + $0x250] sm:$0xff] }
  0xa5   : > { %2077 = vmatprep.subr.bf16.mxu1 %v1490_v10  ;;  %v1316_v61 = vld [vmem:[#allocation7 + $0x348] sm:$0xff]  ;;  %v1516_v63 = vpack.c.bf16 %v1312_v56, %v1308_v55  ;;  %v1289_v4 = vld [vmem:[#allocation7 + $0x270] sm:$0xff]  ;;  %v1294_v5 = vld [vmem:[#allocation7 + $0x298] sm:$0xff]  ;;  %v1515_v6 = vpack.c.bf16 %v1311_v60, %v1307_v59 }
  0xa6   : > { %1692 = vmatpush1.bf16.msra.mxu0 %v1487_v36  ;;  %v1493_v36 = vpack.c.bf16 %v1265_v25, %v1261_v24  ;;  %v1320_v62 = vld [vmem:[#allocation7 + $0x368] sm:$0xff]  ;;  %v1298_v7 = vld [vmem:[#allocation7 + $0x2b8] sm:$0xff]  ;;  %v1319_v10 = vld [vmem:[#allocation7 + $0x360] sm:$0xff]  ;;  %v1505_v14 = vpack.c.bf16 %v1289_v4, %v1285_v3 }
  0xa7   : > { %1693 = vmatprep.subr.bf16.mxu0 %v1492_v45  ;;  %v1299_v45 = vld [vmem:[#allocation7 + $0x2c0] sm:$0xff]  ;;  %v1520_v8 = vpack.c.bf16 %v1320_v62, %v1316_v61  ;;  %v289_v11 = vld [vmem:[%s3415_s6 + $0x70] sm:$0xff]  ;;  %v290_v12 = vld [vmem:[%s3415_s6 + $0x78] sm:$0xff] }
  0xa8   : > { %2078 = vmatpush1.bf16.msra.mxu1 %v1489_v22  ;;  %v1297_v16 = vld [vmem:[#allocation7 + $0x2b0] sm:$0xff]  ;;  %v1302_v18 = vld [vmem:[#allocation7 + $0x2d8] sm:$0xff]  ;;  %v1324_v19 = vld [vmem:[#allocation7 + $0x388] sm:$0xff]  ;;  %v314_v21 = vpack.c.bf16 %v290_v12, %v289_v11 }
  0xa9   : > { %504 = vmatmul.mubr.bf16.gmra.mrb[12].mxu0 %v3449_v38  ;;  %2079 = vmatprep.subr.bf16.mxu1 %v1494_v26  ;;  %v1328_v20 = vld [vmem:[#allocation7 + $0x3a8] sm:$0xff]  ;;  %v1306_v22 = vld [vmem:[#allocation7 + $0x2f8] sm:$0xff]  ;;  %v1323_v24 = vld [vmem:[#allocation7 + $0x380] sm:$0xff] }
  0xaa   : > { %513 = vmatprep.mubr.bf16.mxu0 %v3205_v0  ;;  %1694 = vmatpush1.bf16.msra.mxu0 %v1491_v50  ;;  %v1277_v50 = vld [vmem:[#allocation7 + $0x210] sm:$0xff]  ;;  %v1327_v25 = vld [vmem:[#allocation7 + $0x3a0] sm:$0xff]  ;;  %v1524_v27 = vpack.c.bf16 %v1328_v20, %v1324_v19  ;;  %v1310_v32 = vld [vmem:[#allocation7 + $0x318] sm:$0xff] }
  0xab   : > { %1695 = vmatprep.subr.bf16.mxu0 %v1496_v53  ;;  %697 = vmatmul.mubr.bf16.gmra.mrb[12].mxu1 %v3449_v38  ;;  %v1502_v53 = vpack.c.bf16 %v1282_v43, %v1278_v41  ;;  %v1511_v38 = vpack.c.bf16 %v1303_v46, %v1299_v45  ;;  %v1301_v28 = vld [vmem:[#allocation7 + $0x2d0] sm:$0xff]  ;;  %v1523_v31 = vpack.c.bf16 %v1327_v25, %v1323_v24  ;;  %v1314_v33 = vld [vmem:[#allocation7 + $0x338] sm:$0xff]  ;;  %v291_v34 = vld [vmem:[%s3415_s6 + $0x80] sm:$0xff] }
  0xac   : > { %706 = vmatprep.mubr.bf16.mxu1 %v3205_v0  ;;  %2080 = vmatpush1.bf16.msra.mxu1 %v1493_v36  ;;  %v1305_v29 = vld [vmem:[#allocation7 + $0x2f0] sm:$0xff]  ;;  %v292_v35 = vld [vmem:[%s3415_s6 + $0x88] sm:$0xff]  ;;  %v1322_v41 = vld [vmem:[#allocation7 + $0x378] sm:$0xff] }
  0xad   : > { %2081 = vmatprep.subr.bf16.mxu1 %v1498_v23  ;;  %v1513_v36 = vpack.c.bf16 %v1305_v29, %v1301_v28  ;;  %v1309_v23 = vld [vmem:[#allocation7 + $0x310] sm:$0xff]  ;;  %v315_v40 = vpack.c.bf16 %v292_v35, %v291_v34  ;;  %v1326_v46 = vld [vmem:[#allocation7 + $0x398] sm:$0xff]  ;;  %v295_v56 = vld [vmem:[%s3415_s6 + $0xa0] sm:$0xff]  ;;  %v421_v29 = vlaneseq }
  0xae   : > { %1696 = vmatpush1.bf16.msra.mxu0 %v1495_v51  ;;  %v1501_v51 = vpack.c.bf16 %v1281_v52, %v1277_v50  ;;  %v1313_v39 = vld [vmem:[#allocation7 + $0x330] sm:$0xff]  ;;  %v1330_v47 = vld [vmem:[#allocation7 + $0x3b8] sm:$0xff]  ;;  %v299_v62 = vld [vmem:[%s3415_s6 + $0xc0] sm:$0xff] }
  0xaf   : > { %1697 = vmatprep.subr.bf16.mxu0 %v1500_v9  ;;  %v1315_v9 = vld [vmem:[#allocation7 + $0x340] sm:$0xff]  ;;  %v1321_v45 = vld [vmem:[#allocation7 + $0x370] sm:$0xff]  ;;  %v1526_v52 = vpack.c.bf16 %v1330_v47, %v1326_v46  ;;  %v298_v60 = vld [vmem:[%s3415_s6 + $0xb8] sm:$0xff] }
  0xb0   : > { %2082 = vmatpush1.bf16.msra.mxu1 %v1497_v49  ;;  %v293_v48 = vld [vmem:[%s3415_s6 + $0x90] sm:$0xff]  ;;  %v294_v49 = vld [vmem:[%s3415_s6 + $0x98] sm:$0xff]  ;;  %v303_v24 = vld [vmem:[%s3415_s6 + $0xe0] sm:$0xff] }
  0xb1   : > { %514 = vmatmul.mubr.bf16.gmra.mrb[16].mxu0 %v3457_v2  ;;  %2083 = vmatprep.subr.bf16.mxu1 %v1502_v53  ;;  %v1325_v53 = vld [vmem:[#allocation7 + $0x390] sm:$0xff]  ;;  %v1334_v3 = vld [vmem:[#allocation7 + $0x3d8] sm:$0xff]  ;;  %v304_v25 = vld [vmem:[%s3415_s6 + $0xe8] sm:$0xff] }
  0xb2   : > { %523 = vmatprep.mubr.bf16.mxu0 %v3205_v0  ;;  %1698 = vmatpush1.bf16.msra.mxu0 %v1499_v15  ;;  %v1293_v15 = vld [vmem:[#allocation7 + $0x290] sm:$0xff]  ;;  %v1346_v20 = vld [vmem:[#allocation7 + $0x438] sm:$0xff] }
  0xb3   : > { %1699 = vmatprep.subr.bf16.mxu0 %v1504_v17  ;;  %707 = vmatmul.mubr.bf16.gmra.mrb[16].mxu1 %v3457_v2  ;;  %v1510_v17 = vpack.c.bf16 %v1298_v7, %v1294_v5  ;;  %v1519_v2 = vpack.c.bf16 %v1319_v10, %v1315_v9  ;;  %v1509_v26 = vpack.c.bf16 %v1297_v16, %v1293_v15  ;;  %v1329_v54 = vld [vmem:[#allocation7 + $0x3b0] sm:$0xff]  ;;  %v1338_v5 = vld [vmem:[#allocation7 + $0x3f8] sm:$0xff]  ;;  %v1335_v7 = vld [vmem:[#allocation7 + $0x3e0] sm:$0xff] }
  0xb4   : > { %716 = vmatprep.mubr.bf16.mxu1 %v3205_v0  ;;  %2084 = vmatpush1.bf16.msra.mxu1 %v1501_v51  ;;  %v1525_v55 = vpack.c.bf16 %v1329_v54, %v1325_v53  ;;  %v297_v59 = vld [vmem:[%s3415_s6 + $0xb0] sm:$0xff]  ;;  %v300_v51 = vld [vmem:[%s3415_s6 + $0xc8] sm:$0xff]  ;;  %v302_v16 = vld [vmem:[%s3415_s6 + $0xd8] sm:$0xff] }
  0xb5   : > { %2085 = vmatprep.subr.bf16.mxu1 %v1506_v1  ;;  %v318_v61 = vpack.c.bf16 %v298_v60, %v297_v59  ;;  %v1336_v1 = vld [vmem:[#allocation7 + $0x3e8] sm:$0xff]  ;;  %v1333_v10 = vld [vmem:[#allocation7 + $0x3d0] sm:$0xff] }
  0xb6   : > { %1700 = vmatpush1.bf16.msra.mxu0 %v1503_v13  ;;  %v1514_v13 = vpack.c.bf16 %v1306_v22, %v1302_v18  ;;  %v1337_v11 = vld [vmem:[#allocation7 + $0x3f0] sm:$0xff]  ;;  %v1344_v18 = vld [vmem:[#allocation7 + $0x428] sm:$0xff] }
  0xb7   : > { %1701 = vmatprep.subr.bf16.mxu0 %v1508_v37  ;;  %v1518_v37 = vpack.c.bf16 %v1314_v33, %v1310_v32  ;;  %v1529_v12 = vpack.c.bf16 %v1337_v11, %v1333_v10  ;;  %v301_v15 = vld [vmem:[%s3415_s6 + $0xd0] sm:$0xff]  ;;  %v3523_v33 = vld [vmem:[%s5397_s2] sm:$0xf]  ;;  %v3592_v10 = vld [vmem:[#allocation7 + $0x4e8] sm:$0xff] }
  0xb8   : > { %2086 = vmatpush1.bf16.msra.mxu1 %v1505_v14  ;;  %v319_v14 = vpack.c.bf16 %v300_v51, %v299_v62  ;;  %v320_v22 = vpack.c.bf16 %v302_v16, %v301_v15  ;;  %v3574_v62 = vld [vmem:[#allocation7 + $0x4b8] sm:$0xff]  ;;  %v3576_v51 = vld [vmem:[#allocation7 + $0x480] sm:$0xff] }
  0xb9   : > { %524 = vmatmul.mubr.bf16.gmra.mrb[20].mxu0 %v3465_v30  ;;  %2087 = vmatprep.subr.bf16.mxu1 %v1510_v17  ;;  %v1340_v17 = vld [vmem:[#allocation7 + $0x408] sm:$0xff]  ;;  %v3599_v16 = vld [vmem:[#allocation7 + $0x4d8] sm:$0xff] }
  0xba   : > { %533 = vmatprep.mubr.bf16.mxu0 %v3205_v0  ;;  %1702 = vmatpush1.bf16.msra.mxu0 %v1507_v42  ;;  %v1517_v42 = vpack.c.bf16 %v1313_v39, %v1309_v23  ;;  %v1532_v19 = vpack.c.bf16 %v1344_v18, %v1340_v17  ;;  %v3540_v39 = vld [vmem:[#allocation7 + $0x410] sm:$0xff]  ;;  %v3601_v17 = vld [vmem:[#allocation7 + $0x4f8] sm:$0xff]  ;;  %v3603_v18 = vld [vmem:[#allocation7 + $0x4c0] sm:$0xff] }
  0xbb   : > { %1703 = vmatprep.subr.bf16.mxu0 %v1512_v44  ;;  %717 = vmatmul.mubr.bf16.gmra.mrb[20].mxu1 %v3465_v30  ;;  %v1318_v30 = vld [vmem:[#allocation7 + $0x358] sm:$0xff]  ;;  %v1317_v44 = vld [vmem:[#allocation7 + $0x350] sm:$0xff] }
  0xbc   : > { %726 = vmatprep.mubr.bf16.mxu1 %v3205_v0  ;;  %2088 = vmatpush1.bf16.msra.mxu1 %v1509_v26  ;;  %v1522_v43 = vpack.c.bf16 %v1322_v41, %v1318_v30  ;;  %v1521_v50 = vpack.c.bf16 %v1321_v45, %v1317_v44  ;;  %v321_v26 = vpack.c.bf16 %v304_v25, %v303_v24  ;;  %v3544_v30 = vld [vmem:[#allocation7 + $0x448] sm:$0xff]  ;;  %v3549_v44 = vld [vmem:[#allocation7 + $0x458] sm:$0xff]  ;;  %v3609_v24 = vld [vmem:[#allocation7 + $0x4e0] sm:$0xff] }
  0xbd   : > { %2089 = vmatprep.subr.bf16.mxu1 %v1514_v13  ;;  %v306_v13 = vld [vmem:[%s3415_s6 + $0xf8] sm:$0xff]  ;;  %v3611_v25 = vld [vmem:[#allocation7 + $0x4d0] sm:$0xff] }
  0xbe   : > { %1704 = vmatpush1.bf16.msra.mxu0 %v1511_v38  ;;  %v316_v38 = vpack.c.bf16 %v294_v49, %v293_v48  ;;  %v3551_v45 = vld [vmem:[#allocation7 + $0x478] sm:$0xff]  ;;  %v3554_v48 = vld [vmem:[#allocation7 + $0x440] sm:$0xff] }
  0xbf   : > { %1705 = vmatprep.subr.bf16.mxu0 %v1516_v63  ;;  %v1332_v63 = vld [vmem:[#allocation7 + $0x3c8] sm:$0xff]  ;;  %v3556_v49 = vld [vmem:[#allocation7 + $0x460] sm:$0xff] }
  0xc0   : > { %2090 = vmatpush1.bf16.msra.mxu1 %v1513_v36  ;;  %v1528_v4 = vpack.c.bf16 %v1336_v1, %v1332_v63  ;;  %v3536_v36 = vld [vmem:[#allocation7 + $0x400] sm:$0xff] }
  0xc1   : > { %534 = vmatmul.mubr.bf16.gmra.mrb[24].mxu0 %v3473_v57  ;;  %2091 = vmatprep.subr.bf16.mxu1 %v1518_v37  ;;  %v3538_v37 = vld [vmem:[#allocation7 + $0x420] sm:$0xff] }
  0xc2   : > { %543 = vmatprep.mubr.bf16.mxu0 %v3205_v0  ;;  %1706 = vmatpush1.bf16.msra.mxu0 %v1515_v6  ;;  %v1331_v6 = vld [vmem:[#allocation7 + $0x3c0] sm:$0xff] }
  0xc3   : > { %1707 = vmatprep.subr.bf16.mxu0 %v1520_v8  ;;  %727 = vmatmul.mubr.bf16.gmra.mrb[24].mxu1 %v3473_v57  ;;  %v296_v57 = vld [vmem:[%s3415_s6 + $0xa8] sm:$0xff]  ;;  %v1530_v8 = vpack.c.bf16 %v1338_v5, %v1334_v3  ;;  %v1527_v9 = vpack.c.bf16 %v1335_v7, %v1331_v6  ;;  %v3580_v3 = vld [vmem:[#allocation7 + $0x4a0] sm:$0xff]  ;;  %v1538_v6 = vpack.c.bf16 %v3551_v45, %v3549_v44  ;;  %v3689_v44 = vld [vmem:[#allocation7 + $0x550] sm:$0xff] }
  0xc4   : > { %736 = vmatprep.mubr.bf16.mxu1 %v3205_v0  ;;  %2092 = vmatpush1.bf16.msra.mxu1 %v1517_v42  ;;  %v317_v58 = vpack.c.bf16 %v296_v57, %v295_v56  ;;  %v3565_v56 = vld [vmem:[#allocation7 + $0x488] sm:$0xff]  ;;  %v1535_v7 = vpack.c.bf16 %v3556_v49, %v3554_v48  ;;  %v3691_v45 = vld [vmem:[#allocation7 + $0x570] sm:$0xff]  ;;  %v5437_v49 = vpack.c.bf16 %v3609_v24, %v3603_v18 }
  0xc5   : > { %2093 = vmatprep.subr.bf16.mxu1 %v1522_v43  ;;  %v3547_v43 = vld [vmem:[#allocation7 + $0x468] sm:$0xff] }
  0xc6   : > { %1708 = vmatpush1.bf16.msra.mxu0 %v1519_v2  ;;  %v1342_v2 = vld [vmem:[#allocation7 + $0x418] sm:$0xff]  ;;  %v3567_v57 = vld [vmem:[#allocation7 + $0x4a8] sm:$0xff]  ;;  %v1536_v1 = vpack.c.bf16 %v3547_v43, %v3544_v30 }
  0xc7   : > { %1709 = vmatprep.subr.bf16.mxu0 %v1524_v27  ;;  %v305_v27 = vld [vmem:[%s3415_s6 + $0xf0] sm:$0xff]  ;;  %v1540_v15 = vpack.c.bf16 %v3567_v57, %v3565_v56  ;;  %v3703_v43 = vld [vmem:[#allocation7 + $0x5b8] sm:$0xff]  ;;  %s3132_s6 = scalar_lea.vmem %s3131_s7, 32768 }
  0xc8   : > { %2094 = vmatpush1.bf16.msra.mxu1 %v1521_v50  ;;  %v322_v28 = vpack.c.bf16 %v306_v13, %v305_v27  ;;  %v3558_v50 = vld [vmem:[#allocation7 + $0x450] sm:$0xff]  ;;  %p3134_p9 = scmp.lt.s32.totalorder %s3132_s6, %s3126_s13 }
  0xc9   : > { %544 = vmatmul.mubr.bf16.gmra.mrb[28].mxu0 %v314_v21  ;;  %2095 = vmatprep.subr.bf16.mxu1 %v1526_v52 }
  0xca   : > { %553 = vmatprep.mubr.bf16.mxu0 %v3205_v0  ;;  %1710 = vmatpush1.bf16.msra.mxu0 %v1523_v31  ;;  %v3517_v31 = vshrl.u32 %v421_v29, 7  ;;  %p3135_p12 = por %p3134_p9, %p3133_p7 }
  0xcb   : > { %737 = vmatmul.mubr.bf16.gmra.mrb[28].mxu1 %v314_v21  ;;  %1711 = vmatprep.subr.bf16.mxu0 %v1528_v4  ;;  %v1534_v21 = vpack.c.bf16 %v1346_v20, %v1342_v2  ;;  %v3582_v4 = vld [vmem:[#allocation7 + $0x490] sm:$0xff] }
  0xcc   : > { %746 = vmatprep.mubr.bf16.mxu1 %v3205_v0  ;;  %2096 = vmatpush1.bf16.msra.mxu1 %v1525_v55  ;;  %5432 = vst [vmem:[#allocation12_spill] sm:$0xff] %v3517_v31  ;;  %v5405_v32 = vsub.s32 0, %v3517_v31  ;;  %v5404_v34 = vsub.s32 1, %v3517_v31  ;;  %v3563_v55 = vld [vmem:[#allocation7 + $0x470] sm:$0xff]  ;;  %p3136_p2 = pnand %p3135_p12, %p3129_p3 }
  0xcd   : > { %2097 = vmatprep.subr.bf16.mxu1 %v1530_v8  ;;  %v3588_v8 = vld [vmem:[#allocation7 + $0x4b0] sm:$0xff] }
  0xce   : > { %1712 = vmatpush1.bf16.msra.mxu0 %v1527_v9  ;;  %v3529_v35 = vrot.slane %v3523_v33, %v5405_v32  ;;  %v3590_v9 = vld [vmem:[#allocation7 + $0x4c8] sm:$0xff] }
  0xcf   : > { %1874 = vmatprep.subr.bf16.mxu0 %v1532_v19 }
  0xd0   : > { %2098 = vmatpush1.bf16.msra.mxu1 %v1529_v12 }
  0xd1   : > { %554 = vmatmul.mubr.bf16.gmra.mrb[32].mxu0 %v315_v40  ;;  %2260 = vmatprep.subr.bf16.mxu1 %v1534_v21 }
  0xd2   : > { %563 = vmatprep.mubr.bf16.mxu0 %v3205_v0 }
  0xd3   : > { %747 = vmatmul.mubr.bf16.gmra.mrb[32].mxu1 %v315_v40  ;;  %v3542_v40 = vld [vmem:[#allocation7 + $0x430] sm:$0xff] }
  0xd4   : > { %756 = vmatprep.mubr.bf16.mxu1 %v3205_v0  ;;  %v1533_v60 = vpack.c.bf16 %v3542_v40, %v3540_v39  ;;  %v3679_v39 = vld [vmem:[#allocation7 + $0x540] sm:$0xff] }
  0xd5   : > { %v3681_v40 = vld [vmem:[#allocation7 + $0x560] sm:$0xff] }
  0xd9   : > { %564 = vmatmul.mubr.bf16.gmra.mrb[36].mxu0 %v316_v38 }
  0xda   : > { %573 = vmatprep.mubr.bf16.mxu0 %v3205_v0 }
  0xdb   : > { %757 = vmatmul.mubr.bf16.gmra.mrb[36].mxu1 %v316_v38  ;;  %v1531_v38 = vpack.c.bf16 %v3538_v37, %v3536_v36 }
  0xdc   : > { %766 = vmatprep.mubr.bf16.mxu1 %v3205_v0 }
  0xe1   : > { %574 = vmatmul.mubr.bf16.gmra.mrb[40].mxu0 %v317_v58 }
  0xe2   : > { %583 = vmatprep.mubr.bf16.mxu0 %v3205_v0 }
  0xe3   : > { %767 = vmatmul.mubr.bf16.gmra.mrb[40].mxu1 %v317_v58 }
  0xe4   : > { %776 = vmatprep.mubr.bf16.mxu1 %v3205_v0 }
  0xe9   : > { %584 = vmatmul.mubr.bf16.gmra.mrb[44].mxu0 %v318_v61 }
  0xea   : > { %593 = vmatprep.mubr.bf16.mxu0 %v3205_v0 }
  0xeb   : > { %777 = vmatmul.mubr.bf16.gmra.mrb[44].mxu1 %v318_v61  ;;  %v3572_v61 = vld [vmem:[#allocation7 + $0x498] sm:$0xff] }
  0xec   : > { %786 = vmatprep.mubr.bf16.mxu1 %v3205_v0 }
  0xf1   : > { %594 = vmatmul.mubr.bf16.gmra.mrb[48].mxu0 %v319_v14 }
  0xf2   : > { %603 = vmatprep.mubr.bf16.mxu0 %v3205_v0 }
  0xf3   : > { %787 = vmatmul.mubr.bf16.gmra.mrb[48].mxu1 %v319_v14  ;;  %v1537_v14 = vpack.c.bf16 %v3563_v55, %v3558_v50  ;;  %v3726_v50 = vld [vmem:[#allocation7 + $0x580] sm:$0xff] }
  0xf4   : > { %796 = vmatprep.mubr.bf16.mxu1 %v3205_v0  ;;  %v3728_v55 = vld [vmem:[#allocation7 + $0x5a0] sm:$0xff] }
  0xf9   : > { %604 = vmatmul.mubr.bf16.gmra.mrb[52].mxu0 %v320_v22 }
  0xfa   : > { %613 = vmatprep.mubr.bf16.mxu0 %v3205_v0 }
  0xfb   : > { %797 = vmatmul.mubr.bf16.gmra.mrb[52].mxu1 %v320_v22  ;;  %v1542_v22 = vpack.c.bf16 %v3574_v62, %v3572_v61  ;;  %v3776_v61 = vld [vmem:[#allocation7 + $0x5d0] sm:$0xff] }
  0xfc   : > { %806 = vmatprep.mubr.bf16.mxu1 %v3205_v0 }
 0x101   : > { %614 = vmatmul.mubr.bf16.gmra.mrb[56].mxu0 %v321_v26 }
 0x102   : > { %623 = vmatprep.mubr.bf16.mxu0 %v3205_v0 }
 0x103   : > { %807 = vmatmul.mubr.bf16.gmra.mrb[56].mxu1 %v321_v26  ;;  %v3613_v26 = vld [vmem:[#allocation7 + $0x4f0] sm:$0xff] }
 0x104   : > { %816 = vmatprep.mubr.bf16.mxu1 %v3205_v0  ;;  %v3534_v0 = vrot.slane %v3523_v33, %v5404_v34 }
 0x109   : > { %624 = vmatmul.mubr.bf16.gmra.mrb[60].mxu0 %v322_v28 }
 0x10b   : > { %817 = vmatmul.mubr.bf16.gmra.mrb[60].mxu1 %v322_v28 }
 0x164   : > { %v475_v23 = vpop.f32.mrb[0].mxu0 }
 0x165   : > { %v476_v41 = vadd.f32 %v475_v23, %v3529_v35  ;;  %v477_v42 = vpop.f32.mrb[1].mxu0  ;;  %v3618_v23 = vld [vmem:[#allocation7 + $0x508] sm:$0xff] }
 0x166   : > { %v478_v46 = vadd.f32 %v477_v42, %v3534_v0  ;;  %v479_v47 = vpop.f32.mrb[2].mxu0  ;;  %v5406_v42 = vsub.s32 2, %v3517_v31  ;;  %v668_v30 = vpop.f32.mrb[0].mxu1 }
 0x167   : > { %v955_v52 = vmul.f32 0.2, %v476_v41  ;;  %v480_v53 = vadd.f32 %v479_v47, %v3529_v35  ;;  %v481_v54 = vpop.f32.mrb[3].mxu0  ;;  %vm827_vm0 = vcmp.gt.f32.partialorder %v476_v41, 0.0 }
 0x168   : > { %v956_v58 = vmul.f32 0.2, %v478_v46  ;;  %v482_v59 = vadd.f32 %v481_v54, %v3534_v0  ;;  %vm828_vm1 = vcmp.gt.f32.partialorder %v478_v46, 0.0 }
 0x169   : > { %vm831_vm2 = vcmp.gt.f32.partialorder %v480_v53, 0.0  ;;  %v959_v63 = vmul.f32 0.2, %v480_v53  ;;  %v1083_v11 = vsel %vm827_vm0, %v476_v41, %v955_v52  ;;  %v3620_v41 = vld [vmem:[#allocation7 + $0x528] sm:$0xff] }
 0x16a   : > { %vm832_vm3 = vcmp.gt.f32.partialorder %v482_v59, 0.0  ;;  %v960_v5 = vmul.f32 0.2, %v482_v59  ;;  %v1084_v20 = vsel %vm828_vm1, %v478_v46, %v956_v58  ;;  %v3630_v58 = vld [vmem:[#allocation7 + $0x518] sm:$0xff] }
 0x16b   : > { %v1087_v12 = vsel %vm831_vm2, %v480_v53, %v959_v63 }
 0x16c   : > { %v1595_v2 = vpack.c.bf16 %v1087_v12, %v1083_v11  ;;  %v485_v19 = vpop.f32.mrb[4].mxu0  ;;  %v1088_v21 = vsel %vm832_vm3, %v482_v59, %v960_v5  ;;  %v3632_v59 = vld [vmem:[#allocation7 + $0x538] sm:$0xff]  ;;  %v3650_v12 = vld [vmem:[#allocation7 + $0x548] sm:$0xff] }
 0x16d   : > { %v486_v27 = vadd.f32 %v485_v19, %v3529_v35  ;;  %v487_v13 = vpop.f32.mrb[5].mxu0  ;;  %v1596_v28 = vpack.c.bf16 %v1088_v21, %v1084_v20  ;;  %v3639_v20 = vld [vmem:[#allocation7 + $0x500] sm:$0xff]  ;;  %v3652_v19 = vld [vmem:[#allocation7 + $0x568] sm:$0xff]  ;;  %v5440_v18 = vpack.c.bf16 %v3632_v59, %v3630_v58  ;;  %v3812_v58 = vld [vmem:[#allocation7 + $0x638] sm:$0xff]  ;;  %v5407_v59 = vsub.s32 3, %v3517_v31 }
 0x16e   : > { %v488_v46 = vadd.f32 %v487_v13, %v3534_v0  ;;  %v489_v47 = vpop.f32.mrb[6].mxu0  ;;  %v3641_v21 = vld [vmem:[#allocation7 + $0x520] sm:$0xff]  ;;  %v3643_v13 = vld [vmem:[#allocation7 + $0x510] sm:$0xff] }
 0x16f   : > { %v963_v63 = vmul.f32 0.2, %v486_v27  ;;  %v490_v5 = vadd.f32 %v489_v47, %v3529_v35  ;;  %v491_v11 = vpop.f32.mrb[7].mxu0  ;;  %1713 = vmatprep.mubr.bf16.mxu0 %v1596_v28  ;;  %2099 = vmatprep.mubr.bf16.mxu1 %v1596_v28  ;;  %vm835_vm4 = vcmp.gt.f32.partialorder %v486_v27, 0.0  ;;  %v3648_v47 = vld [vmem:[#allocation7 + $0x530] sm:$0xff]  ;;  %v3667_v28 = vrot.slane %v3523_v33, %v5406_v42 }
 0x170   : > { %v964_v34 = vmul.f32 0.2, %v488_v46  ;;  %v492_v32 = vadd.f32 %v491_v11, %v3534_v0  ;;  %1714 = vmatmul.mubr.bf16.vlgmr.msra.gmra.mrb[64].mxu0 %v1595_v2  ;;  %2100 = vmatmul.mubr.bf16.vlgmr.msra.gmra.mrb[64].mxu1 %v1595_v2  ;;  %vm836_vm5 = vcmp.gt.f32.partialorder %v488_v46, 0.0  ;;  %v3660_v2 = vld [vmem:[#allocation7 + $0x558] sm:$0xff] }
 0x171   : > { %vm839_vm6 = vcmp.gt.f32.partialorder %v490_v5, 0.0  ;;  %v967_v54 = vmul.f32 0.2, %v490_v5  ;;  %1875 = vmatpush1.bf16.msra.mxu0 %v1531_v38  ;;  %2261 = vmatpush1.bf16.msra.mxu1 %v1533_v60  ;;  %v3662_v11 = vld [vmem:[#allocation7 + $0x578] sm:$0xff]  ;;  %v1091_v38 = vsel %vm835_vm4, %v486_v27, %v963_v63  ;;  %v3699_v63 = vld [vmem:[#allocation7 + $0x5a8] sm:$0xff] }
 0x172   : > { %vm840_vm7 = vcmp.gt.f32.partialorder %v492_v32, 0.0  ;;  %v968_v53 = vmul.f32 0.2, %v492_v32  ;;  %1876 = vmatprep.subr.bf16.mxu0 %v1536_v1  ;;  %2262 = vmatprep.subr.bf16.mxu1 %v1538_v6  ;;  %v3693_v1 = vld [vmem:[#allocation7 + $0x588] sm:$0xff]  ;;  %v1092_v42 = vsel %vm836_vm5, %v488_v46, %v964_v34  ;;  %v3713_v34 = vpop.f32.mrb[1].mxu1 }
 0x173   : > { %v1095_v60 = vsel %vm839_vm6, %v490_v5, %v967_v54  ;;  %v1554_v54 = vpack.c.bf16 %v3662_v11, %v3660_v2  ;;  %v3701_v5 = vld [vmem:[#allocation7 + $0x598] sm:$0xff]  ;;  %v3859_v11 = vld [vmem:[#allocation7 + $0x640] sm:$0xff] }
 0x174   : > { %v495_v6 = vpop.f32.mrb[8].mxu0  ;;  %v1096_v37 = vsel %vm840_vm7, %v492_v32, %v968_v53  ;;  %v1599_v27 = vpack.c.bf16 %v1095_v60, %v1091_v38  ;;  %v669_v32 = vadd.f32 %v668_v30, %v3667_v28  ;;  %v3744_v60 = vld [vmem:[#allocation7 + $0x5e8] sm:$0xff]  ;;  %v3857_v2 = vld [vmem:[#allocation7 + $0x678] sm:$0xff] }
 0x175   : > { %v496_v36 = vadd.f32 %v495_v6, %v3529_v35  ;;  %v497_v52 = vpop.f32.mrb[9].mxu0  ;;  %v1600_v29 = vpack.c.bf16 %v1096_v37, %v1092_v42  ;;  %1877 = vmatpush1.bf16.msra.mxu0 %v1535_v7  ;;  %2263 = vmatpush1.bf16.msra.mxu1 %v1537_v14  ;;  %v3730_v7 = vld [vmem:[#allocation7 + $0x590] sm:$0xff]  ;;  %v672_v14 = vpop.f32.mrb[2].mxu1  ;;  %v5433_v6 = vpack.c.bf16 %v3580_v3, %v3576_v51  ;;  %v3762_v3 = vld [vmem:[#allocation7 + $0x5d8] sm:$0xff] }
 0x176   : > { %v498_v46 = vadd.f32 %v497_v52, %v3534_v0  ;;  %v499_v53 = vpop.f32.mrb[10].mxu0  ;;  %1878 = vmatprep.subr.bf16.mxu0 %v1540_v15  ;;  %2264 = vmatprep.subr.bf16.mxu1 %v1542_v22  ;;  %v3737_v15 = vld [vmem:[#allocation7 + $0x5b0] sm:$0xff]  ;;  %v3739_v22 = vld [vmem:[#allocation7 + $0x5c8] sm:$0xff]  ;;  %v3741_v52 = vpop.f32.mrb[3].mxu1  ;;  %vm829_vm11 = vcmp.gt.f32.partialorder %v669_v32, 0.0 }
 0x177   : > { %v971_v42 = vmul.f32 0.2, %v496_v36  ;;  %v500_v56 = vadd.f32 %v499_v53, %v3529_v35  ;;  %v501_v57 = vpop.f32.mrb[11].mxu0  ;;  %1723 = vmatprep.mubr.bf16.mxu0 %v1600_v29  ;;  %2109 = vmatprep.mubr.bf16.mxu1 %v1600_v29  ;;  %vm843_vm8 = vcmp.gt.f32.partialorder %v496_v36, 0.0  ;;  %v957_v29 = vmul.f32 0.2, %v669_v32 }
 0x178   : > { %v972_v37 = vmul.f32 0.2, %v498_v46  ;;  %v502_v38 = vadd.f32 %v501_v57, %v3534_v0  ;;  %1724 = vmatmul.mubr.bf16.gmra.mrb[68].mxu0 %v1599_v27  ;;  %2110 = vmatmul.mubr.bf16.gmra.mrb[68].mxu1 %v1599_v27  ;;  %vm844_vm9 = vcmp.gt.f32.partialorder %v498_v46, 0.0  ;;  %v5434_v53 = vpack.c.bf16 %v3588_v8, %v3582_v4 }
 0x179   : > { %vm847_vm10 = vcmp.gt.f32.partialorder %v500_v56, 0.0  ;;  %v975_v30 = vmul.f32 0.2, %v500_v56  ;;  %1879 = vmatpush1.bf16.msra.mxu0 %v5433_v6  ;;  %v5435_v27 = vpack.c.bf16 %v3592_v10, %v3590_v9  ;;  %v5436_v57 = vpack.c.bf16 %v3601_v17, %v3599_v16  ;;  %v3767_v9 = vld [vmem:[#allocation7 + $0x5f8] sm:$0xff]  ;;  %v3769_v10 = vld [vmem:[#allocation7 + $0x5c0] sm:$0xff] }
 0x17a   : > { %2265 = vmatpush1.bf16.msra.mxu1 %v5434_v53  ;;  %vm848_vm12 = vcmp.gt.f32.partialorder %v502_v38, 0.0  ;;  %v976_v62 = vmul.f32 0.2, %v502_v38  ;;  %v1099_v4 = vsel %vm843_vm8, %v496_v36, %v971_v42  ;;  %v3771_v16 = vld [vmem:[#allocation7 + $0x5e0] sm:$0xff]  ;;  %v673_v17 = vadd.f32 %v672_v14, %v3667_v28  ;;  %v3779_v42 = vpop.f32.mrb[4].mxu1  ;;  %v3788_v14 = vld [vmem:[#allocation7 + $0x5f0] sm:$0xff] }
 0x17b   : > { %1880 = vmatprep.subr.bf16.mxu0 %v5435_v27  ;;  %2266 = vmatprep.subr.bf16.mxu1 %v5436_v57  ;;  %v1103_v8 = vsel %vm847_vm10, %v500_v56, %v975_v30  ;;  %v1100_v27 = vsel %vm844_vm9, %v498_v46, %v972_v37  ;;  %v1085_v36 = vsel %vm829_vm11, %v669_v32, %v957_v29  ;;  %v3790_v37 = vpop.f32.mrb[5].mxu1 }
 0x17c   : > { %v505_v53 = vpop.f32.mrb[12].mxu0  ;;  %v1104_v57 = vsel %vm848_vm12, %v502_v38, %v976_v62  ;;  %v1603_v51 = vpack.c.bf16 %v1103_v8, %v1099_v4  ;;  %v5438_v46 = vpack.c.bf16 %v3613_v26, %v3611_v25  ;;  %vm833_vm13 = vcmp.gt.f32.partialorder %v673_v17, 0.0  ;;  %v3803_v26 = vld [vmem:[#allocation7 + $0x608] sm:$0xff]  ;;  %v3807_v4 = vld [vmem:[#allocation7 + $0x618] sm:$0xff]  ;;  %v3809_v8 = vpop.f32.mrb[6].mxu1  ;;  %v3835_v25 = vld [vmem:[#allocation7 + $0x630] sm:$0xff] }
 0x17d   : > { %v506_v56 = vadd.f32 %v505_v53, %v3529_v35  ;;  %v507_v30 = vpop.f32.mrb[13].mxu0  ;;  %v1604_v6 = vpack.c.bf16 %v1104_v57, %v1100_v27  ;;  %1881 = vmatpush1.bf16.msra.mxu0 %v5437_v49  ;;  %v961_v62 = vmul.f32 0.2, %v673_v17  ;;  %v5439_v29 = vpack.c.bf16 %v3620_v41, %v3618_v23  ;;  %v3805_v49 = vld [vmem:[#allocation7 + $0x628] sm:$0xff]  ;;  %v3816_v57 = vpop.f32.mrb[7].mxu1 }
 0x17e   : > { %2267 = vmatpush1.bf16.msra.mxu1 %v5438_v46  ;;  %v508_v32 = vadd.f32 %v507_v30, %v3534_v0  ;;  %v509_v38 = vpop.f32.mrb[14].mxu0 }
 0x17f   : > { %1882 = vmatprep.subr.bf16.mxu0 %v5439_v29  ;;  %2268 = vmatprep.subr.bf16.mxu1 %v5440_v18  ;;  %v979_v23 = vmul.f32 0.2, %v506_v56  ;;  %v510_v41 = vadd.f32 %v509_v38, %v3529_v35  ;;  %v511_v53 = vpop.f32.mrb[15].mxu0  ;;  %v1089_v27 = vsel %vm833_vm13, %v673_v17, %v961_v62  ;;  %vm851_vm14 = vcmp.gt.f32.partialorder %v506_v56, 0.0  ;;  %v3819_v29 = vld [vmem:[#allocation7 + $0x600] sm:$0xff] }
 0x180   : > { %1733 = vmatprep.mubr.bf16.mxu0 %v1604_v6  ;;  %2119 = vmatprep.mubr.bf16.mxu1 %v1604_v6  ;;  %v980_v30 = vmul.f32 0.2, %v508_v32  ;;  %v512_v46 = vadd.f32 %v511_v53, %v3534_v0  ;;  %v3821_v38 = vld [vmem:[#allocation7 + $0x620] sm:$0xff]  ;;  %v3823_v18 = vpack.c.bf16 %v1089_v27, %v1085_v36  ;;  %vm852_vm15 = vcmp.gt.f32.partialorder %v508_v32, 0.0  ;;  %v3833_v53 = vld [vmem:[#allocation7 + $0x610] sm:$0xff] }
 0x181   : > { %1734 = vmatmul.mubr.bf16.gmra.mrb[72].mxu0 %v1603_v51  ;;  %2120 = vmatmul.mubr.bf16.gmra.mrb[72].mxu1 %v1603_v51  ;;  %vm855_vm0 = vcmp.gt.f32.partialorder %v510_v41, 0.0  ;;  %v983_v6 = vmul.f32 0.2, %v510_v41  ;;  %v5442_v17 = vpack.c.bf16 %v3641_v21, %v3639_v20  ;;  %v5443_v62 = vpack.c.bf16 %v3648_v47, %v3643_v13  ;;  %v3847_v13 = vld [vmem:[#allocation7 + $0x648] sm:$0xff]  ;;  %v3876_v51 = vpop.f32.mrb[8].mxu1 }
 0x182   : > { %5441 = vst [vmem:[#allocation13_spill] sm:$0xff] %v3823_v18  ;;  %vm856_vm1 = vcmp.gt.f32.partialorder %v512_v46, 0.0  ;;  %v984_v36 = vmul.f32 0.2, %v512_v46  ;;  %v5444_v27 = vpack.c.bf16 %v3652_v19, %v3650_v12  ;;  %v3849_v47 = vld [vmem:[#allocation7 + $0x668] sm:$0xff]  ;;  %v1108_v20 = vsel %vm852_vm15, %v508_v32, %v980_v30  ;;  %v3874_v19 = vld [vmem:[#allocation7 + $0x670] sm:$0xff] }
 0x183   : > { %1883 = vmatpush1.bf16.msra.mxu0 %v5442_v17  ;;  %2269 = vmatpush1.bf16.msra.mxu1 %v5443_v62  ;;  %v3851_v17 = vld [vmem:[#allocation7 + $0x658] sm:$0xff]  ;;  %v1107_v62 = vsel %vm851_vm14, %v506_v56, %v979_v23  ;;  %v1111_v12 = vsel %vm855_vm0, %v510_v41, %v983_v6  ;;  %v3872_v6 = vld [vmem:[#allocation7 + $0x650] sm:$0xff]  ;;  %v5446_v32 = vpack.c.bf16 %v3691_v45, %v3689_v44  ;;  %v3900_v45 = vld [vmem:[#allocation7 + $0x688] sm:$0xff] }
 0x184   : > { %1884 = vmatprep.subr.bf16.mxu0 %v5444_v27  ;;  %2270 = vmatprep.subr.bf16.mxu1 %v1554_v54  ;;  %v3861_v54 = vld [vmem:[#allocation7 + $0x660] sm:$0xff]  ;;  %v3866_v27 = vrot.slane %v3523_v33, %v5407_v59  ;;  %v515_v21 = vpop.f32.mrb[16].mxu0  ;;  %v1112_v56 = vsel %vm856_vm1, %v512_v46, %v984_v36  ;;  %v1607_v23 = vpack.c.bf16 %v1111_v12, %v1107_v62  ;;  %v3887_v46 = vpop.f32.mrb[9].mxu1 }
 0x185   : > { %v516_v24 = vadd.f32 %v515_v21, %v3529_v35  ;;  %v517_v48 = vpop.f32.mrb[17].mxu0  ;;  %v1608_v33 = vpack.c.bf16 %v1112_v56, %v1108_v20  ;;  %v5445_v59 = vpack.c.bf16 %v3681_v40, %v3679_v39  ;;  %v5447_v21 = vpack.c.bf16 %v3699_v63, %v3693_v1  ;;  %v3906_v20 = vpop.f32.mrb[10].mxu1  ;;  %v3915_v56 = vld [vmem:[#allocation7 + $0x6b8] sm:$0xff] }
 0x186   : > { %v518_v36 = vadd.f32 %v517_v48, %v3534_v0  ;;  %v519_v62 = vpop.f32.mrb[18].mxu0  ;;  %v5448_v39 = vpack.c.bf16 %v3703_v43, %v3701_v5  ;;  %v3904_v48 = vld [vmem:[#allocation7 + $0x698] sm:$0xff]  ;;  %v3913_v5 = vadd.f32 %v3713_v34, %v3866_v27  ;;  %v3926_v43 = vpop.f32.mrb[11].mxu1  ;;  %v5450_v44 = vpack.c.bf16 %v3728_v55, %v3726_v50 }
 0x187   : > { %1885 = vmatpush1.bf16.msra.mxu0 %v5445_v59  ;;  %2271 = vmatpush1.bf16.msra.mxu1 %v5446_v32  ;;  %v3902_v59 = vld [vmem:[#allocation7 + $0x6a8] sm:$0xff]  ;;  %v987_v1 = vmul.f32 0.2, %v516_v24  ;;  %v520_v63 = vadd.f32 %v519_v62, %v3529_v35  ;;  %v521_v12 = vpop.f32.mrb[19].mxu0  ;;  %v3917_v32 = vld [vmem:[#allocation7 + $0x680] sm:$0xff]  ;;  %vm859_vm2 = vcmp.gt.f32.partialorder %v516_v24, 0.0  ;;  %v5451_v40 = vpack.c.bf16 %v3737_v15, %v3730_v7 }
 0x188   : > { %1886 = vmatprep.subr.bf16.mxu0 %v5447_v21  ;;  %2272 = vmatprep.subr.bf16.mxu1 %v5448_v39  ;;  %v3919_v21 = vld [vmem:[#allocation7 + $0x6a0] sm:$0xff]  ;;  %v988_v39 = vmul.f32 0.2, %v518_v36  ;;  %v522_v62 = vadd.f32 %v521_v12, %v3534_v0  ;;  %5449 = vst [vmem:[#allocation14_spill] sm:$0xff] %v3926_v43  ;;  %vm860_vm3 = vcmp.gt.f32.partialorder %v518_v36, 0.0  ;;  %v5453_v30 = vpack.c.bf16 %v3767_v9, %v3762_v3  ;;  %v3946_v7 = vld [vmem:[#allocation7 + $0x690] sm:$0xff] }
 0x189   : > { %1743 = vmatprep.mubr.bf16.mxu0 %v1608_v33  ;;  %2129 = vmatprep.mubr.bf16.mxu1 %v1608_v33  ;;  %v3924_v33 = vadd.f32 %v3741_v52, %v3866_v27  ;;  %vm863_vm4 = vcmp.gt.f32.partialorder %v520_v63, 0.0  ;;  %v991_v34 = vmul.f32 0.2, %v520_v63  ;;  %v5452_v52 = vpack.c.bf16 %v3744_v60, %v3739_v22  ;;  %v3948_v15 = vld [vmem:[#allocation7 + $0x6b0] sm:$0xff]  ;;  %v3955_v3 = vld [vmem:[#allocation7 + $0x6e8] sm:$0xff]  ;;  %v3957_v9 = vld [vmem:[#allocation7 + $0x6d8] sm:$0xff] }
 0x18a   : > { %1744 = vmatmul.mubr.bf16.gmra.mrb[76].mxu0 %v1607_v23  ;;  %2130 = vmatmul.mubr.bf16.gmra.mrb[76].mxu1 %v1607_v23  ;;  %vm864_vm5 = vcmp.gt.f32.partialorder %v522_v62, 0.0  ;;  %v992_v12 = vmul.f32 0.2, %v522_v62  ;;  %vm830_vm6 = vcmp.gt.f32.partialorder %v3913_v5, 0.0  ;;  %v958_v60 = vmul.f32 0.2, %v3913_v5 }
 0x18b   : > { %1887 = vmatpush1.bf16.msra.mxu0 %v5450_v44  ;;  %2273 = vmatpush1.bf16.msra.mxu1 %v5451_v40  ;;  %v3950_v40 = vld [vmem:[#allocation7 + $0x6c8] sm:$0xff]  ;;  %v1115_v44 = vsel %vm859_vm2, %v516_v24, %v987_v1  ;;  %v1119_v22 = vsel %vm863_vm4, %v520_v63, %v991_v34  ;;  %v1116_v55 = vsel %vm860_vm3, %v518_v36, %v988_v39  ;;  %v962_v41 = vmul.f32 0.2, %v3924_v33  ;;  %v3964_v24 = vld [vmem:[#allocation7 + $0x6c0] sm:$0xff]  ;;  %v3968_v63 = vpop.f32.mrb[12].mxu1 }
 0x18c   : > { %1888 = vmatprep.subr.bf16.mxu0 %v5452_v52  ;;  %2274 = vmatprep.subr.bf16.mxu1 %v5453_v30  ;;  %v3959_v30 = vld [vmem:[#allocation7 + $0x6f8] sm:$0xff]  ;;  %v525_v52 = vpop.f32.mrb[20].mxu0  ;;  %v1120_v50 = vsel %vm864_vm5, %v522_v62, %v992_v12  ;;  %v1611_v23 = vpack.c.bf16 %v1119_v22, %v1115_v44  ;;  %v3966_v1 = vld [vmem:[#allocation7 + $0x6e0] sm:$0xff]  ;;  %5454 = vst [vmem:[#allocation15_spill] sm:$0xff] %v3968_v63  ;;  %vm834_vm7 = vcmp.gt.f32.partialorder %v3924_v33, 0.0  ;;  %v3980_v62 = vld [vmem:[#allocation7 + $0x6d0] sm:$0xff] }
 0x18d   : > { %v526_v34 = vadd.f32 %v525_v52, %v3529_v35  ;;  %v527_v31 = vpop.f32.mrb[21].mxu0  ;;  %v1612_v18 = vpack.c.bf16 %v1120_v50, %v1116_v55  ;;  %v5455_v43 = vpack.c.bf16 %v3771_v16, %v3769_v10  ;;  %v5456_v36 = vpack.c.bf16 %v3788_v14, %v3776_v61  ;;  %v3982_v12 = vpop.f32.mrb[13].mxu1  ;;  %v3997_v55 = vld [vmem:[#allocation7 + $0x708] sm:$0xff]  ;;  %v4018_v16 = vld [vmem:[#allocation7 + $0x710] sm:$0xff] }
 0x18e   : > { %5457 = vst [vmem:[#allocation16_spill] sm:$0xff] %v3982_v12  ;;  %v528_v44 = vadd.f32 %v527_v31, %v3534_v0  ;;  %v529_v50 = vpop.f32.mrb[22].mxu0  ;;  %v5458_v10 = vpack.c.bf16 %v3805_v49, %v3803_v26  ;;  %v5459_v61 = vpack.c.bf16 %v3812_v58, %v3807_v4  ;;  %v3999_v31 = vld [vmem:[#allocation7 + $0x728] sm:$0xff]  ;;  %v4001_v22 = vpop.f32.mrb[14].mxu1  ;;  %v4006_v58 = vld [vmem:[#allocation7 + $0x718] sm:$0xff]  ;;  %v1090_v39 = vsel %vm834_vm7, %v3924_v33, %v962_v41 }
 0x18f   : > { %1889 = vmatpush1.bf16.msra.mxu0 %v5455_v43  ;;  %2275 = vmatpush1.bf16.msra.mxu1 %v5456_v36  ;;  %v3995_v43 = vld [vmem:[#allocation7 + $0x6f0] sm:$0xff]  ;;  %5460 = vst [vmem:[#allocation17_spill] sm:$0xff] %v4001_v22  ;;  %v995_v26 = vmul.f32 0.2, %v526_v34  ;;  %v530_v49 = vadd.f32 %v529_v50, %v3529_v35  ;;  %v531_v52 = vpop.f32.mrb[23].mxu0  ;;  %v4008_v36 = vld [vmem:[#allocation7 + $0x738] sm:$0xff]  ;;  %v5464_v33 = vpack.c.bf16 %v3849_v47, %v3847_v13 }
 0x190   : > { %1890 = vmatprep.subr.bf16.mxu0 %v5458_v10  ;;  %2276 = vmatprep.subr.bf16.mxu1 %v5459_v61  ;;  %v4010_v10 = vld [vmem:[#allocation7 + $0x700] sm:$0xff]  ;;  %v1086_v61 = vsel %vm830_vm6, %v3913_v5, %v958_v60  ;;  %vm867_vm8 = vcmp.gt.f32.partialorder %v526_v34, 0.0  ;;  %v996_v14 = vmul.f32 0.2, %v528_v44  ;;  %v532_v50 = vadd.f32 %v531_v52, %v3534_v0  ;;  %v4020_v4 = vpop.f32.mrb[15].mxu1  ;;  %v4033_v52 = vld [vmem:[#allocation7 + $0x730] sm:$0xff] }
 0x191   : > { %1753 = vmatprep.mubr.bf16.mxu0 %v1612_v18  ;;  %2139 = vmatprep.mubr.bf16.mxu1 %v1612_v18  ;;  %v4016_v18 = vld [vmem:[#allocation7 + $0x720] sm:$0xff]  ;;  %5461 = vst [vmem:[#allocation18_spill] sm:$0xff] %v4020_v4  ;;  %vm868_vm9 = vcmp.gt.f32.partialorder %v528_v44, 0.0  ;;  %vm871_vm10 = vcmp.gt.f32.partialorder %v530_v49, 0.0  ;;  %v999_v22 = vmul.f32 0.2, %v530_v49  ;;  %v5462_v5 = vpack.c.bf16 %v3821_v38, %v3819_v29 }
 0x192   : > { %1754 = vmatmul.mubr.bf16.gmra.mrb[80].mxu0 %v1611_v23  ;;  %2140 = vmatmul.mubr.bf16.gmra.mrb[80].mxu1 %v1611_v23  ;;  %v5463_v23 = vpack.c.bf16 %v3835_v25, %v3833_v53  ;;  %v4035_v4 = vld [vmem:[#allocation7 + $0x748] sm:$0xff]  ;;  %vm872_vm11 = vcmp.gt.f32.partialorder %v532_v50, 0.0  ;;  %v1000_v41 = vmul.f32 0.2, %v532_v50  ;;  %v5465_v29 = vpack.c.bf16 %v3857_v2, %v3851_v17  ;;  %v4057_v17 = vld [vmem:[#allocation7 + $0x740] sm:$0xff] }
 0x193   : > { %1891 = vmatpush1.bf16.msra.mxu0 %v5462_v5  ;;  %v4047_v53 = vld [vmem:[#allocation7 + $0x768] sm:$0xff]  ;;  %v4049_v5 = vld [vmem:[#allocation7 + $0x758] sm:$0xff]  ;;  %v1123_v60 = vsel %vm867_vm8, %v526_v34, %v995_v26  ;;  %v1127_v13 = vsel %vm871_vm10, %v530_v49, %v999_v22  ;;  %v4059_v2 = vld [vmem:[#allocation7 + $0x760] sm:$0xff]  ;;  %v1124_v25 = vsel %vm868_vm9, %v528_v44, %v996_v14  ;;  %v4071_v26 = vpop.f32.mrb[16].mxu1  ;;  %v5467_v44 = vpack.c.bf16 %v3861_v54, %v3859_v11 }
 0x194   : > { %2277 = vmatpush1.bf16.msra.mxu1 %v5463_v23  ;;  %1892 = vmatprep.subr.bf16.mxu0 %v5464_v33  ;;  %v4051_v23 = vld [vmem:[#allocation7 + $0x778] sm:$0xff]  ;;  %v4061_v33 = vld [vmem:[#allocation7 + $0x750] sm:$0xff]  ;;  %v535_v38 = vpop.f32.mrb[24].mxu0  ;;  %v1128_v12 = vsel %vm872_vm11, %v532_v50, %v1000_v41  ;;  %v1615_v63 = vpack.c.bf16 %v1127_v13, %v1123_v60  ;;  %v4073_v49 = vld [vmem:[#allocation7 + $0x788] sm:$0xff]  ;;  %v5468_v14 = vpack.c.bf16 %v3874_v19, %v3872_v6  ;;  %v4086_v60 = vpop.f32.mrb[17].mxu1 }
 0x195   : > { %2278 = vmatprep.subr.bf16.mxu1 %v5465_v29  ;;  %v4063_v29 = vpack.c.bf16 %v1090_v39, %v1086_v61  ;;  %v4069_v22 = vld [vmem:[#allocation7 + $0x770] sm:$0xff]  ;;  %v4075_v47 = vld [vmem:[#allocation7 + $0x7a8] sm:$0xff]  ;;  %v536_v39 = vadd.f32 %v535_v38, %v3529_v35  ;;  %v537_v61 = vpop.f32.mrb[25].mxu0  ;;  %v5469_v38 = vpack.c.bf16 %v3902_v59, %v3900_v45  ;;  %v5470_v11 = vpack.c.bf16 %v3915_v56, %v3904_v48  ;;  %v4099_v6 = vld [vmem:[#allocation7 + $0x798] sm:$0xff] }
 0x196   : > { %v538_v41 = vadd.f32 %v537_v61, %v3534_v0  ;;  %v539_v13 = vpop.f32.mrb[26].mxu0  ;;  %v4105_v61 = vld [vmem:[#allocation7 + $0x780] sm:$0xff]  ;;  %v4123_v48 = vld [vmem:[#allocation7 + $0x7c8] sm:$0xff]  ;;  %v5473_v34 = vpack.c.bf16 %v3919_v21, %v3917_v32  ;;  %v5478_v32 = vpack.c.bf16 %v3995_v43, %v3980_v62 }
 0x197   : > { %5466 = vst [vmem:[#allocation19_spill] sm:$0xff] %v4063_v29  ;;  %v1616_v29 = vpack.c.bf16 %v1128_v12, %v1124_v25  ;;  %1893 = vmatpush1.bf16.msra.mxu0 %v5467_v44  ;;  %v4101_v12 = vld [vmem:[#allocation7 + $0x7b8] sm:$0xff]  ;;  %v4103_v25 = vpop.f32.mrb[18].mxu1  ;;  %v1003_v45 = vmul.f32 0.2, %v536_v39  ;;  %v540_v59 = vadd.f32 %v539_v13, %v3529_v35  ;;  %v541_v44 = vpop.f32.mrb[27].mxu0 }
 0x198   : > { %2279 = vmatpush1.bf16.msra.mxu1 %v5468_v14  ;;  %1894 = vmatprep.subr.bf16.mxu0 %v5469_v38  ;;  %5471 = vst [vmem:[#allocation20_spill] sm:$0xff] %v4103_v25  ;;  %v4112_v14 = vld [vmem:[#allocation7 + $0x7a0] sm:$0xff]  ;;  %v4114_v38 = vld [vmem:[#allocation7 + $0x790] sm:$0xff]  ;;  %vm875_vm12 = vcmp.gt.f32.partialorder %v536_v39, 0.0  ;;  %v1004_v54 = vmul.f32 0.2, %v538_v41  ;;  %v542_v19 = vadd.f32 %v541_v44, %v3534_v0  ;;  %v5474_v44 = vpack.c.bf16 %v3948_v15, %v3946_v7 }
 0x199   : > { %2280 = vmatprep.subr.bf16.mxu1 %v5470_v11  ;;  %1763 = vmatprep.mubr.bf16.mxu0 %v1616_v29  ;;  %v4116_v11 = vpop.f32.mrb[19].mxu1  ;;  %v4121_v13 = vld [vmem:[#allocation7 + $0x7b0] sm:$0xff]  ;;  %v4125_v56 = vld [vmem:[#allocation7 + $0x7e8] sm:$0xff]  ;;  %vm876_vm13 = vcmp.gt.f32.partialorder %v538_v41, 0.0  ;;  %vm879_vm14 = vcmp.gt.f32.partialorder %v540_v59, 0.0  ;;  %v5476_v25 = vpack.c.bf16 %v3959_v30, %v3957_v9  ;;  %v4145_v7 = vld [vmem:[#allocation7 + $0x7d8] sm:$0xff] }
 0x19a   : > { %2149 = vmatprep.mubr.bf16.mxu1 %v1616_v29  ;;  %5472 = vst [vmem:[#allocation21_spill] sm:$0xff] %v4116_v11  ;;  %1764 = vmatmul.mubr.bf16.gmra.mrb[84].mxu0 %v1615_v63  ;;  %v681_v29 = vadd.f32 %v3790_v37, %v3866_v27  ;;  %v1007_v50 = vmul.f32 0.2, %v540_v59  ;;  %v685_v37 = vadd.f32 %v3816_v57, %v3866_v27  ;;  %vm880_vm15 = vcmp.gt.f32.partialorder %v542_v19, 0.0  ;;  %v4154_v9 = vld [vmem:[#allocation7 + $0x7c0] sm:$0xff] }
 0x19b   : > { %2150 = vmatmul.mubr.bf16.gmra.mrb[84].mxu1 %v1615_v63  ;;  %1895 = vmatpush1.bf16.msra.mxu0 %v5473_v34  ;;  %v1008_v63 = vmul.f32 0.2, %v542_v19  ;;  %v5475_v11 = vpack.c.bf16 %v3955_v3, %v3950_v40  ;;  %v1131_v57 = vsel %vm875_vm12, %v536_v39, %v1003_v45  ;;  %v4152_v3 = vld [vmem:[#allocation7 + $0x7f8] sm:$0xff]  ;;  %v4156_v30 = vld [vmem:[#allocation7 + $0x7e0] sm:$0xff]  ;;  %v5477_v40 = vpack.c.bf16 %v3966_v1, %v3964_v24 }
 0x19c   : > { %2281 = vmatpush1.bf16.msra.mxu1 %v5474_v44  ;;  %v1135_v15 = vsel %vm879_vm14, %v540_v59, %v1007_v50  ;;  %v966_v39 = vmul.f32 0.2, %v681_v29  ;;  %v4160_v50 = vpop.f32.mrb[20].mxu1  ;;  %vm838_vm0 = vcmp.gt.f32.partialorder %v681_v29, 0.0  ;;  %vm842_vm1 = vcmp.gt.f32.partialorder %v685_v37, 0.0 }
 0x19d   : > { %1896 = vmatprep.subr.bf16.mxu0 %v5475_v11  ;;  %2282 = vmatprep.subr.bf16.mxu1 %v5476_v25  ;;  %v545_v25 = vpop.f32.mrb[28].mxu0  ;;  %v1132_v11 = vsel %vm876_vm13, %v538_v41, %v1004_v54  ;;  %v1136_v44 = vsel %vm880_vm15, %v542_v19, %v1008_v63  ;;  %v1619_v21 = vpack.c.bf16 %v1135_v15, %v1131_v57  ;;  %v970_v41 = vmul.f32 0.2, %v685_v37  ;;  %v4169_v54 = vpop.f32.mrb[21].mxu1 }
 0x19e   : > { %v546_v45 = vadd.f32 %v545_v25, %v3529_v35  ;;  %v547_v59 = vpop.f32.mrb[29].mxu0  ;;  %v1620_v34 = vpack.c.bf16 %v1136_v44, %v1132_v11  ;;  %v5479_v57 = vpack.c.bf16 %v3999_v31, %v3997_v55  ;;  %v5480_v15 = vpack.c.bf16 %v4008_v36, %v4006_v58  ;;  %v4180_v1 = vpop.f32.mrb[22].mxu1 }
 0x19f   : > { %1897 = vmatpush1.bf16.msra.mxu0 %v5477_v40  ;;  %v548_v19 = vadd.f32 %v547_v59, %v3534_v0  ;;  %v549_v63 = vpop.f32.mrb[30].mxu0  ;;  %v1594_v24 = vpack.c.bf16 %v4152_v3, %v4145_v7  ;;  %v1591_v62 = vpack.c.bf16 %v4156_v30, %v4154_v9  ;;  %v4187_v55 = vadd.f32 %v3779_v42, %v3667_v28  ;;  %v4193_v58 = vpop.f32.mrb[23].mxu1 }
 0x1a0   : > { %2283 = vmatpush1.bf16.msra.mxu1 %v5478_v32  ;;  %1898 = vmatprep.subr.bf16.mxu0 %v5479_v57  ;;  %v1011_v43 = vmul.f32 0.2, %v546_v45  ;;  %v550_v32 = vadd.f32 %v549_v63, %v3529_v35  ;;  %v551_v40 = vpop.f32.mrb[31].mxu0  ;;  %v4191_v31 = vadd.f32 %v3809_v8, %v3667_v28  ;;  %vm883_vm2 = vcmp.gt.f32.partialorder %v546_v45, 0.0 }
 0x1a1   : > { %2284 = vmatprep.subr.bf16.mxu1 %v5480_v15  ;;  %1773 = vmatprep.mubr.bf16.mxu0 %v1620_v34  ;;  %v1012_v36 = vmul.f32 0.2, %v548_v19  ;;  %v552_v25 = vadd.f32 %v551_v40, %v3534_v0  ;;  %v1094_v11 = vsel %vm838_vm0, %v681_v29, %v966_v39  ;;  %vm884_vm3 = vcmp.gt.f32.partialorder %v548_v19, 0.0  ;;  %v4228_v39 = vld [vmem:[#allocation7 + $0x7f0] sm:$0xff] }
 0x1a2   : > { %2159 = vmatprep.mubr.bf16.mxu1 %v1620_v34  ;;  %1774 = vmatmul.mubr.bf16.gmra.mrb[88].mxu0 %v1619_v21  ;;  %vm887_vm4 = vcmp.gt.f32.partialorder %v550_v32, 0.0  ;;  %v1015_v34 = vmul.f32 0.2, %v550_v32  ;;  %v5481_v42 = vpack.c.bf16 %v4016_v18, %v4010_v10  ;;  %v5482_v8 = vpack.c.bf16 %v4033_v52, %v4018_v16 }
 0x1a3   : > { %2160 = vmatmul.mubr.bf16.gmra.mrb[88].mxu1 %v1619_v21  ;;  %v1098_v44 = vsel %vm842_vm1, %v685_v37, %v970_v41  ;;  %vm888_vm5 = vcmp.gt.f32.partialorder %v552_v25, 0.0  ;;  %v1016_v59 = vmul.f32 0.2, %v552_v25  ;;  %v4206_v21 = vadd.f32 %v3876_v51, %v3667_v28 }
 0x1a4   : > { %1899 = vmatpush1.bf16.msra.mxu0 %v5481_v42  ;;  %2285 = vmatpush1.bf16.msra.mxu1 %v5482_v8  ;;  %v4210_v29 = vadd.f32 %v3887_v46, %v3866_v27  ;;  %v5483_v10 = vpack.c.bf16 %v4047_v53, %v4035_v4  ;;  %v5484_v16 = vpack.c.bf16 %v4051_v23, %v4049_v5  ;;  %v4220_v37 = vmul.f32 0.2, %v4187_v55  ;;  %v4226_v46 = vld [vmem:[#allocation7 + $0x7d0] sm:$0xff]  ;;  %v555_v4 = vpop.f32.mrb[32].mxu0  ;;  %v4232_v23 = vpop.f32.mrb[24].mxu1 }
 0x1a5   : > { %v1139_v18 = vsel %vm883_vm2, %v546_v45, %v1011_v43  ;;  %v1143_v52 = vsel %vm887_vm4, %v550_v32, %v1015_v34  ;;  %v4224_v51 = vadd.f32 %v3906_v20, %v3667_v28  ;;  %v1140_v53 = vsel %vm884_vm3, %v548_v19, %v1012_v36  ;;  %v557_v57 = vpop.f32.mrb[33].mxu0  ;;  %v4247_v32 = vpop.f32.mrb[25].mxu1 }
 0x1a6   : > { %1900 = vmatprep.subr.bf16.mxu0 %v5483_v10  ;;  %2286 = vmatprep.subr.bf16.mxu1 %v5484_v16  ;;  %v1144_v41 = vsel %vm888_vm5, %v552_v25, %v1016_v59  ;;  %v1623_v5 = vpack.c.bf16 %v1143_v52, %v1139_v18  ;;  %vm837_vm6 = vcmp.gt.f32.partialorder %v4187_v55, 0.0  ;;  %v4234_v45 = vpack.c.bf16 %v1098_v44, %v1094_v11  ;;  %v559_v36 = vpop.f32.mrb[34].mxu0  ;;  %v5490_v44 = vld [vmem:[#allocation14_spill] sm:$0xff]  ;;  %v5492_v52 = vld [vmem:[#allocation16_spill] sm:$0xff] }
 0x1a7   : > { %v556_v63 = vadd.f32 %v555_v4, %v3529_v35  ;;  %v1624_v20 = vpack.c.bf16 %v1144_v41, %v1140_v53  ;;  %vm841_vm7 = vcmp.gt.f32.partialorder %v4191_v31, 0.0  ;;  %v4239_v15 = vmul.f32 0.2, %v4191_v31  ;;  %v561_v8 = vpop.f32.mrb[35].mxu0  ;;  %v5495_v41 = vld [vmem:[#allocation17_spill] sm:$0xff] }
 0x1a8   : > { %5485 = vst [vmem:[#allocation22_spill] sm:$0xff] %v4234_v45  ;;  %v5486_v19 = vpack.c.bf16 %v4059_v2, %v4057_v17  ;;  %v5487_v43 = vpack.c.bf16 %v4069_v22, %v4061_v33  ;;  %v558_v40 = vadd.f32 %v557_v57, %v3534_v0  ;;  %v4251_v25 = vmul.f32 0.2, %v4206_v21  ;;  %v4264_v33 = vpop.f32.mrb[26].mxu1  ;;  %v5496_v57 = vld [vmem:[#allocation18_spill] sm:$0xff] }
 0x1a9   : > { %v4254_v11 = vmul.f32 0.2, %v4210_v29  ;;  %v5488_v34 = vpack.c.bf16 %v4075_v47, %v4073_v49  ;;  %v5489_v17 = vpack.c.bf16 %v4101_v12, %v4099_v6  ;;  %v1593_v2 = vpack.c.bf16 %v4228_v39, %v4226_v46  ;;  %1783 = vmatprep.mubr.bf16.mxu0 %v1624_v20  ;;  %2169 = vmatprep.mubr.bf16.mxu1 %v1624_v20  ;;  %v5491_v47 = vld [vmem:[#allocation15_spill] sm:$0xff]  ;;  %v4275_v6 = vpop.f32.mrb[27].mxu1 }
 0x1aa   : > { %1901 = vmatpush1.bf16.msra.mxu0 %v5486_v19  ;;  %2287 = vmatpush1.bf16.msra.mxu1 %v5487_v43  ;;  %v1019_v22 = vmul.f32 0.2, %v556_v63  ;;  %v560_v42 = vadd.f32 %v559_v36, %v3529_v35  ;;  %v4269_v59 = vadd.f32 %v5490_v44, %v3866_v27  ;;  %v4273_v49 = vadd.f32 %v5491_v47, %v3667_v28 }
 0x1ab   : > { %1902 = vmatprep.subr.bf16.mxu0 %v5488_v34  ;;  %2288 = vmatprep.subr.bf16.mxu1 %v5489_v17  ;;  %vm891_vm8 = vcmp.gt.f32.partialorder %v556_v63, 0.0  ;;  %v1020_v12 = vmul.f32 0.2, %v558_v40  ;;  %v562_v10 = vadd.f32 %v561_v8, %v3534_v0  ;;  %vm846_vm9 = vcmp.gt.f32.partialorder %v4210_v29, 0.0 }
 0x1ac   : > { %1784 = vmatmul.mubr.bf16.gmra.mrb[92].mxu0 %v1623_v5  ;;  %2170 = vmatmul.mubr.bf16.gmra.mrb[92].mxu1 %v1623_v5  ;;  %v4280_v16 = vmul.f32 0.2, %v4224_v51  ;;  %vm892_vm10 = vcmp.gt.f32.partialorder %v558_v40, 0.0  ;;  %vm895_vm11 = vcmp.gt.f32.partialorder %v560_v42, 0.0  ;;  %v1023_v18 = vmul.f32 0.2, %v560_v42 }
 0x1ad   : > { %v4284_v46 = vadd.f32 %v5492_v52, %v3866_v27  ;;  %v5493_v39 = vpack.c.bf16 %v4112_v14, %v4105_v61  ;;  %v5494_v4 = vpack.c.bf16 %v4121_v13, %v4114_v38  ;;  %vm896_vm12 = vcmp.gt.f32.partialorder %v562_v10, 0.0  ;;  %v565_v13 = vpop.f32.mrb[36].mxu0 }
 0x1ae   : > { %v1024_v53 = vmul.f32 0.2, %v562_v10  ;;  %v4294_v5 = vadd.f32 %v5495_v41, %v3667_v28  ;;  %v4298_v20 = vadd.f32 %v5496_v57, %v3866_v27  ;;  %v5497_v19 = vpack.c.bf16 %v4125_v56, %v4123_v48  ;;  %v4313_v48 = vpop.f32.mrb[28].mxu1  ;;  %v567_v7 = vpop.f32.mrb[37].mxu0 }
 0x1af   : > { %1903 = vmatpush1.bf16.msra.mxu0 %v5493_v39  ;;  %2289 = vmatpush1.bf16.msra.mxu1 %v5494_v4  ;;  %v1147_v61 = vsel %vm891_vm8, %v556_v63, %v1019_v22  ;;  %v1151_v14 = vsel %vm895_vm11, %v560_v42, %v1023_v18  ;;  %vm850_vm13 = vcmp.gt.f32.partialorder %v4269_v59, 0.0  ;;  %v978_v38 = vmul.f32 0.2, %v4269_v59  ;;  %v569_v42 = vpop.f32.mrb[38].mxu0  ;;  %v5498_v39 = vld [vmem:[#allocation20_spill] sm:$0xff] }
 0x1b0   : > { %1904 = vmatprep.subr.bf16.mxu0 %v5497_v19  ;;  %2290 = vmatprep.subr.bf16.mxu1 %v1594_v24  ;;  %v1148_v43 = vsel %vm892_vm10, %v558_v40, %v1020_v12  ;;  %v1152_v36 = vsel %vm896_vm12, %v562_v10, %v1024_v53  ;;  %v1627_v34 = vpack.c.bf16 %v1151_v14, %v1147_v61  ;;  %v4311_v17 = vmul.f32 0.2, %v4273_v49  ;;  %v4326_v40 = vpop.f32.mrb[29].mxu1  ;;  %v571_v10 = vpop.f32.mrb[39].mxu0  ;;  %v5499_v53 = vld [vmem:[#allocation21_spill] sm:$0xff] }
 0x1b1   : > { %v566_v56 = vadd.f32 %v565_v13, %v3529_v35  ;;  %v1628_v3 = vpack.c.bf16 %v1152_v36, %v1148_v43  ;;  %v4317_v24 = vmul.f32 0.2, %v4284_v46  ;;  %v4321_v63 = vadd.f32 %v4071_v26, %v3667_v28  ;;  %v4335_v47 = vpop.f32.mrb[30].mxu1 }
 0x1b2   : > { %v568_v22 = vadd.f32 %v567_v7, %v3534_v0  ;;  %v4330_v8 = vmul.f32 0.2, %v4294_v5  ;;  %v4333_v44 = vmul.f32 0.2, %v4298_v20  ;;  %v570_v12 = vadd.f32 %v569_v42, %v3529_v35 }
 0x1b3   : > { %1905 = vmatpush1.bf16.msra.mxu0 %v1591_v62  ;;  %2291 = vmatpush1.bf16.msra.mxu1 %v1593_v2  ;;  %v1027_v26 = vmul.f32 0.2, %v566_v56  ;;  %v4340_v9 = vadd.f32 %v4086_v60, %v3866_v27  ;;  %v1093_v30 = vsel %vm837_vm6, %v4187_v55, %v4220_v37  ;;  %v4346_v62 = vpop.f32.mrb[31].mxu1  ;;  %vm899_vm14 = vcmp.gt.f32.partialorder %v566_v56, 0.0 }
 0x1b4   : > { %1793 = vmatprep.mubr.bf16.mxu0 %v1628_v3  ;;  %2179 = vmatprep.mubr.bf16.mxu1 %v1628_v3  ;;  %v1028_v2 = vmul.f32 0.2, %v568_v22  ;;  %v572_v18 = vadd.f32 %v571_v10, %v3534_v0  ;;  %v1097_v52 = vsel %vm841_vm7, %v4191_v31, %v4239_v15  ;;  %vm900_vm15 = vcmp.gt.f32.partialorder %v568_v22, 0.0  ;;  %v575_v61 = vpop.f32.mrb[40].mxu0 }
 0x1b5   : > { %1794 = vmatmul.mubr.bf16.gmra.mrb[96].mxu0 %v1627_v34  ;;  %2180 = vmatmul.mubr.bf16.gmra.mrb[96].mxu1 %v1627_v34  ;;  %vm903_vm0 = vcmp.gt.f32.partialorder %v570_v12, 0.0  ;;  %v1031_v60 = vmul.f32 0.2, %v570_v12  ;;  %vm845_vm1 = vcmp.gt.f32.partialorder %v4206_v21, 0.0  ;;  %vm849_vm2 = vcmp.gt.f32.partialorder %v4224_v51, 0.0  ;;  %v4378_v34 = vpop.f32.mrb[32].mxu1 }
 0x1b6   : > { %v4356_v55 = vmul.f32 0.2, %v4321_v63  ;;  %vm904_vm3 = vcmp.gt.f32.partialorder %v572_v18, 0.0  ;;  %v1032_v37 = vmul.f32 0.2, %v572_v18  ;;  %v4360_v4 = vadd.f32 %v5498_v39, %v3667_v28  ;;  %v577_v7 = vpop.f32.mrb[41].mxu0 }
 0x1b7   : > { %v4364_v41 = vadd.f32 %v5499_v53, %v3866_v27  ;;  %v1155_v31 = vsel %vm899_vm14, %v566_v56, %v1027_v26  ;;  %v1159_v15 = vsel %vm903_vm0, %v570_v12, %v1031_v60  ;;  %v4367_v57 = vpack.c.bf16 %v1097_v52, %v1093_v30  ;;  %v579_v26 = vpop.f32.mrb[42].mxu0 }
 0x1b8   : > { %v1102_v19 = vsel %vm846_vm9, %v4210_v29, %v4254_v11  ;;  %v1156_v14 = vsel %vm900_vm15, %v568_v22, %v1028_v2  ;;  %v1160_v13 = vsel %vm904_vm3, %v572_v18, %v1032_v37  ;;  %v1631_v43 = vpack.c.bf16 %v1159_v15, %v1155_v31  ;;  %v4388_v22 = vpop.f32.mrb[33].mxu1  ;;  %v581_v2 = vpop.f32.mrb[43].mxu0 }
 0x1b9   : > { %5500 = vst [vmem:[#allocation14_spill] sm:$0xff] %v4367_v57  ;;  %vm854_vm4 = vcmp.gt.f32.partialorder %v4284_v46, 0.0  ;;  %vm858_vm5 = vcmp.gt.f32.partialorder %v4298_v20, 0.0  ;;  %v1106_v36 = vsel %vm850_vm13, %v4269_v59, %v978_v38  ;;  %v576_v56 = vadd.f32 %v575_v61, %v3529_v35  ;;  %v4400_v10 = vpop.f32.mrb[34].mxu1 }
 0x1ba   : > { %v1632_v3 = vpack.c.bf16 %v1160_v13, %v1156_v14  ;;  %v4382_v29 = vmul.f32 0.2, %v4340_v9  ;;  %v4386_v11 = vadd.f32 %v4160_v50, %v3667_v28  ;;  %v578_v42 = vadd.f32 %v577_v7, %v3534_v0  ;;  %v4410_v60 = vpop.f32.mrb[35].mxu1 }
 0x1bb   : > { %v4392_v59 = vmul.f32 0.2, %v4360_v4  ;;  %v4396_v38 = vadd.f32 %v4169_v54, %v3866_v27  ;;  %v4398_v12 = vpack.c.bf16 %v1106_v36, %v1102_v19  ;;  %v1035_v30 = vmul.f32 0.2, %v576_v56 }
 0x1bc   : > { %v580_v50 = vadd.f32 %v579_v26, %v3529_v35  ;;  %1803 = vmatprep.mubr.bf16.mxu0 %v1632_v3  ;;  %2189 = vmatprep.mubr.bf16.mxu1 %v1632_v3  ;;  %v4404_v18 = vmul.f32 0.2, %v4364_v41  ;;  %v4408_v52 = vadd.f32 %v4180_v1, %v3667_v28  ;;  %vm907_vm6 = vcmp.gt.f32.partialorder %v576_v56, 0.0 }
 0x1bd   : > { %5501 = vst [vmem:[#allocation15_spill] sm:$0xff] %v4398_v12  ;;  %vm908_vm7 = vcmp.gt.f32.partialorder %v578_v42, 0.0  ;;  %v1036_v54 = vmul.f32 0.2, %v578_v42  ;;  %v582_v37 = vadd.f32 %v581_v2, %v3534_v0  ;;  %1804 = vmatmul.mubr.bf16.gmra.mrb[100].mxu0 %v1631_v43  ;;  %2190 = vmatmul.mubr.bf16.gmra.mrb[100].mxu1 %v1631_v43  ;;  %v4414_v53 = vmul.f32 0.2, %v4386_v11 }
 0x1be   : > { %vm911_vm8 = vcmp.gt.f32.partialorder %v580_v50, 0.0  ;;  %v1039_v39 = vmul.f32 0.2, %v580_v50  ;;  %v4418_v31 = vadd.f32 %v4193_v58, %v3866_v27  ;;  %vm853_vm10 = vcmp.gt.f32.partialorder %v4273_v49, 0.0  ;;  %v585_v43 = vpop.f32.mrb[44].mxu0 }
 0x1bf   : > { %vm912_vm9 = vcmp.gt.f32.partialorder %v582_v37, 0.0  ;;  %v1040_v1 = vmul.f32 0.2, %v582_v37  ;;  %vm857_vm11 = vcmp.gt.f32.partialorder %v4294_v5, 0.0  ;;  %v4423_v15 = vmul.f32 0.2, %v4396_v38 }
 0x1c0   : > { %v4427_v19 = vadd.f32 %v4232_v23, %v3667_v28  ;;  %v1164_v61 = vsel %vm908_vm7, %v578_v42, %v1036_v54  ;;  %v1163_v14 = vsel %vm907_vm6, %v576_v56, %v1035_v30  ;;  %v1167_v13 = vsel %vm911_vm8, %v580_v50, %v1039_v39  ;;  %v4441_v42 = vpop.f32.mrb[36].mxu1  ;;  %v587_v26 = vpop.f32.mrb[45].mxu0 }
 0x1c1   : > { %v4431_v58 = vmul.f32 0.2, %v4408_v52  ;;  %v1168_v36 = vsel %vm912_vm9, %v582_v37, %v1040_v1  ;;  %v1635_v7 = vpack.c.bf16 %v1167_v13, %v1163_v14  ;;  %v1101_v3 = vsel %vm845_vm1, %v4206_v21, %v4251_v25  ;;  %v4451_v54 = vpop.f32.mrb[37].mxu1  ;;  %v589_v25 = vpop.f32.mrb[46].mxu0 }
 0x1c2   : > { %v1105_v23 = vsel %vm849_vm2, %v4224_v51, %v4280_v16  ;;  %v586_v56 = vadd.f32 %v585_v43, %v3529_v35  ;;  %v1636_v30 = vpack.c.bf16 %v1168_v36, %v1164_v61  ;;  %v4445_v50 = vmul.f32 0.2, %v4418_v31  ;;  %v4463_v39 = vpop.f32.mrb[38].mxu1  ;;  %v591_v61 = vpop.f32.mrb[47].mxu0 }
 0x1c3   : > { %v4449_v2 = vadd.f32 %v4247_v32, %v3866_v27  ;;  %v588_v21 = vadd.f32 %v587_v26, %v3534_v0  ;;  %v4455_v51 = vmul.f32 0.2, %v4427_v19  ;;  %v4459_v16 = vadd.f32 %v4264_v33, %v3667_v28  ;;  %v4475_v13 = vpop.f32.mrb[39].mxu1 }
 0x1c4   : > { %v4461_v37 = vpack.c.bf16 %v1105_v23, %v1101_v3  ;;  %v1043_v1 = vmul.f32 0.2, %v586_v56  ;;  %v590_v32 = vadd.f32 %v589_v25, %v3529_v35  ;;  %1813 = vmatprep.mubr.bf16.mxu0 %v1636_v30  ;;  %2199 = vmatprep.mubr.bf16.mxu1 %v1636_v30  ;;  %vm862_vm12 = vcmp.gt.f32.partialorder %v4340_v9, 0.0  ;;  %v595_v25 = vpop.f32.mrb[48].mxu0  ;;  %v4502_v57 = vpop.f32.mrb[40].mxu1 }
 0x1c5   : > { %v1110_v14 = vsel %vm854_vm4, %v4284_v46, %v4317_v24  ;;  %v1114_v33 = vsel %vm858_vm5, %v4298_v20, %v4333_v44  ;;  %vm915_vm13 = vcmp.gt.f32.partialorder %v586_v56, 0.0  ;;  %v1044_v43 = vmul.f32 0.2, %v588_v21  ;;  %1814 = vmatmul.mubr.bf16.gmra.mrb[104].mxu0 %v1635_v7  ;;  %2200 = vmatmul.mubr.bf16.gmra.mrb[104].mxu1 %v1635_v7 }
 0x1c6   : > { %5502 = vst [vmem:[#allocation16_spill] sm:$0xff] %v4461_v37  ;;  %v592_v36 = vadd.f32 %v591_v61, %v3534_v0  ;;  %vm866_vm14 = vcmp.gt.f32.partialorder %v4364_v41, 0.0  ;;  %v4481_v3 = vadd.f32 %v4275_v6, %v3866_v27  ;;  %vm916_vm15 = vcmp.gt.f32.partialorder %v588_v21, 0.0 }
 0x1c7   : > { %vm919_vm0 = vcmp.gt.f32.partialorder %v590_v32, 0.0  ;;  %v1047_v46 = vmul.f32 0.2, %v590_v32  ;;  %v4485_v20 = vadd.f32 %v4313_v48, %v3667_v28  ;;  %v4489_v44 = vadd.f32 %v4326_v40, %v3866_v27 }
 0x1c8   : > { %vm920_vm1 = vcmp.gt.f32.partialorder %v592_v36, 0.0  ;;  %v1048_v24 = vmul.f32 0.2, %v592_v36  ;;  %v4491_v7 = vpack.c.bf16 %v1114_v33, %v1110_v14  ;;  %v1171_v23 = vsel %vm915_vm13, %v586_v56, %v1043_v1  ;;  %v597_v14 = vpop.f32.mrb[49].mxu0 }
 0x1c9   : > { %v1175_v26 = vsel %vm919_vm0, %v590_v32, %v1047_v46  ;;  %v4494_v6 = vmul.f32 0.2, %v4449_v2  ;;  %v4497_v30 = vmul.f32 0.2, %v4459_v16  ;;  %v1172_v61 = vsel %vm916_vm15, %v588_v21, %v1044_v43  ;;  %v4513_v32 = vpop.f32.mrb[41].mxu1  ;;  %v599_v43 = vpop.f32.mrb[50].mxu0 }
 0x1ca   : > { %5503 = vst [vmem:[#allocation17_spill] sm:$0xff] %v4491_v7  ;;  %v1176_v48 = vsel %vm920_vm1, %v592_v36, %v1048_v24  ;;  %v1639_v37 = vpack.c.bf16 %v1175_v26, %v1171_v23  ;;  %v4500_v12 = vmul.f32 0.2, %v4481_v3  ;;  %v596_v40 = vadd.f32 %v595_v25, %v3529_v35  ;;  %v601_v24 = vpop.f32.mrb[51].mxu0 }
 0x1cb   : > { %v1640_v56 = vpack.c.bf16 %v1176_v48, %v1172_v61  ;;  %v1109_v1 = vsel %vm853_vm10, %v4273_v49, %v4311_v17  ;;  %v1113_v21 = vsel %vm857_vm11, %v4294_v5, %v4330_v8  ;;  %v598_v33 = vadd.f32 %v597_v14, %v3534_v0  ;;  %v4527_v17 = vpop.f32.mrb[42].mxu1 }
 0x1cc   : > { %vm861_vm2 = vcmp.gt.f32.partialorder %v4321_v63, 0.0  ;;  %v4518_v36 = vmul.f32 0.2, %v4485_v20  ;;  %v4521_v46 = vmul.f32 0.2, %v4489_v44  ;;  %v4525_v49 = vadd.f32 %v4335_v47, %v3667_v28  ;;  %v4543_v48 = vpop.f32.mrb[43].mxu1 }
 0x1cd   : > { %v1051_v5 = vmul.f32 0.2, %v596_v40  ;;  %v600_v8 = vadd.f32 %v599_v43, %v3529_v35  ;;  %1823 = vmatprep.mubr.bf16.mxu0 %v1640_v56  ;;  %2209 = vmatprep.mubr.bf16.mxu1 %v1640_v56  ;;  %v4532_v23 = vadd.f32 %v4346_v62, %v3866_v27  ;;  %v4536_v26 = vadd.f32 %v4378_v34, %v3667_v28 }
 0x1ce   : > { %5504 = vst [vmem:[#allocation18_spill] sm:$0xff] %v4518_v36  ;;  %vm923_vm3 = vcmp.gt.f32.partialorder %v596_v40, 0.0  ;;  %v1052_v25 = vmul.f32 0.2, %v598_v33  ;;  %v602_v47 = vadd.f32 %v601_v24, %v3534_v0  ;;  %1824 = vmatmul.mubr.bf16.gmra.mrb[108].mxu0 %v1639_v37  ;;  %2210 = vmatmul.mubr.bf16.gmra.mrb[108].mxu1 %v1639_v37  ;;  %vm865_vm4 = vcmp.gt.f32.partialorder %v4360_v4, 0.0  ;;  %v605_v24 = vpop.f32.mrb[52].mxu0 }
 0x1cf   : > { %vm870_vm5 = vcmp.gt.f32.partialorder %v4396_v38, 0.0  ;;  %v4541_v61 = vpack.c.bf16 %v1113_v21, %v1109_v1  ;;  %vm924_vm6 = vcmp.gt.f32.partialorder %v598_v33, 0.0  ;;  %vm927_vm7 = vcmp.gt.f32.partialorder %v600_v8, 0.0  ;;  %v4567_v36 = vpop.f32.mrb[44].mxu1 }
 0x1d0   : > { %v1055_v62 = vmul.f32 0.2, %v600_v8  ;;  %v4547_v34 = vadd.f32 %v4388_v22, %v3866_v27  ;;  %vm928_vm8 = vcmp.gt.f32.partialorder %v602_v47, 0.0  ;;  %v1056_v14 = vmul.f32 0.2, %v602_v47 }
 0x1d1   : > { %5505 = vst [vmem:[#allocation20_spill] sm:$0xff] %v4541_v61  ;;  %v4551_v37 = vadd.f32 %v4400_v10, %v3667_v28  ;;  %v1118_v56 = vsel %vm862_vm12, %v4340_v9, %v4382_v29  ;;  %v1179_v1 = vsel %vm923_vm3, %v596_v40, %v1051_v5  ;;  %v4559_v43 = vmul.f32 0.2, %v4525_v49  ;;  %v607_v29 = vpop.f32.mrb[53].mxu0 }
 0x1d2   : > { %v1183_v21 = vsel %vm927_vm7, %v600_v8, %v1055_v62  ;;  %v1122_v22 = vsel %vm866_vm14, %v4364_v41, %v4404_v18  ;;  %v1180_v61 = vsel %vm924_vm6, %v598_v33, %v1052_v25  ;;  %v1184_v10 = vsel %vm928_vm8, %v602_v47, %v1056_v14  ;;  %v4576_v62 = vpop.f32.mrb[45].mxu1  ;;  %v609_v18 = vpop.f32.mrb[54].mxu0 }
 0x1d3   : > { %v1643_v7 = vpack.c.bf16 %v1183_v21, %v1179_v1  ;;  %v4565_v45 = vpack.c.bf16 %v1122_v22, %v1118_v56  ;;  %v606_v9 = vadd.f32 %v605_v24, %v3529_v35  ;;  %v1644_v40 = vpack.c.bf16 %v1184_v10, %v1180_v61  ;;  %v4585_v47 = vpop.f32.mrb[46].mxu1  ;;  %v611_v56 = vpop.f32.mrb[55].mxu0 }
 0x1d4   : > { %v4571_v5 = vmul.f32 0.2, %v4532_v23  ;;  %v4574_v8 = vmul.f32 0.2, %v4536_v26  ;;  %v608_v41 = vadd.f32 %v607_v29, %v3534_v0  ;;  %v4580_v33 = vmul.f32 0.2, %v4547_v34 }
 0x1d5   : > { %5506 = vst [vmem:[#allocation21_spill] sm:$0xff] %v4565_v45  ;;  %v4583_v25 = vmul.f32 0.2, %v4551_v37  ;;  %vm931_vm9 = vcmp.gt.f32.partialorder %v606_v9, 0.0  ;;  %v1059_v61 = vmul.f32 0.2, %v606_v9  ;;  %v610_v14 = vadd.f32 %v609_v18, %v3529_v35  ;;  %1833 = vmatprep.mubr.bf16.mxu0 %v1644_v40  ;;  %2219 = vmatprep.mubr.bf16.mxu1 %v1644_v40 }
 0x1d6   : > { %vm874_vm10 = vcmp.gt.f32.partialorder %v4418_v31, 0.0  ;;  %v4589_v1 = vpop.f32.mrb[47].mxu1  ;;  %vm932_vm11 = vcmp.gt.f32.partialorder %v608_v41, 0.0  ;;  %v1060_v21 = vmul.f32 0.2, %v608_v41  ;;  %v612_v22 = vadd.f32 %v611_v56, %v3534_v0  ;;  %1834 = vmatmul.mubr.bf16.gmra.mrb[112].mxu0 %v1643_v7  ;;  %2220 = vmatmul.mubr.bf16.gmra.mrb[112].mxu1 %v1643_v7 }
 0x1d7   : > { %v4594_v24 = vadd.f32 %v4410_v60, %v3866_v27  ;;  %vm935_vm12 = vcmp.gt.f32.partialorder %v610_v14, 0.0  ;;  %v1063_v10 = vmul.f32 0.2, %v610_v14  ;;  %vm869_vm13 = vcmp.gt.f32.partialorder %v4386_v11, 0.0 }
 0x1d8   : > { %vm873_vm14 = vcmp.gt.f32.partialorder %v4408_v52, 0.0  ;;  %v4600_v29 = vadd.f32 %v4441_v42, %v3667_v28  ;;  %v1117_v40 = vsel %vm861_vm2, %v4321_v63, %v4356_v55  ;;  %vm936_vm15 = vcmp.gt.f32.partialorder %v612_v22, 0.0  ;;  %v615_v55 = vpop.f32.mrb[56].mxu0 }
 0x1d9   : > { %v1064_v7 = vmul.f32 0.2, %v612_v22  ;;  %v1187_v60 = vsel %vm931_vm9, %v606_v9, %v1059_v61  ;;  %v4609_v18 = vadd.f32 %v4451_v54, %v3866_v27  ;;  %v1188_v56 = vsel %vm932_vm11, %v608_v41, %v1060_v21 }
 0x1da   : > { %v1191_v45 = vsel %vm935_vm12, %v610_v14, %v1063_v10  ;;  %vm878_vm0 = vcmp.gt.f32.partialorder %v4449_v2, 0.0  ;;  %v1121_v42 = vsel %vm865_vm4, %v4360_v4, %v4392_v59  ;;  %v1126_v63 = vsel %vm870_vm5, %v4396_v38, %v4423_v15  ;;  %v4627_v14 = vpop.f32.mrb[48].mxu1  ;;  %v617_v4 = vpop.f32.mrb[57].mxu0 }
 0x1db   : > { %v1192_v9 = vsel %vm936_vm15, %v612_v22, %v1064_v7  ;;  %v1647_v61 = vpack.c.bf16 %v1191_v45, %v1187_v60  ;;  %v4621_v54 = vpack.c.bf16 %v1121_v42, %v1117_v40  ;;  %v1130_v41 = vsel %vm874_vm10, %v4418_v31, %v4445_v50  ;;  %v4637_v45 = vpop.f32.mrb[49].mxu1  ;;  %v619_v22 = vpop.f32.mrb[58].mxu0 }
 0x1dc   : > { %v616_v21 = vadd.f32 %v615_v55, %v3529_v35  ;;  %v1648_v59 = vpack.c.bf16 %v1192_v9, %v1188_v56  ;;  %v4631_v10 = vmul.f32 0.2, %v4594_v24  ;;  %v4635_v38 = vadd.f32 %v4463_v39, %v3667_v28  ;;  %v4649_v7 = vpop.f32.mrb[50].mxu1  ;;  %v621_v56 = vpop.f32.mrb[59].mxu0 }
 0x1dd   : > { %5507 = vst [vmem:[#allocation23_spill] sm:$0xff] %v4621_v54  ;;  %v618_v15 = vadd.f32 %v617_v4, %v3534_v0  ;;  %v4641_v31 = vmul.f32 0.2, %v4600_v29  ;;  %v4645_v50 = vadd.f32 %v4475_v13, %v3866_v27  ;;  %v4647_v40 = vpack.c.bf16 %v1130_v41, %v1126_v63  ;;  %v4655_v55 = vpop.f32.mrb[51].mxu1  ;;  %v625_v54 = vpop.f32.mrb[60].mxu0 }
 0x1de   : > { %v1067_v60 = vmul.f32 0.2, %v616_v21  ;;  %v620_v39 = vadd.f32 %v619_v22, %v3529_v35  ;;  %1843 = vmatprep.mubr.bf16.mxu0 %v1648_v59  ;;  %2229 = vmatprep.mubr.bf16.mxu1 %v1648_v59  ;;  %v4653_v42 = vmul.f32 0.2, %v4609_v18  ;;  %vm939_vm1 = vcmp.gt.f32.partialorder %v616_v21, 0.0 }
 0x1df   : > { %5508 = vst [vmem:[#allocation24_spill] sm:$0xff] %v4641_v31  ;;  %5509 = vst [vmem:[#allocation25_spill] sm:$0xff] %v4647_v40  ;;  %vm940_vm2 = vcmp.gt.f32.partialorder %v618_v15, 0.0  ;;  %v1068_v9 = vmul.f32 0.2, %v618_v15  ;;  %v622_v13 = vadd.f32 %v621_v56, %v3534_v0  ;;  %1844 = vmatmul.mubr.bf16.gmra.mrb[116].mxu0 %v1647_v61  ;;  %2230 = vmatmul.mubr.bf16.gmra.mrb[116].mxu1 %v1647_v61  ;;  %vm877_vm4 = vcmp.gt.f32.partialorder %v4427_v19, 0.0 }
 0x1e0   : > { %vm943_vm3 = vcmp.gt.f32.partialorder %v620_v39, 0.0  ;;  %v1071_v63 = vmul.f32 0.2, %v620_v39  ;;  %vm881_vm5 = vcmp.gt.f32.partialorder %v4459_v16, 0.0  ;;  %v4661_v41 = vmul.f32 0.2, %v4635_v38 }
 0x1e1   : > { %vm944_vm6 = vcmp.gt.f32.partialorder %v622_v13, 0.0  ;;  %v1072_v4 = vmul.f32 0.2, %v622_v13  ;;  %vm882_vm7 = vcmp.gt.f32.partialorder %v4481_v3, 0.0  ;;  %v4665_v59 = vmul.f32 0.2, %v4645_v50 }
 0x1e2   : > { %5510 = vst [vmem:[#allocation26_spill] sm:$0xff] %v4661_v41  ;;  %v1196_v22 = vsel %vm940_vm2, %v618_v15, %v1068_v9  ;;  %v1195_v56 = vsel %vm939_vm1, %v616_v21, %v1067_v60  ;;  %v1199_v61 = vsel %vm943_vm3, %v620_v39, %v1071_v63  ;;  %vm886_vm8 = vcmp.gt.f32.partialorder %v4489_v44, 0.0  ;;  %v4682_v15 = vpop.f32.mrb[52].mxu1  ;;  %v627_v60 = vpop.f32.mrb[61].mxu0 }
 0x1e3   : > { %5511 = vst [vmem:[#allocation27_spill] sm:$0xff] %v4665_v59  ;;  %v4671_v40 = vadd.f32 %v4502_v57, %v3667_v28  ;;  %v1200_v31 = vsel %vm944_vm6, %v622_v13, %v1072_v4  ;;  %v1651_v41 = vpack.c.bf16 %v1199_v61, %v1195_v56  ;;  %vm890_vm9 = vcmp.gt.f32.partialorder %v4532_v23, 0.0  ;;  %v4691_v63 = vpop.f32.mrb[53].mxu1 }
 0x1e4   : > { %v1125_v59 = vsel %vm869_vm13, %v4386_v11, %v4414_v53  ;;  %v1129_v21 = vsel %vm873_vm14, %v4408_v52, %v4431_v58  ;;  %v626_v57 = vadd.f32 %v625_v54, %v3529_v35  ;;  %v1652_v39 = vpack.c.bf16 %v1200_v31, %v1196_v22  ;;  %v629_v53 = vpop.f32.mrb[62].mxu0  ;;  %v4706_v54 = vpop.f32.mrb[54].mxu1 }
 0x1e5   : > { %v4687_v9 = vadd.f32 %v4513_v32, %v3866_v27  ;;  %v4689_v13 = vpack.c.bf16 %v1129_v21, %v1125_v59  ;;  %v628_v11 = vadd.f32 %v627_v60, %v3534_v0  ;;  %v4696_v52 = vadd.f32 %v4527_v17, %v3667_v28  ;;  %v631_v59 = vpop.f32.mrb[63].mxu0 }
 0x1e6   : > { %v1134_v58 = vsel %vm878_vm0, %v4449_v2, %v4494_v6  ;;  %v1138_v32 = vsel %vm882_vm7, %v4481_v3, %v4500_v12  ;;  %v1075_v31 = vmul.f32 0.2, %v626_v57  ;;  %v630_v4 = vadd.f32 %v629_v53, %v3529_v35  ;;  %1853 = vmatprep.mubr.bf16.mxu0 %v1652_v39  ;;  %2239 = vmatprep.mubr.bf16.mxu1 %v1652_v39  ;;  %v4718_v12 = vpop.f32.mrb[55].mxu1 }
 0x1e7   : > { %vm885_vm10 = vcmp.gt.f32.partialorder %v4485_v20, 0.0  ;;  %vm889_vm11 = vcmp.gt.f32.partialorder %v4525_v49, 0.0  ;;  %v4712_v17 = vmul.f32 0.2, %v4671_v40  ;;  %v4716_v2 = vadd.f32 %v4543_v48, %v3866_v27  ;;  %1854 = vmatmul.mubr.bf16.gmra.mrb[120].mxu0 %v1651_v41  ;;  %2240 = vmatmul.mubr.bf16.gmra.mrb[120].mxu1 %v1651_v41 }
 0x1e8   : > { %vm947_vm12 = vcmp.gt.f32.partialorder %v626_v57, 0.0  ;;  %vm948_vm13 = vcmp.gt.f32.partialorder %v628_v11, 0.0  ;;  %v1076_v3 = vmul.f32 0.2, %v628_v11  ;;  %v632_v35 = vadd.f32 %v631_v59, %v3534_v0 }
 0x1e9   : > { %vm894_vm14 = vcmp.gt.f32.partialorder %v4547_v34, 0.0  ;;  %vm898_vm15 = vcmp.gt.f32.partialorder %v4594_v24, 0.0  ;;  %vm951_vm0 = vcmp.gt.f32.partialorder %v630_v4, 0.0  ;;  %v1079_v6 = vmul.f32 0.2, %v630_v4 }
 0x1ea   : > { %v4725_v22 = vadd.f32 %v4567_v36, %v3667_v28  ;;  %v4727_v48 = vpack.c.bf16 %v1138_v32, %v1134_v58  ;;  %vm952_vm1 = vcmp.gt.f32.partialorder %v632_v35, 0.0  ;;  %v1080_v56 = vmul.f32 0.2, %v632_v35 }
 0x1eb   : > { %vm893_vm2 = vcmp.gt.f32.partialorder %v4536_v26, 0.0  ;;  %vm897_vm3 = vcmp.gt.f32.partialorder %v4551_v37, 0.0  ;;  %v4733_v0 = vadd.f32 %v4576_v62, %v3866_v27  ;;  %v4737_v41 = vadd.f32 %v4585_v47, %v3667_v28 }
 0x1ec   : > { %v1204_v61 = vsel %vm948_vm13, %v628_v11, %v1076_v3  ;;  %v1203_v36 = vsel %vm947_vm12, %v626_v57, %v1075_v31  ;;  %v1207_v21 = vsel %vm951_vm0, %v630_v4, %v1079_v6  ;;  %v4743_v60 = vadd.f32 %v4589_v1, %v3866_v27  ;;  %v808_v11 = vpop.f32.mrb[56].mxu1 }
 0x1ed   : > { %v1208_v39 = vsel %vm952_vm1, %v632_v35, %v1080_v56  ;;  %v1655_v53 = vpack.c.bf16 %v1207_v21, %v1203_v36  ;;  %v1133_v62 = vsel %vm877_vm4, %v4427_v19, %v4455_v51  ;;  %v1137_v47 = vsel %vm881_vm5, %v4459_v16, %v4497_v30  ;;  %v810_v19 = vpop.f32.mrb[57].mxu1  ;;  %v5512_v56 = vld [vmem:[#allocation19_spill] sm:$0xff] }
 0x1ee   : > { %v1656_v58 = vpack.c.bf16 %v1208_v39, %v1204_v61  ;;  %vm902_vm6 = vcmp.gt.f32.partialorder %v4609_v18, 0.0  ;;  %v4755_v57 = vmul.f32 0.2, %v4687_v9  ;;  %v4759_v1 = vadd.f32 %v4627_v14, %v3667_v28  ;;  %v812_v14 = vpop.f32.mrb[58].mxu1  ;;  %v5513_v39 = vld [vmem:[#allocation18_spill] sm:$0xff] }
 0x1ef   : > { %v4763_v32 = vadd.f32 %v4637_v45, %v3866_v27  ;;  %v4766_v51 = vmul.f32 0.2, %v4696_v52  ;;  %v4769_v16 = vmul.f32 0.2, %v4716_v2  ;;  %v4771_v30 = vpack.c.bf16 %v1137_v47, %v1133_v62  ;;  %v814_v3 = vpop.f32.mrb[59].mxu1 }
 0x1f0   : > { %v1142_v31 = vsel %vm886_vm8, %v4489_v44, %v4521_v46  ;;  %1863 = vmatprep.mubr.bf16.mxu0 %v1656_v58  ;;  %2249 = vmatprep.mubr.bf16.mxu1 %v1656_v58  ;;  %vm901_vm4 = vcmp.gt.f32.partialorder %v4600_v29, 0.0  ;;  %vm906_vm5 = vcmp.gt.f32.partialorder %v4645_v50, 0.0  ;;  %v4780_v45 = vmul.f32 0.2, %v4725_v22 }
 0x1f1   : > { %v4783_v4 = vmul.f32 0.2, %v4733_v0  ;;  %v1146_v59 = vsel %vm890_vm9, %v4532_v23, %v4571_v5  ;;  %1864 = vmatmul.mubr.bf16.gmra.mrb[124].mxu0 %v1655_v53  ;;  %2250 = vmatmul.mubr.bf16.gmra.mrb[124].mxu1 %v1655_v53  ;;  %vm905_vm7 = vcmp.gt.f32.partialorder %v4635_v38, 0.0  ;;  %v4791_v44 = vmul.f32 0.2, %v4737_v41 }
 0x1f2   : > { %v4794_v46 = vmul.f32 0.2, %v4743_v60  ;;  %v4798_v35 = vadd.f32 %v4649_v7, %v3667_v28  ;;  %v4800_v6 = vpack.c.bf16 %v1146_v59, %v1142_v31  ;;  %1906 = vmatprep.mubr.bf16.mxu0 %v5512_v56  ;;  %2292 = vmatprep.mubr.bf16.mxu1 %v5512_v56  ;;  %vm910_vm8 = vcmp.gt.f32.partialorder %v4687_v9, 0.0  ;;  %v5514_v59 = vld [vmem:[#allocation13_spill] sm:$0xff] }
 0x1f3   : > { %v4806_v23 = vmul.f32 0.2, %v4759_v1  ;;  %v4809_v5 = vmul.f32 0.2, %v4763_v32  ;;  %v4813_v61 = vadd.f32 %v4655_v55, %v3866_v27  ;;  %v4817_v7 = vadd.f32 %v4682_v15, %v3667_v28 }
 0x1f4   : > { %vm909_vm9 = vcmp.gt.f32.partialorder %v4671_v40, 0.0  ;;  %vm914_vm12 = vcmp.gt.f32.partialorder %v4716_v2, 0.0  ;;  %v4823_v36 = vadd.f32 %v4691_v63, %v3866_v27  ;;  %v4827_v21 = vadd.f32 %v4706_v54, %v3667_v28 }
 0x1f5   : > { %v1141_v55 = vsel %vm885_vm10, %v4485_v20, %v5513_v39  ;;  %v1145_v15 = vsel %vm889_vm11, %v4525_v49, %v4559_v43  ;;  %vm913_vm13 = vcmp.gt.f32.partialorder %v4696_v52, 0.0  ;;  %vm918_vm0 = vcmp.gt.f32.partialorder %v4733_v0, 0.0 }
 0x1f6   : > { %vm922_vm1 = vcmp.gt.f32.partialorder %v4743_v60, 0.0  ;;  %v4840_v63 = vpack.c.bf16 %v1145_v15, %v1141_v55  ;;  %v4844_v54 = vadd.f32 %v4718_v12, %v3866_v27  ;;  %v1150_v20 = vsel %vm894_vm14, %v4547_v34, %v4580_v33  ;;  %v818_v34 = vpop.f32.mrb[60].mxu1  ;;  %v5515_v55 = vld [vmem:[#allocation27_spill] sm:$0xff] }
 0x1f7   : > { %v1154_v49 = vsel %vm898_vm15, %v4594_v24, %v4631_v10  ;;  %vm917_vm10 = vcmp.gt.f32.partialorder %v4725_v22, 0.0  ;;  %v4857_v43 = vmul.f32 0.2, %v4798_v35  ;;  %v4862_v12 = vadd.f32 %v808_v11, %v3667_v28  ;;  %v820_v11 = vpop.f32.mrb[61].mxu1 }
 0x1f8   : > { %v4859_v53 = vpack.c.bf16 %v1154_v49, %v1150_v20  ;;  %v4865_v62 = vadd.f32 %v810_v19, %v3866_v27  ;;  %v4870_v33 = vmul.f32 0.2, %v4813_v61  ;;  %v4873_v24 = vadd.f32 %v812_v14, %v3667_v28  ;;  %v822_v14 = vpop.f32.mrb[62].mxu1  ;;  %v5516_v49 = vld [vmem:[#allocation22_spill] sm:$0xff] }
 0x1f9   : > { %v1149_v10 = vsel %vm893_vm2, %v4536_v26, %v4574_v8  ;;  %v1153_v47 = vsel %vm897_vm3, %v4551_v37, %v4583_v25  ;;  %vm925_vm14 = vcmp.gt.f32.partialorder %v4759_v1, 0.0  ;;  %vm929_vm15 = vcmp.gt.f32.partialorder %v4798_v35, 0.0  ;;  %1907 = vmatmul.mubr.bf16.vlgmr.msra.gmra.mrb[64].mxu0 %v5514_v59  ;;  %2293 = vmatmul.mubr.bf16.vlgmr.msra.gmra.mrb[64].mxu1 %v5514_v59  ;;  %v824_v20 = vpop.f32.mrb[63].mxu1 }
 0x1fa   : > { %v4886_v58 = vmul.f32 0.2, %v4817_v7  ;;  %v4889_v19 = vmul.f32 0.2, %v4823_v36  ;;  %v4892_v31 = vmul.f32 0.2, %v4827_v21  ;;  %v4901_v8 = vpack.c.bf16 %v1153_v47, %v1149_v10  ;;  %1916 = vmatprep.mubr.bf16.mxu0 %v5516_v49  ;;  %2302 = vmatprep.mubr.bf16.mxu1 %v5516_v49 }
 0x1fb   : > { %vm938_vm3 = vcmp.gt.f32.partialorder %v4844_v54, 0.0  ;;  %v1066_v26 = vmul.f32 0.2, %v4844_v54  ;;  %v4899_v37 = vmul.f32 0.2, %v4862_v12  ;;  %v815_v25 = vadd.f32 %v814_v3, %v3866_v27  ;;  %v5519_v49 = vld [vmem:[#allocation26_spill] sm:$0xff] }
 0x1fc   : > { %v1070_v56 = vmul.f32 0.2, %v4865_v62  ;;  %v1158_v39 = vsel %vm902_vm6, %v4609_v18, %v4653_v42  ;;  %v1162_v3 = vsel %vm906_vm5, %v4645_v50, %v5515_v55  ;;  %v819_v15 = vadd.f32 %v818_v34, %v3667_v28  ;;  %v5518_v34 = vld [vmem:[#allocation24_spill] sm:$0xff] }
 0x1fd   : > { %v1073_v10 = vmul.f32 0.2, %v4873_v24  ;;  %v4923_v47 = vpack.c.bf16 %v1162_v3, %v1158_v39  ;;  %v821_v18 = vadd.f32 %v820_v11, %v3866_v27  ;;  %vm946_vm6 = vcmp.gt.f32.partialorder %v815_v25, 0.0 }
 0x1fe   : > { %v1074_v42 = vmul.f32 0.2, %v815_v25  ;;  %v823_v50 = vadd.f32 %v822_v14, %v3667_v28  ;;  %v1157_v59 = vsel %vm901_vm4, %v4600_v29, %v5518_v34  ;;  %vm949_vm5 = vcmp.gt.f32.partialorder %v819_v15, 0.0 }
 0x1ff   : > { %5517 = vst [vmem:[#allocation19_spill] sm:$0xff] %v4923_v47  ;;  %v1077_v55 = vmul.f32 0.2, %v819_v15  ;;  %vm950_vm11 = vcmp.gt.f32.partialorder %v821_v18, 0.0  ;;  %v1161_v39 = vsel %vm905_vm7, %v4635_v38, %v5519_v49  ;;  %v1078_v3 = vmul.f32 0.2, %v821_v18 }
 0x200   : > { %v4935_v47 = vpack.c.bf16 %v1161_v39, %v1157_v59  ;;  %v825_v11 = vadd.f32 %v824_v20, %v3866_v27  ;;  %v1166_v28 = vsel %vm910_vm8, %v4687_v9, %v4755_v57  ;;  %vm953_vm2 = vcmp.gt.f32.partialorder %v823_v50, 0.0  ;;  %v5536_v20 = vld [vmem:[#allocation25_spill] sm:$0xff] }
 0x201   : > { %v1081_v29 = vmul.f32 0.2, %v823_v50  ;;  %v1170_v14 = vsel %vm914_vm12, %v4716_v2, %v4769_v16  ;;  %v1165_v38 = vsel %vm909_vm9, %v4671_v40, %v4712_v17  ;;  %v1169_v27 = vsel %vm913_vm13, %v4696_v52, %v4766_v51  ;;  %v5524_v16 = vld [vmem:[#allocation15_spill] sm:$0xff] }
 0x202   : > { %v4950_v34 = vpack.c.bf16 %v1170_v14, %v1166_v28  ;;  %v1174_v9 = vsel %vm918_vm0, %v4733_v0, %v4783_v4  ;;  %v1178_v2 = vsel %vm922_vm1, %v4743_v60, %v4794_v46  ;;  %v4964_v57 = vpack.c.bf16 %v1169_v27, %v1165_v38  ;;  %v5521_v0 = vld [vmem:[#allocation14_spill] sm:$0xff] }
 0x203   : > { %v4966_v40 = vpack.c.bf16 %v1178_v2, %v1174_v9  ;;  %v1173_v17 = vsel %vm917_vm10, %v4725_v22, %v4780_v45  ;;  %vm5520_vm4 = vcmp.gt.f32.partialorder %v4737_v41, 0.0  ;;  %1917 = vmatmul.mubr.bf16.gmra.mrb[68].mxu0 %v5521_v0  ;;  %2303 = vmatmul.mubr.bf16.gmra.mrb[68].mxu1 %v5521_v0  ;;  %vm954_vm7 = vcmp.gt.f32.partialorder %v825_v11, 0.0 }
 0x204   : > { %v1177_v52 = vsel %vm5520_vm4, %v4737_v41, %v4791_v44  ;;  %vm5522_vm8 = vcmp.gt.f32.partialorder %v4763_v32, 0.0  ;;  %vm5523_vm9 = vcmp.gt.f32.partialorder %v4813_v61, 0.0  ;;  %1926 = vmatprep.mubr.bf16.mxu0 %v5524_v16  ;;  %2312 = vmatprep.mubr.bf16.mxu1 %v5524_v16  ;;  %v1082_v41 = vmul.f32 0.2, %v825_v11 }
 0x205   : > { %v4978_v60 = vpack.c.bf16 %v1177_v52, %v1173_v17  ;;  %v1182_v51 = vsel %vm5522_vm8, %v4763_v32, %v4809_v5  ;;  %v1186_v22 = vsel %vm5523_vm9, %v4813_v61, %v4870_v33  ;;  %v1181_v4 = vsel %vm925_vm14, %v4759_v1, %v4806_v23 }
 0x206   : > { %v1646_v45 = vpack.c.bf16 %v1186_v22, %v1182_v51  ;;  %v1185_v32 = vsel %vm929_vm15, %v4798_v35, %v4857_v43  ;;  %vm5525_vm12 = vcmp.gt.f32.partialorder %v4823_v36, 0.0  ;;  %v1194_v5 = vsel %vm938_vm3, %v4844_v54, %v1066_v26 }
 0x207   : > { %v1645_v44 = vpack.c.bf16 %v1185_v32, %v1181_v4  ;;  %v1190_v46 = vsel %vm5525_vm12, %v4823_v36, %v4889_v19  ;;  %vm5526_vm13 = vcmp.gt.f32.partialorder %v4817_v7, 0.0  ;;  %vm5527_vm0 = vcmp.gt.f32.partialorder %v4827_v21, 0.0 }
 0x208   : > { %v1189_v1 = vsel %vm5526_vm13, %v4817_v7, %v4886_v58  ;;  %v1650_v23 = vpack.c.bf16 %v1194_v5, %v1190_v46  ;;  %v1193_v35 = vsel %vm5527_vm0, %v4827_v21, %v4892_v31  ;;  %vm5528_vm1 = vcmp.gt.f32.partialorder %v4865_v62, 0.0 }
 0x209   : > { %v1198_v61 = vsel %vm5528_vm1, %v4865_v62, %v1070_v56  ;;  %v1202_v36 = vsel %vm946_vm6, %v815_v25, %v1074_v42  ;;  %v1649_v43 = vpack.c.bf16 %v1193_v35, %v1189_v1  ;;  %vm5529_vm10 = vcmp.gt.f32.partialorder %v4862_v12, 0.0  ;;  %v5531_v56 = vld [vmem:[#allocation16_spill] sm:$0xff] }
 0x20a   : > { %v1654_v33 = vpack.c.bf16 %v1202_v36, %v1198_v61  ;;  %v1197_v54 = vsel %vm5529_vm10, %v4862_v12, %v4899_v37  ;;  %vm5530_vm14 = vcmp.gt.f32.partialorder %v4873_v24, 0.0  ;;  %v1206_v21 = vsel %vm950_vm11, %v821_v18, %v1078_v3  ;;  %v5532_v12 = vld [vmem:[#allocation17_spill] sm:$0xff] }
 0x20b   : > { %v1201_v7 = vsel %vm5530_vm14, %v4873_v24, %v1073_v10  ;;  %v1210_v19 = vsel %vm954_vm7, %v825_v11, %v1082_v41  ;;  %v1205_v62 = vsel %vm949_vm5, %v819_v15, %v1077_v55  ;;  %v1209_v26 = vsel %vm953_vm2, %v823_v50, %v1081_v29  ;;  %1927 = vmatmul.mubr.bf16.gmra.mrb[72].mxu0 %v5531_v56  ;;  %v5533_v24 = vld [vmem:[#allocation20_spill] sm:$0xff]  ;;  %v5534_v37 = vld [vmem:[#allocation21_spill] sm:$0xff]  ;;  %v5535_v15 = vld [vmem:[#allocation23_spill] sm:$0xff] }
 0x20c   : > { %v1653_v58 = vpack.c.bf16 %v1201_v7, %v1197_v54  ;;  %v1658_v31 = vpack.c.bf16 %v1210_v19, %v1206_v21  ;;  %v1657_v25 = vpack.c.bf16 %v1209_v26, %v1205_v62  ;;  %2313 = vmatmul.mubr.bf16.gmra.mrb[72].mxu1 %v5531_v56  ;;  %1936 = vmatprep.mubr.bf16.mxu0 %v5532_v12 }
 0x20d   : > { %2322 = vmatprep.mubr.bf16.mxu1 %v5532_v12 }
 0x213   : > { %1937 = vmatmul.mubr.bf16.gmra.mrb[76].mxu0 %v5533_v24 }
 0x214   : > { %2323 = vmatmul.mubr.bf16.gmra.mrb[76].mxu1 %v5533_v24  ;;  %1946 = vmatprep.mubr.bf16.mxu0 %v5534_v37 }
 0x215   : > { %2332 = vmatprep.mubr.bf16.mxu1 %v5534_v37 }
 0x21b   : > { %1947 = vmatmul.mubr.bf16.gmra.mrb[80].mxu0 %v5535_v15 }
 0x21c   : > { %2333 = vmatmul.mubr.bf16.gmra.mrb[80].mxu1 %v5535_v15  ;;  %1956 = vmatprep.mubr.bf16.mxu0 %v5536_v20 }
 0x21d   : > { %2342 = vmatprep.mubr.bf16.mxu1 %v5536_v20 }
 0x223   : > { %1957 = vmatmul.mubr.bf16.gmra.mrb[84].mxu0 %v4689_v13 }
 0x224   : > { %2343 = vmatmul.mubr.bf16.gmra.mrb[84].mxu1 %v4689_v13  ;;  %1966 = vmatprep.mubr.bf16.mxu0 %v4727_v48  ;;  %v5537_v13 = vld [vmem:[#allocation19_spill] sm:$0xff] }
 0x225   : > { %2352 = vmatprep.mubr.bf16.mxu1 %v4727_v48  ;;  %v1659_v48 = vld [vmem:[%s5399_s4] sm:$0xf] }
 0x22b   : > { %1967 = vmatmul.mubr.bf16.gmra.mrb[88].mxu0 %v4771_v30 }
 0x22c   : > { %2353 = vmatmul.mubr.bf16.gmra.mrb[88].mxu1 %v4771_v30  ;;  %1976 = vmatprep.mubr.bf16.mxu0 %v4800_v6  ;;  %v5538_v30 = vld [vmem:[#allocation12_spill] sm:$0xff] }
 0x22d   : > { %2362 = vmatprep.mubr.bf16.mxu1 %v4800_v6  ;;  %v5539_v6 = vsub.s32 0, %v5538_v30  ;;  %v5541_v10 = vsub.s32 1, %v5538_v30  ;;  %v5542_v18 = vsub.s32 3, %v5538_v30 }
 0x22f   : > { %v5084_v42 = vrot.slane %v1659_v48, %v5542_v18 }
 0x233   : > { %1977 = vmatmul.mubr.bf16.gmra.mrb[92].mxu0 %v4840_v63 }
 0x234   : > { %2363 = vmatmul.mubr.bf16.gmra.mrb[92].mxu1 %v4840_v63  ;;  %1986 = vmatprep.mubr.bf16.mxu0 %v4859_v53  ;;  %v5072_v63 = vrot.slane %v1659_v48, %v5539_v6 }
 0x235   : > { %2372 = vmatprep.mubr.bf16.mxu1 %v4859_v53  ;;  %v5540_v53 = vsub.s32 2, %v5538_v30 }
 0x23b   : > { %1987 = vmatmul.mubr.bf16.gmra.mrb[96].mxu0 %v4901_v8 }
 0x23c   : > { %2373 = vmatmul.mubr.bf16.gmra.mrb[96].mxu1 %v4901_v8  ;;  %1996 = vmatprep.mubr.bf16.mxu0 %v5537_v13  ;;  %v5076_v8 = vrot.slane %v1659_v48, %v5540_v53 }
 0x23d   : > { %2382 = vmatprep.mubr.bf16.mxu1 %v5537_v13 }
 0x243   : > { %1997 = vmatmul.mubr.bf16.gmra.mrb[100].mxu0 %v4935_v47 }
 0x244   : > { %2383 = vmatmul.mubr.bf16.gmra.mrb[100].mxu1 %v4935_v47  ;;  %2006 = vmatprep.mubr.bf16.mxu0 %v4950_v34  ;;  %v5080_v47 = vrot.slane %v1659_v48, %v5541_v10 }
 0x245   : > { %2392 = vmatprep.mubr.bf16.mxu1 %v4950_v34 }
 0x24b   : > { %2007 = vmatmul.mubr.bf16.gmra.mrb[104].mxu0 %v4964_v57 }
 0x24c   : > { %2393 = vmatmul.mubr.bf16.gmra.mrb[104].mxu1 %v4964_v57  ;;  %2016 = vmatprep.mubr.bf16.mxu0 %v4966_v40 }
 0x24d   : > { %2402 = vmatprep.mubr.bf16.mxu1 %v4966_v40 }
 0x253   : > { %2017 = vmatmul.mubr.bf16.gmra.mrb[108].mxu0 %v4978_v60 }
 0x254   : > { %2403 = vmatmul.mubr.bf16.gmra.mrb[108].mxu1 %v4978_v60  ;;  %2026 = vmatprep.mubr.bf16.mxu0 %v1646_v45 }
 0x255   : > { %2412 = vmatprep.mubr.bf16.mxu1 %v1646_v45 }
 0x25b   : > { %2027 = vmatmul.mubr.bf16.gmra.mrb[112].mxu0 %v1645_v44 }
 0x25c   : > { %2413 = vmatmul.mubr.bf16.gmra.mrb[112].mxu1 %v1645_v44  ;;  %2036 = vmatprep.mubr.bf16.mxu0 %v1650_v23 }
 0x25d   : > { %2422 = vmatprep.mubr.bf16.mxu1 %v1650_v23 }
 0x263   : > { %2037 = vmatmul.mubr.bf16.gmra.mrb[116].mxu0 %v1649_v43 }
 0x264   : > { %2423 = vmatmul.mubr.bf16.gmra.mrb[116].mxu1 %v1649_v43  ;;  %2046 = vmatprep.mubr.bf16.mxu0 %v1654_v33 }
 0x265   : > { %2432 = vmatprep.mubr.bf16.mxu1 %v1654_v33 }
 0x26b   : > { %2047 = vmatmul.mubr.bf16.gmra.mrb[120].mxu0 %v1653_v58 }
 0x26c   : > { %2433 = vmatmul.mubr.bf16.gmra.mrb[120].mxu1 %v1653_v58  ;;  %2056 = vmatprep.mubr.bf16.mxu0 %v1658_v31 }
 0x26d   : > { %2442 = vmatprep.mubr.bf16.mxu1 %v1658_v31 }
 0x273   : > { %2057 = vmatmul.mubr.bf16.gmra.mrb[124].mxu0 %v1657_v25 }
 0x274   : > { %2443 = vmatmul.mubr.bf16.gmra.mrb[124].mxu1 %v1657_v25 }
 0x2cc   : > { %v1908_v50 = vpop.f32.mrb[64].mxu0  ;;  %v2294_v59 = vpop.f32.mrb[64].mxu1 }
 0x2cd   : > { %v2710_v55 = vadd.f32 %v1908_v50, %v5072_v63  ;;  %v2774_v49 = vadd.f32 %v2294_v59, %v5076_v8  ;;  %v1910_v39 = vpop.f32.mrb[65].mxu0  ;;  %v2296_v3 = vpop.f32.mrb[65].mxu1 }
 0x2ce   : > { %v2711_v11 = vadd.f32 %v1910_v39, %v5080_v47  ;;  %v2775_v28 = vadd.f32 %v2296_v3, %v5084_v42  ;;  %v1912_v29 = vpop.f32.mrb[66].mxu0  ;;  %v2298_v14 = vpop.f32.mrb[66].mxu1 }
 0x2cf   : > { %2453 = vst [vmem:[%s5090_s28] sm:$0xff] %v2710_v55  ;;  %2455 = vst [vmem:[%s5090_s28 + $0x10] sm:$0xff] %v2774_v49  ;;  %v2712_v38 = vadd.f32 %v1912_v29, %v5072_v63  ;;  %v2776_v34 = vadd.f32 %v2298_v14, %v5076_v8  ;;  %v1914_v27 = vpop.f32.mrb[67].mxu0  ;;  %v2300_v9 = vpop.f32.mrb[67].mxu1 }
 0x2d0   : > { %2454 = vst [vmem:[%s5090_s28 + $0x8] sm:$0xff] %v2711_v11  ;;  %2456 = vst [vmem:[%s5090_s28 + $0x18] sm:$0xff] %v2775_v28  ;;  %v2713_v2 = vadd.f32 %v1914_v27, %v5080_v47  ;;  %v2777_v57 = vadd.f32 %v2300_v9, %v5084_v42 }
 0x2d1   : > { %2457 = vst [vmem:[%s5090_s28 + $0x20] sm:$0xff] %v2712_v38  ;;  %2459 = vst [vmem:[%s5090_s28 + $0x30] sm:$0xff] %v2776_v34 }
 0x2d2   : > { %2458 = vst [vmem:[%s5090_s28 + $0x28] sm:$0xff] %v2713_v2  ;;  %2460 = vst [vmem:[%s5090_s28 + $0x38] sm:$0xff] %v2777_v57 }
 0x2d6   : > { %v1918_v40 = vpop.f32.mrb[68].mxu0  ;;  %v2304_v17 = vpop.f32.mrb[68].mxu1 }
 0x2d7   : > { %v2714_v52 = vadd.f32 %v1918_v40, %v5072_v63  ;;  %v2778_v0 = vadd.f32 %v2304_v17, %v5076_v8  ;;  %v1920_v60 = vpop.f32.mrb[69].mxu0  ;;  %v2306_v51 = vpop.f32.mrb[69].mxu1 }
 0x2d8   : > { %v2715_v22 = vadd.f32 %v1920_v60, %v5080_v47  ;;  %v2779_v16 = vadd.f32 %v2306_v51, %v5084_v42  ;;  %v1922_v41 = vpop.f32.mrb[70].mxu0  ;;  %v2308_v45 = vpop.f32.mrb[70].mxu1 }
 0x2d9   : > { %2461 = vst [vmem:[%s5090_s28 + $0x40] sm:$0xff] %v2714_v52  ;;  %2463 = vst [vmem:[%s5090_s28 + $0x50] sm:$0xff] %v2778_v0  ;;  %v2716_v4 = vadd.f32 %v1922_v41, %v5072_v63  ;;  %v2780_v32 = vadd.f32 %v2308_v45, %v5076_v8  ;;  %v1924_v44 = vpop.f32.mrb[71].mxu0  ;;  %v2310_v46 = vpop.f32.mrb[71].mxu1 }
 0x2da   : > { %2462 = vst [vmem:[%s5090_s28 + $0x48] sm:$0xff] %v2715_v22  ;;  %2464 = vst [vmem:[%s5090_s28 + $0x58] sm:$0xff] %v2779_v16  ;;  %v2717_v5 = vadd.f32 %v1924_v44, %v5080_v47  ;;  %v2781_v1 = vadd.f32 %v2310_v46, %v5084_v42 }
 0x2db   : > { %2465 = vst [vmem:[%s5090_s28 + $0x60] sm:$0xff] %v2716_v4  ;;  %2467 = vst [vmem:[%s5090_s28 + $0x70] sm:$0xff] %v2780_v32 }
 0x2dc   : > { %2466 = vst [vmem:[%s5090_s28 + $0x68] sm:$0xff] %v2717_v5  ;;  %2468 = vst [vmem:[%s5090_s28 + $0x78] sm:$0xff] %v2781_v1 }
 0x2de   : > { %v1928_v23 = vpop.f32.mrb[72].mxu0 }
 0x2df   : > { %v2314_v35 = vpop.f32.mrb[72].mxu1  ;;  %v2718_v61 = vadd.f32 %v1928_v23, %v5072_v63  ;;  %v1930_v43 = vpop.f32.mrb[73].mxu0 }
 0x2e0   : > { %v2782_v36 = vadd.f32 %v2314_v35, %v5076_v8  ;;  %v2316_v33 = vpop.f32.mrb[73].mxu1  ;;  %v2719_v54 = vadd.f32 %v1930_v43, %v5080_v47  ;;  %v1932_v58 = vpop.f32.mrb[74].mxu0 }
 0x2e1   : > { %v2783_v7 = vadd.f32 %v2316_v33, %v5084_v42  ;;  %v2318_v21 = vpop.f32.mrb[74].mxu1  ;;  %2469 = vst [vmem:[%s5090_s28 + $0x80] sm:$0xff] %v2718_v61  ;;  %v2720_v19 = vadd.f32 %v1932_v58, %v5072_v63  ;;  %v1934_v31 = vpop.f32.mrb[75].mxu0 }
 0x2e2   : > { %2471 = vst [vmem:[%s5090_s28 + $0x90] sm:$0xff] %v2782_v36  ;;  %v2784_v62 = vadd.f32 %v2318_v21, %v5076_v8  ;;  %v2320_v26 = vpop.f32.mrb[75].mxu1  ;;  %2470 = vst [vmem:[%s5090_s28 + $0x88] sm:$0xff] %v2719_v54  ;;  %v2721_v25 = vadd.f32 %v1934_v31, %v5080_v47 }
 0x2e3   : > { %2472 = vst [vmem:[%s5090_s28 + $0x98] sm:$0xff] %v2783_v7  ;;  %v2785_v56 = vadd.f32 %v2320_v26, %v5084_v42  ;;  %2473 = vst [vmem:[%s5090_s28 + $0xa0] sm:$0xff] %v2720_v19 }
 0x2e4   : > { %2475 = vst [vmem:[%s5090_s28 + $0xb0] sm:$0xff] %v2784_v62  ;;  %2474 = vst [vmem:[%s5090_s28 + $0xa8] sm:$0xff] %v2721_v25 }
 0x2e5   : > { %2476 = vst [vmem:[%s5090_s28 + $0xb8] sm:$0xff] %v2785_v56 }
 0x2e6   : > { %v1938_v12 = vpop.f32.mrb[76].mxu0 }
 0x2e7   : > { %v2324_v24 = vpop.f32.mrb[76].mxu1  ;;  %v2722_v37 = vadd.f32 %v1938_v12, %v5072_v63  ;;  %v1940_v20 = vpop.f32.mrb[77].mxu0 }
 0x2e8   : > { %v2786_v15 = vadd.f32 %v2324_v24, %v5076_v8  ;;  %v2326_v13 = vpop.f32.mrb[77].mxu1  ;;  %v2723_v48 = vadd.f32 %v1940_v20, %v5080_v47  ;;  %v1942_v6 = vpop.f32.mrb[78].mxu0 }
 0x2e9   : > { %v2787_v30 = vadd.f32 %v2326_v13, %v5084_v42  ;;  %v2328_v53 = vpop.f32.mrb[78].mxu1  ;;  %2477 = vst [vmem:[%s5090_s28 + $0xc0] sm:$0xff] %v2722_v37  ;;  %v2724_v10 = vadd.f32 %v1942_v6, %v5072_v63  ;;  %v1944_v50 = vpop.f32.mrb[79].mxu0 }
 0x2ea   : > { %2479 = vst [vmem:[%s5090_s28 + $0xd0] sm:$0xff] %v2786_v15  ;;  %v2788_v18 = vadd.f32 %v2328_v53, %v5076_v8  ;;  %v2330_v59 = vpop.f32.mrb[79].mxu1  ;;  %2478 = vst [vmem:[%s5090_s28 + $0xc8] sm:$0xff] %v2723_v48  ;;  %v2725_v55 = vadd.f32 %v1944_v50, %v5080_v47 }
 0x2eb   : > { %2480 = vst [vmem:[%s5090_s28 + $0xd8] sm:$0xff] %v2787_v30  ;;  %v2789_v49 = vadd.f32 %v2330_v59, %v5084_v42  ;;  %2481 = vst [vmem:[%s5090_s28 + $0xe0] sm:$0xff] %v2724_v10 }
 0x2ec   : > { %2483 = vst [vmem:[%s5090_s28 + $0xf0] sm:$0xff] %v2788_v18  ;;  %2482 = vst [vmem:[%s5090_s28 + $0xe8] sm:$0xff] %v2725_v55 }
 0x2ed   : > { %2484 = vst [vmem:[%s5090_s28 + $0xf8] sm:$0xff] %v2789_v49 }
 0x2ee   : > { %v1948_v39 = vpop.f32.mrb[80].mxu0 }
 0x2ef   : > { %v2334_v3 = vpop.f32.mrb[80].mxu1  ;;  %v2726_v11 = vadd.f32 %v1948_v39, %v5072_v63  ;;  %v1950_v29 = vpop.f32.mrb[81].mxu0 }
 0x2f0   : > { %v2790_v28 = vadd.f32 %v2334_v3, %v5076_v8  ;;  %v2336_v14 = vpop.f32.mrb[81].mxu1  ;;  %v2727_v38 = vadd.f32 %v1950_v29, %v5080_v47  ;;  %v1952_v27 = vpop.f32.mrb[82].mxu0 }
 0x2f1   : > { %v2791_v34 = vadd.f32 %v2336_v14, %v5084_v42  ;;  %v2338_v9 = vpop.f32.mrb[82].mxu1  ;;  %2485 = vst [vmem:[%s5090_s28 + $0x100] sm:$0xff] %v2726_v11  ;;  %v2728_v2 = vadd.f32 %v1952_v27, %v5072_v63  ;;  %v1954_v40 = vpop.f32.mrb[83].mxu0 }
 0x2f2   : > { %2487 = vst [vmem:[%s5090_s28 + $0x110] sm:$0xff] %v2790_v28  ;;  %v2792_v57 = vadd.f32 %v2338_v9, %v5076_v8  ;;  %v2340_v17 = vpop.f32.mrb[83].mxu1  ;;  %2486 = vst [vmem:[%s5090_s28 + $0x108] sm:$0xff] %v2727_v38  ;;  %v2729_v52 = vadd.f32 %v1954_v40, %v5080_v47 }
 0x2f3   : > { %2488 = vst [vmem:[%s5090_s28 + $0x118] sm:$0xff] %v2791_v34  ;;  %v2793_v0 = vadd.f32 %v2340_v17, %v5084_v42  ;;  %2489 = vst [vmem:[%s5090_s28 + $0x120] sm:$0xff] %v2728_v2 }
 0x2f4   : > { %2491 = vst [vmem:[%s5090_s28 + $0x130] sm:$0xff] %v2792_v57  ;;  %2490 = vst [vmem:[%s5090_s28 + $0x128] sm:$0xff] %v2729_v52 }
 0x2f5   : > { %2492 = vst [vmem:[%s5090_s28 + $0x138] sm:$0xff] %v2793_v0 }
 0x2f6   : > { %v1958_v60 = vpop.f32.mrb[84].mxu0 }
 0x2f7   : > { %v2344_v51 = vpop.f32.mrb[84].mxu1  ;;  %v2730_v22 = vadd.f32 %v1958_v60, %v5072_v63  ;;  %v1960_v41 = vpop.f32.mrb[85].mxu0 }
 0x2f8   : > { %v2794_v16 = vadd.f32 %v2344_v51, %v5076_v8  ;;  %v2346_v45 = vpop.f32.mrb[85].mxu1  ;;  %v2731_v4 = vadd.f32 %v1960_v41, %v5080_v47  ;;  %v1962_v44 = vpop.f32.mrb[86].mxu0 }
 0x2f9   : > { %v2795_v32 = vadd.f32 %v2346_v45, %v5084_v42  ;;  %v2348_v46 = vpop.f32.mrb[86].mxu1  ;;  %2493 = vst [vmem:[%s5090_s28 + $0x140] sm:$0xff] %v2730_v22  ;;  %v2732_v5 = vadd.f32 %v1962_v44, %v5072_v63  ;;  %v1964_v23 = vpop.f32.mrb[87].mxu0 }
 0x2fa   : > { %2495 = vst [vmem:[%s5090_s28 + $0x150] sm:$0xff] %v2794_v16  ;;  %v2796_v1 = vadd.f32 %v2348_v46, %v5076_v8  ;;  %v2350_v35 = vpop.f32.mrb[87].mxu1  ;;  %2494 = vst [vmem:[%s5090_s28 + $0x148] sm:$0xff] %v2731_v4  ;;  %v2733_v61 = vadd.f32 %v1964_v23, %v5080_v47 }
 0x2fb   : > { %2496 = vst [vmem:[%s5090_s28 + $0x158] sm:$0xff] %v2795_v32  ;;  %v2797_v36 = vadd.f32 %v2350_v35, %v5084_v42  ;;  %2497 = vst [vmem:[%s5090_s28 + $0x160] sm:$0xff] %v2732_v5 }
 0x2fc   : > { %2499 = vst [vmem:[%s5090_s28 + $0x170] sm:$0xff] %v2796_v1  ;;  %2498 = vst [vmem:[%s5090_s28 + $0x168] sm:$0xff] %v2733_v61 }
 0x2fd   : > { %2500 = vst [vmem:[%s5090_s28 + $0x178] sm:$0xff] %v2797_v36 }
 0x2fe   : > { %v1968_v43 = vpop.f32.mrb[88].mxu0 }
 0x2ff   : > { %v2354_v33 = vpop.f32.mrb[88].mxu1  ;;  %v2734_v54 = vadd.f32 %v1968_v43, %v5072_v63  ;;  %v1970_v58 = vpop.f32.mrb[89].mxu0 }
 0x300   : > { %v2798_v7 = vadd.f32 %v2354_v33, %v5076_v8  ;;  %v2356_v21 = vpop.f32.mrb[89].mxu1  ;;  %v2735_v19 = vadd.f32 %v1970_v58, %v5080_v47  ;;  %v1972_v31 = vpop.f32.mrb[90].mxu0 }
 0x301   : > { %v2799_v62 = vadd.f32 %v2356_v21, %v5084_v42  ;;  %v2358_v26 = vpop.f32.mrb[90].mxu1  ;;  %2501 = vst [vmem:[%s5090_s28 + $0x180] sm:$0xff] %v2734_v54  ;;  %v2736_v25 = vadd.f32 %v1972_v31, %v5072_v63  ;;  %v1974_v12 = vpop.f32.mrb[91].mxu0 }
 0x302   : > { %2503 = vst [vmem:[%s5090_s28 + $0x190] sm:$0xff] %v2798_v7  ;;  %v2800_v56 = vadd.f32 %v2358_v26, %v5076_v8  ;;  %v2360_v24 = vpop.f32.mrb[91].mxu1  ;;  %2502 = vst [vmem:[%s5090_s28 + $0x188] sm:$0xff] %v2735_v19  ;;  %v2737_v37 = vadd.f32 %v1974_v12, %v5080_v47 }
 0x303   : > { %2504 = vst [vmem:[%s5090_s28 + $0x198] sm:$0xff] %v2799_v62  ;;  %v2801_v15 = vadd.f32 %v2360_v24, %v5084_v42  ;;  %2505 = vst [vmem:[%s5090_s28 + $0x1a0] sm:$0xff] %v2736_v25 }
 0x304   : > { %2507 = vst [vmem:[%s5090_s28 + $0x1b0] sm:$0xff] %v2800_v56  ;;  %2506 = vst [vmem:[%s5090_s28 + $0x1a8] sm:$0xff] %v2737_v37 }
 0x305   : > { %2508 = vst [vmem:[%s5090_s28 + $0x1b8] sm:$0xff] %v2801_v15 }
 0x306   : > { %v1978_v20 = vpop.f32.mrb[92].mxu0 }
 0x307   : > { %v2364_v13 = vpop.f32.mrb[92].mxu1  ;;  %v2738_v48 = vadd.f32 %v1978_v20, %v5072_v63  ;;  %v1980_v6 = vpop.f32.mrb[93].mxu0 }
 0x308   : > { %v2802_v30 = vadd.f32 %v2364_v13, %v5076_v8  ;;  %v2366_v53 = vpop.f32.mrb[93].mxu1  ;;  %v2739_v10 = vadd.f32 %v1980_v6, %v5080_v47  ;;  %v1982_v50 = vpop.f32.mrb[94].mxu0 }
 0x309   : > { %v2803_v18 = vadd.f32 %v2366_v53, %v5084_v42  ;;  %v2368_v59 = vpop.f32.mrb[94].mxu1  ;;  %2509 = vst [vmem:[%s5090_s28 + $0x1c0] sm:$0xff] %v2738_v48  ;;  %v2740_v55 = vadd.f32 %v1982_v50, %v5072_v63  ;;  %v1984_v39 = vpop.f32.mrb[95].mxu0 }
 0x30a   : > { %2511 = vst [vmem:[%s5090_s28 + $0x1d0] sm:$0xff] %v2802_v30  ;;  %v2804_v49 = vadd.f32 %v2368_v59, %v5076_v8  ;;  %v2370_v3 = vpop.f32.mrb[95].mxu1  ;;  %2510 = vst [vmem:[%s5090_s28 + $0x1c8] sm:$0xff] %v2739_v10  ;;  %v2741_v11 = vadd.f32 %v1984_v39, %v5080_v47 }
 0x30b   : > { %2512 = vst [vmem:[%s5090_s28 + $0x1d8] sm:$0xff] %v2803_v18  ;;  %v2805_v28 = vadd.f32 %v2370_v3, %v5084_v42  ;;  %2513 = vst [vmem:[%s5090_s28 + $0x1e0] sm:$0xff] %v2740_v55 }
 0x30c   : > { %2515 = vst [vmem:[%s5090_s28 + $0x1f0] sm:$0xff] %v2804_v49  ;;  %2514 = vst [vmem:[%s5090_s28 + $0x1e8] sm:$0xff] %v2741_v11 }
 0x30d   : > { %2516 = vst [vmem:[%s5090_s28 + $0x1f8] sm:$0xff] %v2805_v28 }
 0x30e   : > { %v1988_v29 = vpop.f32.mrb[96].mxu0 }
 0x30f   : > { %v2374_v14 = vpop.f32.mrb[96].mxu1  ;;  %v2742_v38 = vadd.f32 %v1988_v29, %v5072_v63  ;;  %v1990_v27 = vpop.f32.mrb[97].mxu0 }
 0x310   : > { %v2806_v34 = vadd.f32 %v2374_v14, %v5076_v8  ;;  %v2376_v9 = vpop.f32.mrb[97].mxu1  ;;  %v2743_v2 = vadd.f32 %v1990_v27, %v5080_v47  ;;  %v1992_v40 = vpop.f32.mrb[98].mxu0 }
 0x311   : > { %v2807_v57 = vadd.f32 %v2376_v9, %v5084_v42  ;;  %v2378_v17 = vpop.f32.mrb[98].mxu1  ;;  %2517 = vst [vmem:[%s5090_s28 + $0x200] sm:$0xff] %v2742_v38  ;;  %v2744_v52 = vadd.f32 %v1992_v40, %v5072_v63  ;;  %v1994_v60 = vpop.f32.mrb[99].mxu0 }
 0x312   : > { %2519 = vst [vmem:[%s5090_s28 + $0x210] sm:$0xff] %v2806_v34  ;;  %v2808_v0 = vadd.f32 %v2378_v17, %v5076_v8  ;;  %v2380_v51 = vpop.f32.mrb[99].mxu1  ;;  %2518 = vst [vmem:[%s5090_s28 + $0x208] sm:$0xff] %v2743_v2  ;;  %v2745_v22 = vadd.f32 %v1994_v60, %v5080_v47 }
 0x313   : > { %2520 = vst [vmem:[%s5090_s28 + $0x218] sm:$0xff] %v2807_v57  ;;  %v2809_v16 = vadd.f32 %v2380_v51, %v5084_v42  ;;  %2521 = vst [vmem:[%s5090_s28 + $0x220] sm:$0xff] %v2744_v52 }
 0x314   : > { %2523 = vst [vmem:[%s5090_s28 + $0x230] sm:$0xff] %v2808_v0  ;;  %2522 = vst [vmem:[%s5090_s28 + $0x228] sm:$0xff] %v2745_v22 }
 0x315   : > { %2524 = vst [vmem:[%s5090_s28 + $0x238] sm:$0xff] %v2809_v16 }
 0x316   : > { %v1998_v41 = vpop.f32.mrb[100].mxu0 }
 0x317   : > { %v2384_v45 = vpop.f32.mrb[100].mxu1  ;;  %v2746_v4 = vadd.f32 %v1998_v41, %v5072_v63  ;;  %v2000_v44 = vpop.f32.mrb[101].mxu0 }
 0x318   : > { %v2810_v32 = vadd.f32 %v2384_v45, %v5076_v8  ;;  %v2386_v46 = vpop.f32.mrb[101].mxu1  ;;  %v2747_v5 = vadd.f32 %v2000_v44, %v5080_v47  ;;  %v2002_v23 = vpop.f32.mrb[102].mxu0 }
 0x319   : > { %v2811_v1 = vadd.f32 %v2386_v46, %v5084_v42  ;;  %v2388_v35 = vpop.f32.mrb[102].mxu1  ;;  %2525 = vst [vmem:[%s5090_s28 + $0x240] sm:$0xff] %v2746_v4  ;;  %v2748_v61 = vadd.f32 %v2002_v23, %v5072_v63  ;;  %v2004_v43 = vpop.f32.mrb[103].mxu0 }
 0x31a   : > { %2527 = vst [vmem:[%s5090_s28 + $0x250] sm:$0xff] %v2810_v32  ;;  %v2812_v36 = vadd.f32 %v2388_v35, %v5076_v8  ;;  %v2390_v33 = vpop.f32.mrb[103].mxu1  ;;  %2526 = vst [vmem:[%s5090_s28 + $0x248] sm:$0xff] %v2747_v5  ;;  %v2749_v54 = vadd.f32 %v2004_v43, %v5080_v47 }
 0x31b   : > { %2528 = vst [vmem:[%s5090_s28 + $0x258] sm:$0xff] %v2811_v1  ;;  %v2813_v7 = vadd.f32 %v2390_v33, %v5084_v42  ;;  %2529 = vst [vmem:[%s5090_s28 + $0x260] sm:$0xff] %v2748_v61 }
 0x31c   : > { %2531 = vst [vmem:[%s5090_s28 + $0x270] sm:$0xff] %v2812_v36  ;;  %2530 = vst [vmem:[%s5090_s28 + $0x268] sm:$0xff] %v2749_v54 }
 0x31d   : > { %2532 = vst [vmem:[%s5090_s28 + $0x278] sm:$0xff] %v2813_v7 }
 0x31e   : > { %v2008_v58 = vpop.f32.mrb[104].mxu0 }
 0x31f   : > { %v2394_v21 = vpop.f32.mrb[104].mxu1  ;;  %v2750_v19 = vadd.f32 %v2008_v58, %v5072_v63  ;;  %v2010_v31 = vpop.f32.mrb[105].mxu0 }
 0x320   : > { %v2814_v62 = vadd.f32 %v2394_v21, %v5076_v8  ;;  %v2396_v26 = vpop.f32.mrb[105].mxu1  ;;  %v2751_v25 = vadd.f32 %v2010_v31, %v5080_v47  ;;  %v2012_v12 = vpop.f32.mrb[106].mxu0 }
 0x321   : > { %v2815_v56 = vadd.f32 %v2396_v26, %v5084_v42  ;;  %v2398_v24 = vpop.f32.mrb[106].mxu1  ;;  %2533 = vst [vmem:[%s5090_s28 + $0x280] sm:$0xff] %v2750_v19  ;;  %v2752_v37 = vadd.f32 %v2012_v12, %v5072_v63  ;;  %v2014_v20 = vpop.f32.mrb[107].mxu0 }
 0x322   : > { %2535 = vst [vmem:[%s5090_s28 + $0x290] sm:$0xff] %v2814_v62  ;;  %v2816_v15 = vadd.f32 %v2398_v24, %v5076_v8  ;;  %v2400_v13 = vpop.f32.mrb[107].mxu1  ;;  %2534 = vst [vmem:[%s5090_s28 + $0x288] sm:$0xff] %v2751_v25  ;;  %v2753_v48 = vadd.f32 %v2014_v20, %v5080_v47 }
 0x323   : > { %2536 = vst [vmem:[%s5090_s28 + $0x298] sm:$0xff] %v2815_v56  ;;  %v2817_v30 = vadd.f32 %v2400_v13, %v5084_v42  ;;  %2537 = vst [vmem:[%s5090_s28 + $0x2a0] sm:$0xff] %v2752_v37 }
 0x324   : > { %2539 = vst [vmem:[%s5090_s28 + $0x2b0] sm:$0xff] %v2816_v15  ;;  %2538 = vst [vmem:[%s5090_s28 + $0x2a8] sm:$0xff] %v2753_v48 }
 0x325   : > { %2540 = vst [vmem:[%s5090_s28 + $0x2b8] sm:$0xff] %v2817_v30 }
 0x326   : > { %v2018_v6 = vpop.f32.mrb[108].mxu0 }
 0x327   : > { %v2404_v53 = vpop.f32.mrb[108].mxu1  ;;  %v2754_v10 = vadd.f32 %v2018_v6, %v5072_v63  ;;  %v2020_v50 = vpop.f32.mrb[109].mxu0 }
 0x328   : > { %v2818_v18 = vadd.f32 %v2404_v53, %v5076_v8  ;;  %v2406_v59 = vpop.f32.mrb[109].mxu1  ;;  %v2755_v55 = vadd.f32 %v2020_v50, %v5080_v47  ;;  %v2022_v39 = vpop.f32.mrb[110].mxu0 }
 0x329   : > { %v2819_v49 = vadd.f32 %v2406_v59, %v5084_v42  ;;  %v2408_v3 = vpop.f32.mrb[110].mxu1  ;;  %2541 = vst [vmem:[%s5090_s28 + $0x2c0] sm:$0xff] %v2754_v10  ;;  %v2756_v11 = vadd.f32 %v2022_v39, %v5072_v63  ;;  %v2024_v29 = vpop.f32.mrb[111].mxu0 }
 0x32a   : > { %2543 = vst [vmem:[%s5090_s28 + $0x2d0] sm:$0xff] %v2818_v18  ;;  %v2820_v28 = vadd.f32 %v2408_v3, %v5076_v8  ;;  %v2410_v14 = vpop.f32.mrb[111].mxu1  ;;  %2542 = vst [vmem:[%s5090_s28 + $0x2c8] sm:$0xff] %v2755_v55  ;;  %v2757_v38 = vadd.f32 %v2024_v29, %v5080_v47 }
 0x32b   : > { %2544 = vst [vmem:[%s5090_s28 + $0x2d8] sm:$0xff] %v2819_v49  ;;  %v2821_v34 = vadd.f32 %v2410_v14, %v5084_v42  ;;  %2545 = vst [vmem:[%s5090_s28 + $0x2e0] sm:$0xff] %v2756_v11 }
 0x32c   : > { %2547 = vst [vmem:[%s5090_s28 + $0x2f0] sm:$0xff] %v2820_v28  ;;  %2546 = vst [vmem:[%s5090_s28 + $0x2e8] sm:$0xff] %v2757_v38 }
 0x32d   : > { %2548 = vst [vmem:[%s5090_s28 + $0x2f8] sm:$0xff] %v2821_v34 }
 0x32e   : > { %v2028_v27 = vpop.f32.mrb[112].mxu0 }
 0x32f   : > { %v2414_v9 = vpop.f32.mrb[112].mxu1  ;;  %v2758_v2 = vadd.f32 %v2028_v27, %v5072_v63  ;;  %v2030_v40 = vpop.f32.mrb[113].mxu0 }
 0x330   : > { %v2822_v57 = vadd.f32 %v2414_v9, %v5076_v8  ;;  %v2416_v17 = vpop.f32.mrb[113].mxu1  ;;  %v2759_v52 = vadd.f32 %v2030_v40, %v5080_v47  ;;  %v2032_v60 = vpop.f32.mrb[114].mxu0 }
 0x331   : > { %v2823_v0 = vadd.f32 %v2416_v17, %v5084_v42  ;;  %v2418_v51 = vpop.f32.mrb[114].mxu1  ;;  %2549 = vst [vmem:[%s5090_s28 + $0x300] sm:$0xff] %v2758_v2  ;;  %v2760_v22 = vadd.f32 %v2032_v60, %v5072_v63  ;;  %v2034_v41 = vpop.f32.mrb[115].mxu0 }
 0x332   : > { %2551 = vst [vmem:[%s5090_s28 + $0x310] sm:$0xff] %v2822_v57  ;;  %v2824_v16 = vadd.f32 %v2418_v51, %v5076_v8  ;;  %v2420_v45 = vpop.f32.mrb[115].mxu1  ;;  %2550 = vst [vmem:[%s5090_s28 + $0x308] sm:$0xff] %v2759_v52  ;;  %v2761_v4 = vadd.f32 %v2034_v41, %v5080_v47 }
 0x333   : > { %2552 = vst [vmem:[%s5090_s28 + $0x318] sm:$0xff] %v2823_v0  ;;  %v2825_v32 = vadd.f32 %v2420_v45, %v5084_v42  ;;  %2553 = vst [vmem:[%s5090_s28 + $0x320] sm:$0xff] %v2760_v22 }
 0x334   : > { %2555 = vst [vmem:[%s5090_s28 + $0x330] sm:$0xff] %v2824_v16  ;;  %2554 = vst [vmem:[%s5090_s28 + $0x328] sm:$0xff] %v2761_v4 }
 0x335   : > { %2556 = vst [vmem:[%s5090_s28 + $0x338] sm:$0xff] %v2825_v32 }
 0x336   : > { %v2038_v44 = vpop.f32.mrb[116].mxu0 }
 0x337   : > { %v2424_v46 = vpop.f32.mrb[116].mxu1  ;;  %v2762_v5 = vadd.f32 %v2038_v44, %v5072_v63  ;;  %v2040_v23 = vpop.f32.mrb[117].mxu0 }
 0x338   : > { %v2826_v1 = vadd.f32 %v2424_v46, %v5076_v8  ;;  %v2426_v35 = vpop.f32.mrb[117].mxu1  ;;  %v2763_v61 = vadd.f32 %v2040_v23, %v5080_v47  ;;  %v2042_v43 = vpop.f32.mrb[118].mxu0 }
 0x339   : > { %v2827_v36 = vadd.f32 %v2426_v35, %v5084_v42  ;;  %v2428_v33 = vpop.f32.mrb[118].mxu1  ;;  %2557 = vst [vmem:[%s5090_s28 + $0x340] sm:$0xff] %v2762_v5  ;;  %v2764_v54 = vadd.f32 %v2042_v43, %v5072_v63  ;;  %v2044_v58 = vpop.f32.mrb[119].mxu0 }
 0x33a   : > { %2559 = vst [vmem:[%s5090_s28 + $0x350] sm:$0xff] %v2826_v1  ;;  %v2828_v7 = vadd.f32 %v2428_v33, %v5076_v8  ;;  %v2430_v21 = vpop.f32.mrb[119].mxu1  ;;  %2558 = vst [vmem:[%s5090_s28 + $0x348] sm:$0xff] %v2763_v61  ;;  %v2765_v19 = vadd.f32 %v2044_v58, %v5080_v47 }
 0x33b   : > { %2560 = vst [vmem:[%s5090_s28 + $0x358] sm:$0xff] %v2827_v36  ;;  %v2829_v62 = vadd.f32 %v2430_v21, %v5084_v42  ;;  %2561 = vst [vmem:[%s5090_s28 + $0x360] sm:$0xff] %v2764_v54 }
 0x33c   : > { %2563 = vst [vmem:[%s5090_s28 + $0x370] sm:$0xff] %v2828_v7  ;;  %2562 = vst [vmem:[%s5090_s28 + $0x368] sm:$0xff] %v2765_v19 }
 0x33d   : > { %2564 = vst [vmem:[%s5090_s28 + $0x378] sm:$0xff] %v2829_v62 }
 0x33e   : > { %v2048_v31 = vpop.f32.mrb[120].mxu0 }
 0x33f   : > { %v2434_v26 = vpop.f32.mrb[120].mxu1  ;;  %v2766_v25 = vadd.f32 %v2048_v31, %v5072_v63  ;;  %v2050_v12 = vpop.f32.mrb[121].mxu0 }
 0x340   : > { %v2830_v56 = vadd.f32 %v2434_v26, %v5076_v8  ;;  %v2436_v24 = vpop.f32.mrb[121].mxu1  ;;  %v2767_v37 = vadd.f32 %v2050_v12, %v5080_v47  ;;  %v2052_v20 = vpop.f32.mrb[122].mxu0 }
 0x341   : > { %v2831_v15 = vadd.f32 %v2436_v24, %v5084_v42  ;;  %v2438_v13 = vpop.f32.mrb[122].mxu1  ;;  %2565 = vst [vmem:[%s5090_s28 + $0x380] sm:$0xff] %v2766_v25  ;;  %v2768_v48 = vadd.f32 %v2052_v20, %v5072_v63  ;;  %v2054_v6 = vpop.f32.mrb[123].mxu0 }
 0x342   : > { %2567 = vst [vmem:[%s5090_s28 + $0x390] sm:$0xff] %v2830_v56  ;;  %v2832_v30 = vadd.f32 %v2438_v13, %v5076_v8  ;;  %v2440_v53 = vpop.f32.mrb[123].mxu1  ;;  %2566 = vst [vmem:[%s5090_s28 + $0x388] sm:$0xff] %v2767_v37  ;;  %v2769_v10 = vadd.f32 %v2054_v6, %v5080_v47 }
 0x343   : > { %2568 = vst [vmem:[%s5090_s28 + $0x398] sm:$0xff] %v2831_v15  ;;  %v2833_v18 = vadd.f32 %v2440_v53, %v5084_v42  ;;  %2569 = vst [vmem:[%s5090_s28 + $0x3a0] sm:$0xff] %v2768_v48 }
 0x344   : > { %2571 = vst [vmem:[%s5090_s28 + $0x3b0] sm:$0xff] %v2832_v30  ;;  %2570 = vst [vmem:[%s5090_s28 + $0x3a8] sm:$0xff] %v2769_v10 }
 0x345   : > { %2572 = vst [vmem:[%s5090_s28 + $0x3b8] sm:$0xff] %v2833_v18 }
 0x346   : > { %v2058_v50 = vpop.f32.mrb[124].mxu0 }
 0x347   : > { %v2444_v59 = vpop.f32.mrb[124].mxu1  ;;  %v2770_v55 = vadd.f32 %v2058_v50, %v5072_v63  ;;  %v2060_v39 = vpop.f32.mrb[125].mxu0 }
 0x348   : > { %v2834_v49 = vadd.f32 %v2444_v59, %v5076_v8  ;;  %v2446_v3 = vpop.f32.mrb[125].mxu1  ;;  %v2771_v11 = vadd.f32 %v2060_v39, %v5080_v47  ;;  %v2062_v29 = vpop.f32.mrb[126].mxu0 }
 0x349   : > { %v2835_v28 = vadd.f32 %v2446_v3, %v5084_v42  ;;  %v2448_v14 = vpop.f32.mrb[126].mxu1  ;;  %2573 = vst [vmem:[%s5090_s28 + $0x3c0] sm:$0xff] %v2770_v55  ;;  %v2772_v38 = vadd.f32 %v2062_v29, %v5072_v63  ;;  %v2064_v27 = vpop.f32.mrb[127].mxu0 }
 0x34a   : > { %2575 = vst [vmem:[%s5090_s28 + $0x3d0] sm:$0xff] %v2834_v49  ;;  %v2836_v34 = vadd.f32 %v2448_v14, %v5076_v8  ;;  %v2450_v9 = vpop.f32.mrb[127].mxu1  ;;  %2574 = vst [vmem:[%s5090_s28 + $0x3c8] sm:$0xff] %v2771_v11  ;;  %v2773_v2 = vadd.f32 %v2064_v27, %v5080_v47 }
 0x34b   : > { %2576 = vst [vmem:[%s5090_s28 + $0x3d8] sm:$0xff] %v2835_v28  ;;  %v2837_v63 = vadd.f32 %v2450_v9, %v5084_v42  ;;  %2577 = vst [vmem:[%s5090_s28 + $0x3e0] sm:$0xff] %v2772_v38 }
 0x34c   : > { %2579 = vst [vmem:[%s5090_s28 + $0x3f0] sm:$0xff] %v2836_v34  ;;  %2578 = vst [vmem:[%s5090_s28 + $0x3e8] sm:$0xff] %v2773_v2 }
 0x34d   : > { %2580 = vst [vmem:[%s5090_s28 + $0x3f8] sm:$0xff] %v2837_v63 }
 0x34e   : > { %3139 = shalt.err (!%p3136_p2)
}
 0x34f   : > { %s3140_s24 = scalar_lea.hbm %s5341_s9, 16384  ;;  %s3144_s10 = scalar_lea.hbm %s5400_s5, 32768 }
 0x350   : > { %p3141_p13 = scmp.ne.s32.totalorder %s5341_s9, %s3140_s24  ;;  %p3145_p4 = scmp.lt.u32.totalorder %s5341_s9, %s5400_s5 }
 0x351   : > { %p3146_p5 = scmp.lt.u32.totalorder %s3144_s10, %s3140_s24  ;;  %p3148_p11 = scmp.lt.u32.totalorder %s3140_s24, %s5341_s9 }
 0x352   : > { %p3142_p6 = pnand %p3141_p13, %p5543_p0 }
 0x353   : > { %p3147_p8 = por %p3146_p5, %p3145_p4 }
 0x354   : > { %p3143_p10 = pneg %p3142_p6 }
 0x355   : > { %p3149_p1 = por %p3148_p11, %p3147_p8 }
 0x357   : > { %p3150_p3 = pnand %p3149_p1, %p3143_p10 }
 0x359   : > { %3153 = shalt.err (!%p3150_p3)
}
 0x35a   : > { %s3207_s30 = smov 512   ;;  %s3208_s22 = smov 32  }
 0x35b   : > { %2976 = dma.vmem_to_hbm [thread:$0]  (%p5543_p0), %s5343_s15, 16384, %s5341_s9, %s2582_s12, %s3207_s30, %s3207_s30, %s3208_s22  }
 0x35c PF: > { %s2611_s16 = sand.u32 1, %s3184_s18   ;;  %p5544_p7 = scmp.ne.s32.totalorder %s5423_s25, 0 }
 0x35d   : > { %p5545_p9 = scmp.ge.s32.totalorder %s3196_s21, 2  ;;  %s2612_s13 = scalar_lea.sflag [#allocation4], %s2611_s16 }
 0x35f   : > { %p2990_p12 = pnand %p5545_p9, %p5544_p7 }
 0x361   : > { %3179 = dma.done.wait (!%p2990_p12), %s2612_s13, 16384  }
 0x362   : > { %3181 = vsyncadd (!%p2990_p12), %s2612_s13, 4294950912  ;;  %p19_p2 = scmp.ge.s32.totalorder %s3349_s14, 4   ;;  %s5546_s18 = smov %s3188_s19 }
 0x363   : > { %s5547_s19 = smov %s3192_s20  ;;  %s5548_s20 = smov %s3365_s27 }
 0x364   : > { %s5549_s21 = smov %s3349_s14  ;;  %21 = sbr.rel (!%p19_p2) target bundleno = 6 (0x6), region = 93 }
 0x36b   :  { %2617 = vsyncpa [#allocation3], 1 }
 0x36c   :  { %2619 = vsyncpa [#allocation3 + $0x1], 1 }
 0x36d   :  { %2620 = vsyncpa [#allocation6], 1 }
 0x36e   :  { %2621 = vsyncpa [#allocation4], 1 }
 0x36f   :  { %2623 = vsyncpa [#allocation4 + $0x1], 1 }

</bundles_post_ra>
